<compile_context>
chip_gen: v5e
topology: v5e:2x2
jax: 0.10.0
libtpu: 0.0.40
codegen_flags: <defaults>
</compile_context>

<pallas_src>
import jax
import jax.numpy as jnp
import numpy as np
from jax.experimental import pallas as pl
from jax.experimental.pallas import tpu as pltpu

# ----------------------------- model sizes -----------------------------------
VOCAB = 50
VOCAB_PAD = 64    # embedding table padded with zero rows (nice MXU K dim)
TAGSET = 8
OUT_PAD = 128     # lane-dense output width (wrapper slices [:, :TAGSET])
EMB = 64          # embedding_dim
HID = 64          # hidden_dim
B = 4             # real batch
BP = 8            # batch padded to one full sublane group
T = 12            # max sequence length in the input
TBP = T * BP


# ----------------------------- Pallas kernel ----------------------------------
def _bilstm_fused_kernel(tokf_ref, tokr_ref, projf_ref, projr_ref, b_ref,
                         whh_ref, wfcf_ref, wfcr_ref, bfc_ref, out_ref,
                         gx_scr, msel_scr, fbuf, rbuf):
    """Whole BiLSTMTagger forward in one kernel.

    tokf_ref : [T*BP, 1] int32 tokens, time-major (row = t*BP + b)
    tokr_ref : [T*BP, 1] int32 time-reversed tokens
    projf_ref: [VOCAB_PAD, 8H] bf16  (table @ W_ih_fwd) in fused gate slots
    projr_ref: [VOCAB_PAD, 8H] bf16  (table @ W_ih_rev) in fused gate slots
    b_ref    : [1, 8H] f32 packed gate biases (b_ih + b_hh, both directions)
    whh_ref  : [2H, 8H] bf16 block-diagonal recurrent weights
    wfcf_ref : [2H, OUT_PAD] bf16 (rows H: zero)   wfcr_ref: rows :H zero
    bfc_ref  : [1, OUT_PAD] f32
    out_ref  : [T*BP, OUT_PAD] f32 logits, time-major
    gx_scr   : VMEM [T*BP, 8H] f32   direction-selected input projections
    msel_scr : VMEM [T*BP, 2H] i32   direction-selected validity mask
    fbuf/rbuf: VMEM [T*BP, 2H] f32   step outputs indexed by fwd / rev timestep
    """
    H = HID
    tok_f = tokf_ref[...]                                          # [TBP,1] i32
    tok_r = tokr_ref[...]

    # ---- fused embedding-lookup + input projection for all steps, both dirs --
    vocab_iota = jax.lax.broadcasted_iota(jnp.int32, (TBP, VOCAB_PAD), 1)
    oh_f = (tok_f == vocab_iota).astype(jnp.bfloat16)              # [TBP, Vp]
    oh_r = (tok_r == vocab_iota).astype(jnp.bfloat16)
    gx_scr[...] = (
        jnp.dot(oh_f, projf_ref[...], preferred_element_type=jnp.float32)
        + jnp.dot(oh_r, projr_ref[...], preferred_element_type=jnp.float32)
        + b_ref[...])                                              # [TBP, 8H]

    # ---- direction-selected freeze mask for all steps (hoisted out of loop) --
    lane2 = jax.lax.broadcasted_iota(jnp.int32, (TBP, 2 * H), 1)
    msel_scr[...] = jnp.where(lane2 < H, tok_f, tok_r)             # nonzero=valid

    # loop-invariant recurrent weights (bf16, block-diagonal)
    whh = whh_ref[...]

    # lane-stacked state: [hf | hr], [cf | cr]  -> exactly one vreg each
    h = jnp.zeros((BP, 2 * H), jnp.float32)
    c = jnp.zeros((BP, 2 * H), jnp.float32)

    # ---- time recurrence, fully unrolled (static indices) ----
    for s in range(T):
        r0 = s * BP                 # forward-direction row block (timestep s)
        q0 = (T - 1 - s) * BP       # reverse-direction row block (timestep T-1-s)

        gates = (jnp.dot(h.astype(jnp.bfloat16), whh,
                         preferred_element_type=jnp.float32)
                 + gx_scr[r0:r0 + BP, :])                          # [BP, 8H]

        # 128-lane-aligned slabs: sigmoid on [i|f|o] (both dirs), tanh on [g]
        sig = jax.nn.sigmoid(gates[:, :6 * H])
        i_g = sig[:, 0 * H:2 * H]
        f_g = sig[:, 2 * H:4 * H]
        o_g = sig[:, 4 * H:6 * H]
        g_g = jnp.tanh(gates[:, 6 * H:8 * H])

        c_new = f_g * c + i_g * g_g
        h_new = o_g * jnp.tanh(c_new)

        # packed-sequence semantics: freeze state / zero output past lengths
        m = msel_scr[r0:r0 + BP, :] != 0                           # bool [BP,2H]
        c = jnp.where(m, c_new, c)
        h = jnp.where(m, h_new, h)
        h_out = jnp.where(m, h_new, 0.0)

        # full-lane (8,128) unmasked stores; fwd half valid in fbuf[t-block],
        # rev half valid in rbuf[rt-block] -- FC weights zero out the rest.
        fbuf[r0:r0 + BP, :] = h_out
        rbuf[q0:q0 + BP, :] = h_out

    # ---- fused FC epilogue, lane-dense output ----
    out_ref[...] = (
        jnp.dot(fbuf[...].astype(jnp.bfloat16), wfcf_ref[...],
                preferred_element_type=jnp.float32)
        + jnp.dot(rbuf[...].astype(jnp.bfloat16), wfcr_ref[...],
                  preferred_element_type=jnp.float32)
        + bfc_ref[...])


# ----------------------------- one-time weight packing -------------------------
def pack_params(params):
    """Build all packed / bf16 kernel weights ONCE (hoisted out of the forward).

    Fused gate-column order (each H wide): i_f,i_r,f_f,f_r,o_f,o_r,g_f,g_r,
    so sigmoid covers lanes [0,6H) and tanh covers [6H,8H), all 128-aligned.
    PyTorch per-direction gate order is (i, f, g, o)."""
    P = jax.lax.Precision.HIGHEST
    H = HID

    table = jnp.zeros((VOCAB_PAD, EMB), jnp.float32)
    table = table.at[:VOCAB].set(params["embedding"].astype(jnp.float32))

    def expand_dir(w4, d):
        """[*,4H] (torch order i,f,g,o) -> [*,8H] fused slots, other dir zeroed."""
        Z = jnp.zeros(w4.shape[:-1] + (H,), jnp.float32)
        chunks = []
        for gidx in (0, 1, 3, 2):            # fused slot order: i, f, o, g
            g = w4[..., gidx * H:(gidx + 1) * H]
            chunks += ([g, Z] if d == 0 else [Z, g])
        return jnp.concatenate(chunks, axis=-1)

    # embedding lookup fused with the input projection (high-precision precompute)
    projF = expand_dir(jnp.dot(table, params["wih_f"], precision=P), 0)
    projR = expand_dir(jnp.dot(table, params["wih_r"], precision=P), 1)
    b512 = expand_dir(params["b_f"], 0) + expand_dir(params["b_r"], 1)
    whh = jnp.concatenate([expand_dir(params["whh_f"], 0),
                           expand_dir(params["whh_r"], 1)], axis=0)   # [2H, 8H]

    wfcF = jnp.zeros((2 * H, OUT_PAD), jnp.float32)
    wfcF = wfcF.at[:H, :TAGSET].set(params["w_fc"][:H])
    wfcR = jnp.zeros((2 * H, OUT_PAD), jnp.float32)
    wfcR = wfcR.at[H:, :TAGSET].set(params["w_fc"][H:])
    bfc = jnp.zeros((1, OUT_PAD), jnp.float32).at[:, :TAGSET].set(params["b_fc"])

    return {
        "projF": projF.astype(jnp.bfloat16),
        "projR": projR.astype(jnp.bfloat16),
        "b512": b512,                          # f32 (added after f32 accumulation)
        "whh": whh.astype(jnp.bfloat16),
        "wfcF": wfcF.astype(jnp.bfloat16),
        "wfcR": wfcR.astype(jnp.bfloat16),
        "bfc": bfc,
    }


# ----------------------------- wrapper ----------------------------------------
@jax.jit
def bilstm_tagger_forward(x_tokens, packed):
    """x_tokens: int32 [B, T]. packed: output of pack_params (built once).
    Returns logits [B, T, TAGSET] (full T; caller truncates to max(lengths))."""
    x = x_tokens.astype(jnp.int32)
    # time-major, batch padded to BP=8 rows per step with padding token 0
    xt = jnp.zeros((T, BP), jnp.int32).at[:, :B].set(x.T)            # [T, BP]
    tok_f = xt.reshape(TBP, 1)
    tok_r = xt[::-1, :].reshape(TBP, 1)                              # time-reversed

    out = pl.pallas_call(
        _bilstm_fused_kernel,
        out_shape=jax.ShapeDtypeStruct((TBP, OUT_PAD), jnp.float32),
        scratch_shapes=[
            pltpu.VMEM((TBP, 8 * HID), jnp.float32),   # gx (direction-selected)
            pltpu.VMEM((TBP, 2 * HID), jnp.int32),     # freeze-mask tokens
            pltpu.VMEM((TBP, 2 * HID), jnp.float32),   # fwd-indexed step outputs
            pltpu.VMEM((TBP, 2 * HID), jnp.float32),   # rev-indexed step outputs
        ],
    )(tok_f, tok_r, packed["projF"], packed["projR"], packed["b512"],
      packed["whh"], packed["wfcF"], packed["wfcR"], packed["bfc"])

    # [T*BP, OUT_PAD] time-major -> [B, T, TAGSET]
    return out.reshape(T, BP, OUT_PAD)[:, :B, :TAGSET].transpose(1, 0, 2)


# ----------------------------- reference (pure JAX, f32) -----------------------
def _ref_direction(emb, mask, wih, whh, b, reverse):
    P = jax.lax.Precision.HIGHEST
    h = jnp.zeros((B, HID), jnp.float32)
    c = jnp.zeros((B, HID), jnp.float32)
    out = [None] * T
    order = range(T - 1, -1, -1) if reverse else range(T)
    for t in order:
        x = emb[:, t, :]
        m = mask[:, t][:, None].astype(jnp.float32)
        g = jnp.dot(x, wih, precision=P) + jnp.dot(h, whh, precision=P) + b
        i_g = jax.nn.sigmoid(g[:, :HID])
        f_g = jax.nn.sigmoid(g[:, HID:2 * HID])
        g_g = jnp.tanh(g[:, 2 * HID:3 * HID])
        o_g = jax.nn.sigmoid(g[:, 3 * HID:])
        c_new = f_g * c + i_g * g_g
        h_new = o_g * jnp.tanh(c_new)
        c = m * c_new + (1.0 - m) * c
        h = m * h_new + (1.0 - m) * h
        out[t] = h * m
    return jnp.stack(out, axis=1)


def reference_forward(x_tokens, params):
    P = jax.lax.Precision.HIGHEST
    emb = params["embedding"][x_tokens].astype(jnp.float32)
    mask = (x_tokens != 0)
    hf = _ref_direction(emb, mask, params["wih_f"], params["whh_f"],
                        params["b_f"], reverse=False)
    hr = _ref_direction(emb, mask, params["wih_r"], params["whh_r"],
                        params["b_r"], reverse=True)
    h = jnp.concatenate([hf, hr], axis=-1)
    return jnp.dot(h, params["w_fc"], precision=P) + params["b_fc"]


# ----------------------------- parameter init ---------------------------------
def init_params(key):
    ks = jax.random.split(key, 12)
    k = 1.0 / np.sqrt(HID)
    u = lambda kk, shp: jax.random.uniform(kk, shp, jnp.float32, -k, k)
    emb = jax.random.normal(ks[0], (VOCAB, EMB), jnp.float32)
    emb = emb.at[0].set(0.0)  # padding_idx=0
    params = {
        "embedding": emb,
        # stored transposed for x @ W: [E, 4H], [H, 4H], gate order i, f, g, o
        "wih_f": u(ks[1], (EMB, 4 * HID)),
        "whh_f": u(ks[2], (HID, 4 * HID)),
        "b_f": (u(ks[3], (1, 4 * HID)) + u(ks[4], (1, 4 * HID))),  # b_ih + b_hh
        "wih_r": u(ks[5], (EMB, 4 * HID)),
        "whh_r": u(ks[6], (HID, 4 * HID)),
        "b_r": (u(ks[7], (1, 4 * HID)) + u(ks[8], (1, 4 * HID))),
        "w_fc": jax.random.uniform(ks[9], (2 * HID, TAGSET), jnp.float32,
                                   -1.0 / np.sqrt(2 * HID), 1.0 / np.sqrt(2 * HID)),
        "b_fc": jax.random.uniform(ks[10], (1, TAGSET), jnp.float32,
                                   -1.0 / np.sqrt(2 * HID), 1.0 / np.sqrt(2 * HID)),
    }
    return params


# ----------------------------- main --------------------------------------------
if __name__ == "__main__":
    key = jax.random.PRNGKey(0)
    params = init_params(key)
    packed = pack_params(params)          # one-time packing, NOT in the forward

    # deterministic tokens with varying lengths (one sequence spans full T so
    # that pad_packed_sequence's max length equals T)
    lengths = jnp.array([T, 9, 5, 7], dtype=jnp.int32)
    tok_key = jax.random.fold_in(key, 123)
    tokens = jax.random.randint(tok_key, (B, T), 1, VOCAB, dtype=jnp.int32)
    pos = jnp.arange(T, dtype=jnp.int32)[None, :]
    x = jnp.where(pos < lengths[:, None], tokens, 0).astype(jnp.int32)

    out_full = jax.block_until_ready(bilstm_tagger_forward(x, packed))

    # pad_packed_sequence truncates the time axis to max(lengths)
    t_max = int(jnp.max(jnp.sum(x != 0, axis=1)))
    out = np.asarray(out_full)[:, :t_max, :]                  # [B, max_len, TAGSET]

    # correctness check against a pure-JAX f32 reference. Tolerance loosened
    # deliberately: the kernel uses bf16 MXU inputs (f32 state/accumulation),
    # whose rounding compounds over the T-step recurrence (perf-review note).
    ref = np.asarray(reference_forward(x, params))[:, :t_max, :]
    np.testing.assert_allclose(out, ref, rtol=5e-2, atol=5e-2)

    print("KERNEL_OK")
</pallas_src>

<mosaic_0001>
module attributes {stable_mosaic.version = 11 : i64} {
  func.func @_bilstm_fused_kernel(%arg0: memref<96x1xi32, #tpu.memory_space<vmem>>, %arg1: memref<96x1xi32, #tpu.memory_space<vmem>>, %arg2: memref<64x512xbf16, #tpu.memory_space<vmem>>, %arg3: memref<64x512xbf16, #tpu.memory_space<vmem>>, %arg4: memref<1x512xf32, #tpu.memory_space<vmem>>, %arg5: memref<128x512xbf16, #tpu.memory_space<vmem>>, %arg6: memref<128x128xbf16, #tpu.memory_space<vmem>>, %arg7: memref<128x128xbf16, #tpu.memory_space<vmem>>, %arg8: memref<1x128xf32, #tpu.memory_space<vmem>>, %arg9: memref<96x128xf32, #tpu.memory_space<vmem>>, %arg10: memref<96x512xf32, #tpu.memory_space<vmem>>, %arg11: memref<96x128xi32, #tpu.memory_space<vmem>>, %arg12: memref<96x128xf32, #tpu.memory_space<vmem>>, %arg13: memref<96x128xf32, #tpu.memory_space<vmem>>) attributes {dimension_semantics = [], scalar_prefetch = 0 : i64, scratch_operands = 4 : i64, tpu.core_type = #tpu.core_type<tc>} {
    %c0 = arith.constant 0 : index
    %c0_0 = arith.constant 0 : index
    %0 = vector.load %arg0[%c0, %c0_0] : memref<96x1xi32, #tpu.memory_space<vmem>>, vector<96x1xi32>
    %c0_1 = arith.constant 0 : index
    %c0_2 = arith.constant 0 : index
    %1 = vector.load %arg1[%c0_1, %c0_2] : memref<96x1xi32, #tpu.memory_space<vmem>>, vector<96x1xi32>
    %2 = tpu.iota {dimensions = array<i32: 1>} : vector<96x64xi32>
    %3 = vector.broadcast %0 : vector<96x1xi32> to vector<96x64xi32>
    %4 = arith.cmpi eq, %3, %2 : vector<96x64xi32>
    %5 = arith.extui %4 : vector<96x64xi1> to vector<96x64xi32>
    %6 = arith.sitofp %5 : vector<96x64xi32> to vector<96x64xf32>
    %7 = arith.truncf %6 : vector<96x64xf32> to vector<96x64xbf16>
    %8 = vector.broadcast %1 : vector<96x1xi32> to vector<96x64xi32>
    %9 = arith.cmpi eq, %8, %2 : vector<96x64xi32>
    %10 = arith.extui %9 : vector<96x64xi1> to vector<96x64xi32>
    %11 = arith.sitofp %10 : vector<96x64xi32> to vector<96x64xf32>
    %12 = arith.truncf %11 : vector<96x64xf32> to vector<96x64xbf16>
    %c0_3 = arith.constant 0 : index
    %c0_4 = arith.constant 0 : index
    %13 = vector.load %arg2[%c0_3, %c0_4] : memref<64x512xbf16, #tpu.memory_space<vmem>>, vector<64x512xbf16>
    %cst = arith.constant dense<0.000000e+00> : vector<96x512xf32>
    %14 = tpu.matmul %7, %13, %cst {dimension_numbers = #tpu.dot_dimension_numbers<[1], [0], [0], [1], [0, 0, 1, 1], [], []>} : vector<96x64xbf16>, vector<64x512xbf16>, vector<96x512xf32> -> vector<96x512xf32>
    %c0_5 = arith.constant 0 : index
    %c0_6 = arith.constant 0 : index
    %15 = vector.load %arg3[%c0_5, %c0_6] : memref<64x512xbf16, #tpu.memory_space<vmem>>, vector<64x512xbf16>
    %cst_7 = arith.constant dense<0.000000e+00> : vector<96x512xf32>
    %16 = tpu.matmul %12, %15, %cst_7 {dimension_numbers = #tpu.dot_dimension_numbers<[1], [0], [0], [1], [0, 0, 1, 1], [], []>} : vector<96x64xbf16>, vector<64x512xbf16>, vector<96x512xf32> -> vector<96x512xf32>
    %17 = arith.addf %14, %16 : vector<96x512xf32>
    %c0_8 = arith.constant 0 : index
    %c0_9 = arith.constant 0 : index
    %18 = vector.load %arg4[%c0_8, %c0_9] : memref<1x512xf32, #tpu.memory_space<vmem>>, vector<1x512xf32>
    %19 = vector.broadcast %18 : vector<1x512xf32> to vector<96x512xf32>
    %20 = arith.addf %17, %19 : vector<96x512xf32>
    %c0_10 = arith.constant 0 : index
    %c0_11 = arith.constant 0 : index
    %21 = vector.load %arg10[%c0_10, %c0_11] : memref<96x512xf32, #tpu.memory_space<vmem>>, vector<96x512xf32>
    tpu.vector_store %arg10[%c0_10, %c0_11], %20 {strides = array<i32>} : memref<96x512xf32, #tpu.memory_space<vmem>>, vector<96x512xf32>,
    %22 = tpu.iota {dimensions = array<i32: 1>} : vector<96x128xi32>
    %c64_i32 = arith.constant 64 : i32
    %23 = vector.broadcast %c64_i32 : i32 to vector<96x128xi32>
    %24 = arith.cmpi slt, %22, %23 : vector<96x128xi32>
    %25 = vector.shape_cast %0 : vector<96x1xi32> to vector<96x1xi32>
    %26 = vector.broadcast %25 : vector<96x1xi32> to vector<96x128xi32>
    %27 = vector.shape_cast %1 : vector<96x1xi32> to vector<96x1xi32>
    %28 = vector.broadcast %27 : vector<96x1xi32> to vector<96x128xi32>
    %29 = arith.select %24, %26, %28 : vector<96x128xi1>, vector<96x128xi32>
    %c0_12 = arith.constant 0 : index
    %c0_13 = arith.constant 0 : index
    %30 = vector.load %arg11[%c0_12, %c0_13] : memref<96x128xi32, #tpu.memory_space<vmem>>, vector<96x128xi32>
    tpu.vector_store %arg11[%c0_12, %c0_13], %29 {strides = array<i32>} : memref<96x128xi32, #tpu.memory_space<vmem>>, vector<96x128xi32>,
    %c0_14 = arith.constant 0 : index
    %c0_15 = arith.constant 0 : index
    %31 = vector.load %arg5[%c0_14, %c0_15] : memref<128x512xbf16, #tpu.memory_space<vmem>>, vector<128x512xbf16>
    %cst_16 = arith.constant 0.000000e+00 : f32
    %32 = vector.broadcast %cst_16 : f32 to vector<8x128xf32>
    %cst_17 = arith.constant 0.000000e+00 : f32
    %33 = vector.broadcast %cst_17 : f32 to vector<8x128xf32>
    %34 = arith.truncf %32 : vector<8x128xf32> to vector<8x128xbf16>
    %cst_18 = arith.constant dense<0.000000e+00> : vector<8x512xf32>
    %35 = tpu.matmul %34, %31, %cst_18 {dimension_numbers = #tpu.dot_dimension_numbers<[1], [0], [0], [1], [0, 0, 1, 1], [], []>} : vector<8x128xbf16>, vector<128x512xbf16>, vector<8x512xf32> -> vector<8x512xf32>
    %c0_19 = arith.constant 0 : index
    %c0_20 = arith.constant 0 : index
    %36 = vector.load %arg10[%c0_19, %c0_20] : memref<96x512xf32, #tpu.memory_space<vmem>>, vector<8x512xf32>
    %37 = arith.addf %35, %36 : vector<8x512xf32>
    %38 = vector.extract_strided_slice %37 {offsets = [0, 0], sizes = [8, 384], strides = [1, 1]} : vector<8x512xf32> to vector<8x384xf32>
    %39 = arith.negf %38 : vector<8x384xf32>
    %40 = math.exp %39 : vector<8x384xf32>
    %cst_21 = arith.constant 1.000000e+00 : f32
    %41 = vector.broadcast %cst_21 : f32 to vector<8x384xf32>
    %42 = arith.addf %41, %40 : vector<8x384xf32>
    %43 = arith.divf %41, %42 : vector<8x384xf32>
    %44 = vector.extract_strided_slice %43 {offsets = [0, 0], sizes = [8, 128], strides = [1, 1]} : vector<8x384xf32> to vector<8x128xf32>
    %45 = vector.extract_strided_slice %43 {offsets = [0, 128], sizes = [8, 128], strides = [1, 1]} : vector<8x384xf32> to vector<8x128xf32>
    %46 = vector.extract_strided_slice %43 {offsets = [0, 256], sizes = [8, 128], strides = [1, 1]} : vector<8x384xf32> to vector<8x128xf32>
    %47 = vector.extract_strided_slice %37 {offsets = [0, 384], sizes = [8, 128], strides = [1, 1]} : vector<8x512xf32> to vector<8x128xf32>
    %48 = math.tanh %47 : vector<8x128xf32>
    %49 = arith.mulf %45, %33 : vector<8x128xf32>
    %50 = arith.mulf %44, %48 : vector<8x128xf32>
    %51 = arith.addf %49, %50 : vector<8x128xf32>
    %52 = math.tanh %51 : vector<8x128xf32>
    %53 = arith.mulf %46, %52 : vector<8x128xf32>
    %c0_22 = arith.constant 0 : index
    %c0_23 = arith.constant 0 : index
    %54 = vector.load %arg11[%c0_22, %c0_23] : memref<96x128xi32, #tpu.memory_space<vmem>>, vector<8x128xi32>
    %c0_i32 = arith.constant 0 : i32
    %55 = vector.broadcast %c0_i32 : i32 to vector<8x128xi32>
    %56 = arith.cmpi ne, %54, %55 : vector<8x128xi32>
    %57 = arith.select %56, %51, %33 : vector<8x128xi1>, vector<8x128xf32>
    %58 = arith.select %56, %53, %32 : vector<8x128xi1>, vector<8x128xf32>
    %cst_24 = arith.constant 0.000000e+00 : f32
    %59 = vector.broadcast %cst_24 : f32 to vector<8x128xf32>
    %60 = arith.select %56, %53, %59 : vector<8x128xi1>, vector<8x128xf32>
    %c0_25 = arith.constant 0 : index
    %c0_26 = arith.constant 0 : index
    %61 = vector.load %arg12[%c0_25, %c0_26] : memref<96x128xf32, #tpu.memory_space<vmem>>, vector<8x128xf32>
    tpu.vector_store %arg12[%c0_25, %c0_26], %60 {strides = array<i32>} : memref<96x128xf32, #tpu.memory_space<vmem>>, vector<8x128xf32>,
    %c88 = arith.constant 88 : index
    %c0_27 = arith.constant 0 : index
    %62 = vector.load %arg13[%c88, %c0_27] : memref<96x128xf32, #tpu.memory_space<vmem>>, vector<8x128xf32>
    tpu.vector_store %arg13[%c88, %c0_27], %60 {strides = array<i32>} : memref<96x128xf32, #tpu.memory_space<vmem>>, vector<8x128xf32>,
    %63 = arith.truncf %58 : vector<8x128xf32> to vector<8x128xbf16>
    %cst_28 = arith.constant dense<0.000000e+00> : vector<8x512xf32>
    %64 = tpu.matmul %63, %31, %cst_28 {dimension_numbers = #tpu.dot_dimension_numbers<[1], [0], [0], [1], [0, 0, 1, 1], [], []>} : vector<8x128xbf16>, vector<128x512xbf16>, vector<8x512xf32> -> vector<8x512xf32>
    %c8 = arith.constant 8 : index
    %c0_29 = arith.constant 0 : index
    %65 = vector.load %arg10[%c8, %c0_29] : memref<96x512xf32, #tpu.memory_space<vmem>>, vector<8x512xf32>
    %66 = arith.addf %64, %65 : vector<8x512xf32>
    %67 = vector.extract_strided_slice %66 {offsets = [0, 0], sizes = [8, 384], strides = [1, 1]} : vector<8x512xf32> to vector<8x384xf32>
    %68 = arith.negf %67 : vector<8x384xf32>
    %69 = math.exp %68 : vector<8x384xf32>
    %cst_30 = arith.constant 1.000000e+00 : f32
    %70 = vector.broadcast %cst_30 : f32 to vector<8x384xf32>
    %71 = arith.addf %70, %69 : vector<8x384xf32>
    %72 = arith.divf %70, %71 : vector<8x384xf32>
    %73 = vector.extract_strided_slice %72 {offsets = [0, 0], sizes = [8, 128], strides = [1, 1]} : vector<8x384xf32> to vector<8x128xf32>
    %74 = vector.extract_strided_slice %72 {offsets = [0, 128], sizes = [8, 128], strides = [1, 1]} : vector<8x384xf32> to vector<8x128xf32>
    %75 = vector.extract_strided_slice %72 {offsets = [0, 256], sizes = [8, 128], strides = [1, 1]} : vector<8x384xf32> to vector<8x128xf32>
    %76 = vector.extract_strided_slice %66 {offsets = [0, 384], sizes = [8, 128], strides = [1, 1]} : vector<8x512xf32> to vector<8x128xf32>
    %77 = math.tanh %76 : vector<8x128xf32>
    %78 = arith.mulf %74, %57 : vector<8x128xf32>
    %79 = arith.mulf %73, %77 : vector<8x128xf32>
    %80 = arith.addf %78, %79 : vector<8x128xf32>
    %81 = math.tanh %80 : vector<8x128xf32>
    %82 = arith.mulf %75, %81 : vector<8x128xf32>
    %c8_31 = arith.constant 8 : index
    %c0_32 = arith.constant 0 : index
    %83 = vector.load %arg11[%c8_31, %c0_32] : memref<96x128xi32, #tpu.memory_space<vmem>>, vector<8x128xi32>
    %c0_i32_33 = arith.constant 0 : i32
    %84 = vector.broadcast %c0_i32_33 : i32 to vector<8x128xi32>
    %85 = arith.cmpi ne, %83, %84 : vector<8x128xi32>
    %86 = arith.select %85, %80, %57 : vector<8x128xi1>, vector<8x128xf32>
    %87 = arith.select %85, %82, %58 : vector<8x128xi1>, vector<8x128xf32>
    %cst_34 = arith.constant 0.000000e+00 : f32
    %88 = vector.broadcast %cst_34 : f32 to vector<8x128xf32>
    %89 = arith.select %85, %82, %88 : vector<8x128xi1>, vector<8x128xf32>
    %c8_35 = arith.constant 8 : index
    %c0_36 = arith.constant 0 : index
    %90 = vector.load %arg12[%c8_35, %c0_36] : memref<96x128xf32, #tpu.memory_space<vmem>>, vector<8x128xf32>
    tpu.vector_store %arg12[%c8_35, %c0_36], %89 {strides = array<i32>} : memref<96x128xf32, #tpu.memory_space<vmem>>, vector<8x128xf32>,
    %c80 = arith.constant 80 : index
    %c0_37 = arith.constant 0 : index
    %91 = vector.load %arg13[%c80, %c0_37] : memref<96x128xf32, #tpu.memory_space<vmem>>, vector<8x128xf32>
    tpu.vector_store %arg13[%c80, %c0_37], %89 {strides = array<i32>} : memref<96x128xf32, #tpu.memory_space<vmem>>, vector<8x128xf32>,
    %92 = arith.truncf %87 : vector<8x128xf32> to vector<8x128xbf16>
    %cst_38 = arith.constant dense<0.000000e+00> : vector<8x512xf32>
    %93 = tpu.matmul %92, %31, %cst_38 {dimension_numbers = #tpu.dot_dimension_numbers<[1], [0], [0], [1], [0, 0, 1, 1], [], []>} : vector<8x128xbf16>, vector<128x512xbf16>, vector<8x512xf32> -> vector<8x512xf32>
    %c16 = arith.constant 16 : index
    %c0_39 = arith.constant 0 : index
    %94 = vector.load %arg10[%c16, %c0_39] : memref<96x512xf32, #tpu.memory_space<vmem>>, vector<8x512xf32>
    %95 = arith.addf %93, %94 : vector<8x512xf32>
    %96 = vector.extract_strided_slice %95 {offsets = [0, 0], sizes = [8, 384], strides = [1, 1]} : vector<8x512xf32> to vector<8x384xf32>
    %97 = arith.negf %96 : vector<8x384xf32>
    %98 = math.exp %97 : vector<8x384xf32>
    %cst_40 = arith.constant 1.000000e+00 : f32
    %99 = vector.broadcast %cst_40 : f32 to vector<8x384xf32>
    %100 = arith.addf %99, %98 : vector<8x384xf32>
    %101 = arith.divf %99, %100 : vector<8x384xf32>
    %102 = vector.extract_strided_slice %101 {offsets = [0, 0], sizes = [8, 128], strides = [1, 1]} : vector<8x384xf32> to vector<8x128xf32>
    %103 = vector.extract_strided_slice %101 {offsets = [0, 128], sizes = [8, 128], strides = [1, 1]} : vector<8x384xf32> to vector<8x128xf32>
    %104 = vector.extract_strided_slice %101 {offsets = [0, 256], sizes = [8, 128], strides = [1, 1]} : vector<8x384xf32> to vector<8x128xf32>
    %105 = vector.extract_strided_slice %95 {offsets = [0, 384], sizes = [8, 128], strides = [1, 1]} : vector<8x512xf32> to vector<8x128xf32>
    %106 = math.tanh %105 : vector<8x128xf32>
    %107 = arith.mulf %103, %86 : vector<8x128xf32>
    %108 = arith.mulf %102, %106 : vector<8x128xf32>
    %109 = arith.addf %107, %108 : vector<8x128xf32>
    %110 = math.tanh %109 : vector<8x128xf32>
    %111 = arith.mulf %104, %110 : vector<8x128xf32>
    %c16_41 = arith.constant 16 : index
    %c0_42 = arith.constant 0 : index
    %112 = vector.load %arg11[%c16_41, %c0_42] : memref<96x128xi32, #tpu.memory_space<vmem>>, vector<8x128xi32>
    %c0_i32_43 = arith.constant 0 : i32
    %113 = vector.broadcast %c0_i32_43 : i32 to vector<8x128xi32>
    %114 = arith.cmpi ne, %112, %113 : vector<8x128xi32>
    %115 = arith.select %114, %109, %86 : vector<8x128xi1>, vector<8x128xf32>
    %116 = arith.select %114, %111, %87 : vector<8x128xi1>, vector<8x128xf32>
    %cst_44 = arith.constant 0.000000e+00 : f32
    %117 = vector.broadcast %cst_44 : f32 to vector<8x128xf32>
    %118 = arith.select %114, %111, %117 : vector<8x128xi1>, vector<8x128xf32>
    %c16_45 = arith.constant 16 : index
    %c0_46 = arith.constant 0 : index
    %119 = vector.load %arg12[%c16_45, %c0_46] : memref<96x128xf32, #tpu.memory_space<vmem>>, vector<8x128xf32>
    tpu.vector_store %arg12[%c16_45, %c0_46], %118 {strides = array<i32>} : memref<96x128xf32, #tpu.memory_space<vmem>>, vector<8x128xf32>,
    %c72 = arith.constant 72 : index
    %c0_47 = arith.constant 0 : index
    %120 = vector.load %arg13[%c72, %c0_47] : memref<96x128xf32, #tpu.memory_space<vmem>>, vector<8x128xf32>
    tpu.vector_store %arg13[%c72, %c0_47], %118 {strides = array<i32>} : memref<96x128xf32, #tpu.memory_space<vmem>>, vector<8x128xf32>,
    %121 = arith.truncf %116 : vector<8x128xf32> to vector<8x128xbf16>
    %cst_48 = arith.constant dense<0.000000e+00> : vector<8x512xf32>
    %122 = tpu.matmul %121, %31, %cst_48 {dimension_numbers = #tpu.dot_dimension_numbers<[1], [0], [0], [1], [0, 0, 1, 1], [], []>} : vector<8x128xbf16>, vector<128x512xbf16>, vector<8x512xf32> -> vector<8x512xf32>
    %c24 = arith.constant 24 : index
    %c0_49 = arith.constant 0 : index
    %123 = vector.load %arg10[%c24, %c0_49] : memref<96x512xf32, #tpu.memory_space<vmem>>, vector<8x512xf32>
    %124 = arith.addf %122, %123 : vector<8x512xf32>
    %125 = vector.extract_strided_slice %124 {offsets = [0, 0], sizes = [8, 384], strides = [1, 1]} : vector<8x512xf32> to vector<8x384xf32>
    %126 = arith.negf %125 : vector<8x384xf32>
    %127 = math.exp %126 : vector<8x384xf32>
    %cst_50 = arith.constant 1.000000e+00 : f32
    %128 = vector.broadcast %cst_50 : f32 to vector<8x384xf32>
    %129 = arith.addf %128, %127 : vector<8x384xf32>
    %130 = arith.divf %128, %129 : vector<8x384xf32>
    %131 = vector.extract_strided_slice %130 {offsets = [0, 0], sizes = [8, 128], strides = [1, 1]} : vector<8x384xf32> to vector<8x128xf32>
    %132 = vector.extract_strided_slice %130 {offsets = [0, 128], sizes = [8, 128], strides = [1, 1]} : vector<8x384xf32> to vector<8x128xf32>
    %133 = vector.extract_strided_slice %130 {offsets = [0, 256], sizes = [8, 128], strides = [1, 1]} : vector<8x384xf32> to vector<8x128xf32>
    %134 = vector.extract_strided_slice %124 {offsets = [0, 384], sizes = [8, 128], strides = [1, 1]} : vector<8x512xf32> to vector<8x128xf32>
    %135 = math.tanh %134 : vector<8x128xf32>
    %136 = arith.mulf %132, %115 : vector<8x128xf32>
    %137 = arith.mulf %131, %135 : vector<8x128xf32>
    %138 = arith.addf %136, %137 : vector<8x128xf32>
    %139 = math.tanh %138 : vector<8x128xf32>
    %140 = arith.mulf %133, %139 : vector<8x128xf32>
    %c24_51 = arith.constant 24 : index
    %c0_52 = arith.constant 0 : index
    %141 = vector.load %arg11[%c24_51, %c0_52] : memref<96x128xi32, #tpu.memory_space<vmem>>, vector<8x128xi32>
    %c0_i32_53 = arith.constant 0 : i32
    %142 = vector.broadcast %c0_i32_53 : i32 to vector<8x128xi32>
    %143 = arith.cmpi ne, %141, %142 : vector<8x128xi32>
    %144 = arith.select %143, %138, %115 : vector<8x128xi1>, vector<8x128xf32>
    %145 = arith.select %143, %140, %116 : vector<8x128xi1>, vector<8x128xf32>
    %cst_54 = arith.constant 0.000000e+00 : f32
    %146 = vector.broadcast %cst_54 : f32 to vector<8x128xf32>
    %147 = arith.select %143, %140, %146 : vector<8x128xi1>, vector<8x128xf32>
    %c24_55 = arith.constant 24 : index
    %c0_56 = arith.constant 0 : index
    %148 = vector.load %arg12[%c24_55, %c0_56] : memref<96x128xf32, #tpu.memory_space<vmem>>, vector<8x128xf32>
    tpu.vector_store %arg12[%c24_55, %c0_56], %147 {strides = array<i32>} : memref<96x128xf32, #tpu.memory_space<vmem>>, vector<8x128xf32>,
    %c64 = arith.constant 64 : index
    %c0_57 = arith.constant 0 : index
    %149 = vector.load %arg13[%c64, %c0_57] : memref<96x128xf32, #tpu.memory_space<vmem>>, vector<8x128xf32>
    tpu.vector_store %arg13[%c64, %c0_57], %147 {strides = array<i32>} : memref<96x128xf32, #tpu.memory_space<vmem>>, vector<8x128xf32>,
    %150 = arith.truncf %145 : vector<8x128xf32> to vector<8x128xbf16>
    %cst_58 = arith.constant dense<0.000000e+00> : vector<8x512xf32>
    %151 = tpu.matmul %150, %31, %cst_58 {dimension_numbers = #tpu.dot_dimension_numbers<[1], [0], [0], [1], [0, 0, 1, 1], [], []>} : vector<8x128xbf16>, vector<128x512xbf16>, vector<8x512xf32> -> vector<8x512xf32>
    %c32 = arith.constant 32 : index
    %c0_59 = arith.constant 0 : index
    %152 = vector.load %arg10[%c32, %c0_59] : memref<96x512xf32, #tpu.memory_space<vmem>>, vector<8x512xf32>
    %153 = arith.addf %151, %152 : vector<8x512xf32>
    %154 = vector.extract_strided_slice %153 {offsets = [0, 0], sizes = [8, 384], strides = [1, 1]} : vector<8x512xf32> to vector<8x384xf32>
    %155 = arith.negf %154 : vector<8x384xf32>
    %156 = math.exp %155 : vector<8x384xf32>
    %cst_60 = arith.constant 1.000000e+00 : f32
    %157 = vector.broadcast %cst_60 : f32 to vector<8x384xf32>
    %158 = arith.addf %157, %156 : vector<8x384xf32>
    %159 = arith.divf %157, %158 : vector<8x384xf32>
    %160 = vector.extract_strided_slice %159 {offsets = [0, 0], sizes = [8, 128], strides = [1, 1]} : vector<8x384xf32> to vector<8x128xf32>
    %161 = vector.extract_strided_slice %159 {offsets = [0, 128], sizes = [8, 128], strides = [1, 1]} : vector<8x384xf32> to vector<8x128xf32>
    %162 = vector.extract_strided_slice %159 {offsets = [0, 256], sizes = [8, 128], strides = [1, 1]} : vector<8x384xf32> to vector<8x128xf32>
    %163 = vector.extract_strided_slice %153 {offsets = [0, 384], sizes = [8, 128], strides = [1, 1]} : vector<8x512xf32> to vector<8x128xf32>
    %164 = math.tanh %163 : vector<8x128xf32>
    %165 = arith.mulf %161, %144 : vector<8x128xf32>
    %166 = arith.mulf %160, %164 : vector<8x128xf32>
    %167 = arith.addf %165, %166 : vector<8x128xf32>
    %168 = math.tanh %167 : vector<8x128xf32>
    %169 = arith.mulf %162, %168 : vector<8x128xf32>
    %c32_61 = arith.constant 32 : index
    %c0_62 = arith.constant 0 : index
    %170 = vector.load %arg11[%c32_61, %c0_62] : memref<96x128xi32, #tpu.memory_space<vmem>>, vector<8x128xi32>
    %c0_i32_63 = arith.constant 0 : i32
    %171 = vector.broadcast %c0_i32_63 : i32 to vector<8x128xi32>
    %172 = arith.cmpi ne, %170, %171 : vector<8x128xi32>
    %173 = arith.select %172, %167, %144 : vector<8x128xi1>, vector<8x128xf32>
    %174 = arith.select %172, %169, %145 : vector<8x128xi1>, vector<8x128xf32>
    %cst_64 = arith.constant 0.000000e+00 : f32
    %175 = vector.broadcast %cst_64 : f32 to vector<8x128xf32>
    %176 = arith.select %172, %169, %175 : vector<8x128xi1>, vector<8x128xf32>
    %c32_65 = arith.constant 32 : index
    %c0_66 = arith.constant 0 : index
    %177 = vector.load %arg12[%c32_65, %c0_66] : memref<96x128xf32, #tpu.memory_space<vmem>>, vector<8x128xf32>
    tpu.vector_store %arg12[%c32_65, %c0_66], %176 {strides = array<i32>} : memref<96x128xf32, #tpu.memory_space<vmem>>, vector<8x128xf32>,
    %c56 = arith.constant 56 : index
    %c0_67 = arith.constant 0 : index
    %178 = vector.load %arg13[%c56, %c0_67] : memref<96x128xf32, #tpu.memory_space<vmem>>, vector<8x128xf32>
    tpu.vector_store %arg13[%c56, %c0_67], %176 {strides = array<i32>} : memref<96x128xf32, #tpu.memory_space<vmem>>, vector<8x128xf32>,
    %179 = arith.truncf %174 : vector<8x128xf32> to vector<8x128xbf16>
    %cst_68 = arith.constant dense<0.000000e+00> : vector<8x512xf32>
    %180 = tpu.matmul %179, %31, %cst_68 {dimension_numbers = #tpu.dot_dimension_numbers<[1], [0], [0], [1], [0, 0, 1, 1], [], []>} : vector<8x128xbf16>, vector<128x512xbf16>, vector<8x512xf32> -> vector<8x512xf32>
    %c40 = arith.constant 40 : index
    %c0_69 = arith.constant 0 : index
    %181 = vector.load %arg10[%c40, %c0_69] : memref<96x512xf32, #tpu.memory_space<vmem>>, vector<8x512xf32>
    %182 = arith.addf %180, %181 : vector<8x512xf32>
    %183 = vector.extract_strided_slice %182 {offsets = [0, 0], sizes = [8, 384], strides = [1, 1]} : vector<8x512xf32> to vector<8x384xf32>
    %184 = arith.negf %183 : vector<8x384xf32>
    %185 = math.exp %184 : vector<8x384xf32>
    %cst_70 = arith.constant 1.000000e+00 : f32
    %186 = vector.broadcast %cst_70 : f32 to vector<8x384xf32>
    %187 = arith.addf %186, %185 : vector<8x384xf32>
    %188 = arith.divf %186, %187 : vector<8x384xf32>
    %189 = vector.extract_strided_slice %188 {offsets = [0, 0], sizes = [8, 128], strides = [1, 1]} : vector<8x384xf32> to vector<8x128xf32>
    %190 = vector.extract_strided_slice %188 {offsets = [0, 128], sizes = [8, 128], strides = [1, 1]} : vector<8x384xf32> to vector<8x128xf32>
    %191 = vector.extract_strided_slice %188 {offsets = [0, 256], sizes = [8, 128], strides = [1, 1]} : vector<8x384xf32> to vector<8x128xf32>
    %192 = vector.extract_strided_slice %182 {offsets = [0, 384], sizes = [8, 128], strides = [1, 1]} : vector<8x512xf32> to vector<8x128xf32>
    %193 = math.tanh %192 : vector<8x128xf32>
    %194 = arith.mulf %190, %173 : vector<8x128xf32>
    %195 = arith.mulf %189, %193 : vector<8x128xf32>
    %196 = arith.addf %194, %195 : vector<8x128xf32>
    %197 = math.tanh %196 : vector<8x128xf32>
    %198 = arith.mulf %191, %197 : vector<8x128xf32>
    %c40_71 = arith.constant 40 : index
    %c0_72 = arith.constant 0 : index
    %199 = vector.load %arg11[%c40_71, %c0_72] : memref<96x128xi32, #tpu.memory_space<vmem>>, vector<8x128xi32>
    %c0_i32_73 = arith.constant 0 : i32
    %200 = vector.broadcast %c0_i32_73 : i32 to vector<8x128xi32>
    %201 = arith.cmpi ne, %199, %200 : vector<8x128xi32>
    %202 = arith.select %201, %196, %173 : vector<8x128xi1>, vector<8x128xf32>
    %203 = arith.select %201, %198, %174 : vector<8x128xi1>, vector<8x128xf32>
    %cst_74 = arith.constant 0.000000e+00 : f32
    %204 = vector.broadcast %cst_74 : f32 to vector<8x128xf32>
    %205 = arith.select %201, %198, %204 : vector<8x128xi1>, vector<8x128xf32>
    %c40_75 = arith.constant 40 : index
    %c0_76 = arith.constant 0 : index
    %206 = vector.load %arg12[%c40_75, %c0_76] : memref<96x128xf32, #tpu.memory_space<vmem>>, vector<8x128xf32>
    tpu.vector_store %arg12[%c40_75, %c0_76], %205 {strides = array<i32>} : memref<96x128xf32, #tpu.memory_space<vmem>>, vector<8x128xf32>,
    %c48 = arith.constant 48 : index
    %c0_77 = arith.constant 0 : index
    %207 = vector.load %arg13[%c48, %c0_77] : memref<96x128xf32, #tpu.memory_space<vmem>>, vector<8x128xf32>
    tpu.vector_store %arg13[%c48, %c0_77], %205 {strides = array<i32>} : memref<96x128xf32, #tpu.memory_space<vmem>>, vector<8x128xf32>,
    %208 = arith.truncf %203 : vector<8x128xf32> to vector<8x128xbf16>
    %cst_78 = arith.constant dense<0.000000e+00> : vector<8x512xf32>
    %209 = tpu.matmul %208, %31, %cst_78 {dimension_numbers = #tpu.dot_dimension_numbers<[1], [0], [0], [1], [0, 0, 1, 1], [], []>} : vector<8x128xbf16>, vector<128x512xbf16>, vector<8x512xf32> -> vector<8x512xf32>
    %c48_79 = arith.constant 48 : index
    %c0_80 = arith.constant 0 : index
    %210 = vector.load %arg10[%c48_79, %c0_80] : memref<96x512xf32, #tpu.memory_space<vmem>>, vector<8x512xf32>
    %211 = arith.addf %209, %210 : vector<8x512xf32>
    %212 = vector.extract_strided_slice %211 {offsets = [0, 0], sizes = [8, 384], strides = [1, 1]} : vector<8x512xf32> to vector<8x384xf32>
    %213 = arith.negf %212 : vector<8x384xf32>
    %214 = math.exp %213 : vector<8x384xf32>
    %cst_81 = arith.constant 1.000000e+00 : f32
    %215 = vector.broadcast %cst_81 : f32 to vector<8x384xf32>
    %216 = arith.addf %215, %214 : vector<8x384xf32>
    %217 = arith.divf %215, %216 : vector<8x384xf32>
    %218 = vector.extract_strided_slice %217 {offsets = [0, 0], sizes = [8, 128], strides = [1, 1]} : vector<8x384xf32> to vector<8x128xf32>
    %219 = vector.extract_strided_slice %217 {offsets = [0, 128], sizes = [8, 128], strides = [1, 1]} : vector<8x384xf32> to vector<8x128xf32>
    %220 = vector.extract_strided_slice %217 {offsets = [0, 256], sizes = [8, 128], strides = [1, 1]} : vector<8x384xf32> to vector<8x128xf32>
    %221 = vector.extract_strided_slice %211 {offsets = [0, 384], sizes = [8, 128], strides = [1, 1]} : vector<8x512xf32> to vector<8x128xf32>
    %222 = math.tanh %221 : vector<8x128xf32>
    %223 = arith.mulf %219, %202 : vector<8x128xf32>
    %224 = arith.mulf %218, %222 : vector<8x128xf32>
    %225 = arith.addf %223, %224 : vector<8x128xf32>
    %226 = math.tanh %225 : vector<8x128xf32>
    %227 = arith.mulf %220, %226 : vector<8x128xf32>
    %c48_82 = arith.constant 48 : index
    %c0_83 = arith.constant 0 : index
    %228 = vector.load %arg11[%c48_82, %c0_83] : memref<96x128xi32, #tpu.memory_space<vmem>>, vector<8x128xi32>
    %c0_i32_84 = arith.constant 0 : i32
    %229 = vector.broadcast %c0_i32_84 : i32 to vector<8x128xi32>
    %230 = arith.cmpi ne, %228, %229 : vector<8x128xi32>
    %231 = arith.select %230, %225, %202 : vector<8x128xi1>, vector<8x128xf32>
    %232 = arith.select %230, %227, %203 : vector<8x128xi1>, vector<8x128xf32>
    %cst_85 = arith.constant 0.000000e+00 : f32
    %233 = vector.broadcast %cst_85 : f32 to vector<8x128xf32>
    %234 = arith.select %230, %227, %233 : vector<8x128xi1>, vector<8x128xf32>
    %c48_86 = arith.constant 48 : index
    %c0_87 = arith.constant 0 : index
    %235 = vector.load %arg12[%c48_86, %c0_87] : memref<96x128xf32, #tpu.memory_space<vmem>>, vector<8x128xf32>
    tpu.vector_store %arg12[%c48_86, %c0_87], %234 {strides = array<i32>} : memref<96x128xf32, #tpu.memory_space<vmem>>, vector<8x128xf32>,
    %c40_88 = arith.constant 40 : index
    %c0_89 = arith.constant 0 : index
    %236 = vector.load %arg13[%c40_88, %c0_89] : memref<96x128xf32, #tpu.memory_space<vmem>>, vector<8x128xf32>
    tpu.vector_store %arg13[%c40_88, %c0_89], %234 {strides = array<i32>} : memref<96x128xf32, #tpu.memory_space<vmem>>, vector<8x128xf32>,
    %237 = arith.truncf %232 : vector<8x128xf32> to vector<8x128xbf16>
    %cst_90 = arith.constant dense<0.000000e+00> : vector<8x512xf32>
    %238 = tpu.matmul %237, %31, %cst_90 {dimension_numbers = #tpu.dot_dimension_numbers<[1], [0], [0], [1], [0, 0, 1, 1], [], []>} : vector<8x128xbf16>, vector<128x512xbf16>, vector<8x512xf32> -> vector<8x512xf32>
    %c56_91 = arith.constant 56 : index
    %c0_92 = arith.constant 0 : index
    %239 = vector.load %arg10[%c56_91, %c0_92] : memref<96x512xf32, #tpu.memory_space<vmem>>, vector<8x512xf32>
    %240 = arith.addf %238, %239 : vector<8x512xf32>
    %241 = vector.extract_strided_slice %240 {offsets = [0, 0], sizes = [8, 384], strides = [1, 1]} : vector<8x512xf32> to vector<8x384xf32>
    %242 = arith.negf %241 : vector<8x384xf32>
    %243 = math.exp %242 : vector<8x384xf32>
    %cst_93 = arith.constant 1.000000e+00 : f32
    %244 = vector.broadcast %cst_93 : f32 to vector<8x384xf32>
    %245 = arith.addf %244, %243 : vector<8x384xf32>
    %246 = arith.divf %244, %245 : vector<8x384xf32>
    %247 = vector.extract_strided_slice %246 {offsets = [0, 0], sizes = [8, 128], strides = [1, 1]} : vector<8x384xf32> to vector<8x128xf32>
    %248 = vector.extract_strided_slice %246 {offsets = [0, 128], sizes = [8, 128], strides = [1, 1]} : vector<8x384xf32> to vector<8x128xf32>
    %249 = vector.extract_strided_slice %246 {offsets = [0, 256], sizes = [8, 128], strides = [1, 1]} : vector<8x384xf32> to vector<8x128xf32>
    %250 = vector.extract_strided_slice %240 {offsets = [0, 384], sizes = [8, 128], strides = [1, 1]} : vector<8x512xf32> to vector<8x128xf32>
    %251 = math.tanh %250 : vector<8x128xf32>
    %252 = arith.mulf %248, %231 : vector<8x128xf32>
    %253 = arith.mulf %247, %251 : vector<8x128xf32>
    %254 = arith.addf %252, %253 : vector<8x128xf32>
    %255 = math.tanh %254 : vector<8x128xf32>
    %256 = arith.mulf %249, %255 : vector<8x128xf32>
    %c56_94 = arith.constant 56 : index
    %c0_95 = arith.constant 0 : index
    %257 = vector.load %arg11[%c56_94, %c0_95] : memref<96x128xi32, #tpu.memory_space<vmem>>, vector<8x128xi32>
    %c0_i32_96 = arith.constant 0 : i32
    %258 = vector.broadcast %c0_i32_96 : i32 to vector<8x128xi32>
    %259 = arith.cmpi ne, %257, %258 : vector<8x128xi32>
    %260 = arith.select %259, %254, %231 : vector<8x128xi1>, vector<8x128xf32>
    %261 = arith.select %259, %256, %232 : vector<8x128xi1>, vector<8x128xf32>
    %cst_97 = arith.constant 0.000000e+00 : f32
    %262 = vector.broadcast %cst_97 : f32 to vector<8x128xf32>
    %263 = arith.select %259, %256, %262 : vector<8x128xi1>, vector<8x128xf32>
    %c56_98 = arith.constant 56 : index
    %c0_99 = arith.constant 0 : index
    %264 = vector.load %arg12[%c56_98, %c0_99] : memref<96x128xf32, #tpu.memory_space<vmem>>, vector<8x128xf32>
    tpu.vector_store %arg12[%c56_98, %c0_99], %263 {strides = array<i32>} : memref<96x128xf32, #tpu.memory_space<vmem>>, vector<8x128xf32>,
    %c32_100 = arith.constant 32 : index
    %c0_101 = arith.constant 0 : index
    %265 = vector.load %arg13[%c32_100, %c0_101] : memref<96x128xf32, #tpu.memory_space<vmem>>, vector<8x128xf32>
    tpu.vector_store %arg13[%c32_100, %c0_101], %263 {strides = array<i32>} : memref<96x128xf32, #tpu.memory_space<vmem>>, vector<8x128xf32>,
    %266 = arith.truncf %261 : vector<8x128xf32> to vector<8x128xbf16>
    %cst_102 = arith.constant dense<0.000000e+00> : vector<8x512xf32>
    %267 = tpu.matmul %266, %31, %cst_102 {dimension_numbers = #tpu.dot_dimension_numbers<[1], [0], [0], [1], [0, 0, 1, 1], [], []>} : vector<8x128xbf16>, vector<128x512xbf16>, vector<8x512xf32> -> vector<8x512xf32>
    %c64_103 = arith.constant 64 : index
    %c0_104 = arith.constant 0 : index
    %268 = vector.load %arg10[%c64_103, %c0_104] : memref<96x512xf32, #tpu.memory_space<vmem>>, vector<8x512xf32>
    %269 = arith.addf %267, %268 : vector<8x512xf32>
    %270 = vector.extract_strided_slice %269 {offsets = [0, 0], sizes = [8, 384], strides = [1, 1]} : vector<8x512xf32> to vector<8x384xf32>
    %271 = arith.negf %270 : vector<8x384xf32>
    %272 = math.exp %271 : vector<8x384xf32>
    %cst_105 = arith.constant 1.000000e+00 : f32
    %273 = vector.broadcast %cst_105 : f32 to vector<8x384xf32>
    %274 = arith.addf %273, %272 : vector<8x384xf32>
    %275 = arith.divf %273, %274 : vector<8x384xf32>
    %276 = vector.extract_strided_slice %275 {offsets = [0, 0], sizes = [8, 128], strides = [1, 1]} : vector<8x384xf32> to vector<8x128xf32>
    %277 = vector.extract_strided_slice %275 {offsets = [0, 128], sizes = [8, 128], strides = [1, 1]} : vector<8x384xf32> to vector<8x128xf32>
    %278 = vector.extract_strided_slice %275 {offsets = [0, 256], sizes = [8, 128], strides = [1, 1]} : vector<8x384xf32> to vector<8x128xf32>
    %279 = vector.extract_strided_slice %269 {offsets = [0, 384], sizes = [8, 128], strides = [1, 1]} : vector<8x512xf32> to vector<8x128xf32>
    %280 = math.tanh %279 : vector<8x128xf32>
    %281 = arith.mulf %277, %260 : vector<8x128xf32>
    %282 = arith.mulf %276, %280 : vector<8x128xf32>
    %283 = arith.addf %281, %282 : vector<8x128xf32>
    %284 = math.tanh %283 : vector<8x128xf32>
    %285 = arith.mulf %278, %284 : vector<8x128xf32>
    %c64_106 = arith.constant 64 : index
    %c0_107 = arith.constant 0 : index
    %286 = vector.load %arg11[%c64_106, %c0_107] : memref<96x128xi32, #tpu.memory_space<vmem>>, vector<8x128xi32>
    %c0_i32_108 = arith.constant 0 : i32
    %287 = vector.broadcast %c0_i32_108 : i32 to vector<8x128xi32>
    %288 = arith.cmpi ne, %286, %287 : vector<8x128xi32>
    %289 = arith.select %288, %283, %260 : vector<8x128xi1>, vector<8x128xf32>
    %290 = arith.select %288, %285, %261 : vector<8x128xi1>, vector<8x128xf32>
    %cst_109 = arith.constant 0.000000e+00 : f32
    %291 = vector.broadcast %cst_109 : f32 to vector<8x128xf32>
    %292 = arith.select %288, %285, %291 : vector<8x128xi1>, vector<8x128xf32>
    %c64_110 = arith.constant 64 : index
    %c0_111 = arith.constant 0 : index
    %293 = vector.load %arg12[%c64_110, %c0_111] : memref<96x128xf32, #tpu.memory_space<vmem>>, vector<8x128xf32>
    tpu.vector_store %arg12[%c64_110, %c0_111], %292 {strides = array<i32>} : memref<96x128xf32, #tpu.memory_space<vmem>>, vector<8x128xf32>,
    %c24_112 = arith.constant 24 : index
    %c0_113 = arith.constant 0 : index
    %294 = vector.load %arg13[%c24_112, %c0_113] : memref<96x128xf32, #tpu.memory_space<vmem>>, vector<8x128xf32>
    tpu.vector_store %arg13[%c24_112, %c0_113], %292 {strides = array<i32>} : memref<96x128xf32, #tpu.memory_space<vmem>>, vector<8x128xf32>,
    %295 = arith.truncf %290 : vector<8x128xf32> to vector<8x128xbf16>
    %cst_114 = arith.constant dense<0.000000e+00> : vector<8x512xf32>
    %296 = tpu.matmul %295, %31, %cst_114 {dimension_numbers = #tpu.dot_dimension_numbers<[1], [0], [0], [1], [0, 0, 1, 1], [], []>} : vector<8x128xbf16>, vector<128x512xbf16>, vector<8x512xf32> -> vector<8x512xf32>
    %c72_115 = arith.constant 72 : index
    %c0_116 = arith.constant 0 : index
    %297 = vector.load %arg10[%c72_115, %c0_116] : memref<96x512xf32, #tpu.memory_space<vmem>>, vector<8x512xf32>
    %298 = arith.addf %296, %297 : vector<8x512xf32>
    %299 = vector.extract_strided_slice %298 {offsets = [0, 0], sizes = [8, 384], strides = [1, 1]} : vector<8x512xf32> to vector<8x384xf32>
    %300 = arith.negf %299 : vector<8x384xf32>
    %301 = math.exp %300 : vector<8x384xf32>
    %cst_117 = arith.constant 1.000000e+00 : f32
    %302 = vector.broadcast %cst_117 : f32 to vector<8x384xf32>
    %303 = arith.addf %302, %301 : vector<8x384xf32>
    %304 = arith.divf %302, %303 : vector<8x384xf32>
    %305 = vector.extract_strided_slice %304 {offsets = [0, 0], sizes = [8, 128], strides = [1, 1]} : vector<8x384xf32> to vector<8x128xf32>
    %306 = vector.extract_strided_slice %304 {offsets = [0, 128], sizes = [8, 128], strides = [1, 1]} : vector<8x384xf32> to vector<8x128xf32>
    %307 = vector.extract_strided_slice %304 {offsets = [0, 256], sizes = [8, 128], strides = [1, 1]} : vector<8x384xf32> to vector<8x128xf32>
    %308 = vector.extract_strided_slice %298 {offsets = [0, 384], sizes = [8, 128], strides = [1, 1]} : vector<8x512xf32> to vector<8x128xf32>
    %309 = math.tanh %308 : vector<8x128xf32>
    %310 = arith.mulf %306, %289 : vector<8x128xf32>
    %311 = arith.mulf %305, %309 : vector<8x128xf32>
    %312 = arith.addf %310, %311 : vector<8x128xf32>
    %313 = math.tanh %312 : vector<8x128xf32>
    %314 = arith.mulf %307, %313 : vector<8x128xf32>
    %c72_118 = arith.constant 72 : index
    %c0_119 = arith.constant 0 : index
    %315 = vector.load %arg11[%c72_118, %c0_119] : memref<96x128xi32, #tpu.memory_space<vmem>>, vector<8x128xi32>
    %c0_i32_120 = arith.constant 0 : i32
    %316 = vector.broadcast %c0_i32_120 : i32 to vector<8x128xi32>
    %317 = arith.cmpi ne, %315, %316 : vector<8x128xi32>
    %318 = arith.select %317, %312, %289 : vector<8x128xi1>, vector<8x128xf32>
    %319 = arith.select %317, %314, %290 : vector<8x128xi1>, vector<8x128xf32>
    %cst_121 = arith.constant 0.000000e+00 : f32
    %320 = vector.broadcast %cst_121 : f32 to vector<8x128xf32>
    %321 = arith.select %317, %314, %320 : vector<8x128xi1>, vector<8x128xf32>
    %c72_122 = arith.constant 72 : index
    %c0_123 = arith.constant 0 : index
    %322 = vector.load %arg12[%c72_122, %c0_123] : memref<96x128xf32, #tpu.memory_space<vmem>>, vector<8x128xf32>
    tpu.vector_store %arg12[%c72_122, %c0_123], %321 {strides = array<i32>} : memref<96x128xf32, #tpu.memory_space<vmem>>, vector<8x128xf32>,
    %c16_124 = arith.constant 16 : index
    %c0_125 = arith.constant 0 : index
    %323 = vector.load %arg13[%c16_124, %c0_125] : memref<96x128xf32, #tpu.memory_space<vmem>>, vector<8x128xf32>
    tpu.vector_store %arg13[%c16_124, %c0_125], %321 {strides = array<i32>} : memref<96x128xf32, #tpu.memory_space<vmem>>, vector<8x128xf32>,
    %324 = arith.truncf %319 : vector<8x128xf32> to vector<8x128xbf16>
    %cst_126 = arith.constant dense<0.000000e+00> : vector<8x512xf32>
    %325 = tpu.matmul %324, %31, %cst_126 {dimension_numbers = #tpu.dot_dimension_numbers<[1], [0], [0], [1], [0, 0, 1, 1], [], []>} : vector<8x128xbf16>, vector<128x512xbf16>, vector<8x512xf32> -> vector<8x512xf32>
    %c80_127 = arith.constant 80 : index
    %c0_128 = arith.constant 0 : index
    %326 = vector.load %arg10[%c80_127, %c0_128] : memref<96x512xf32, #tpu.memory_space<vmem>>, vector<8x512xf32>
    %327 = arith.addf %325, %326 : vector<8x512xf32>
    %328 = vector.extract_strided_slice %327 {offsets = [0, 0], sizes = [8, 384], strides = [1, 1]} : vector<8x512xf32> to vector<8x384xf32>
    %329 = arith.negf %328 : vector<8x384xf32>
    %330 = math.exp %329 : vector<8x384xf32>
    %cst_129 = arith.constant 1.000000e+00 : f32
    %331 = vector.broadcast %cst_129 : f32 to vector<8x384xf32>
    %332 = arith.addf %331, %330 : vector<8x384xf32>
    %333 = arith.divf %331, %332 : vector<8x384xf32>
    %334 = vector.extract_strided_slice %333 {offsets = [0, 0], sizes = [8, 128], strides = [1, 1]} : vector<8x384xf32> to vector<8x128xf32>
    %335 = vector.extract_strided_slice %333 {offsets = [0, 128], sizes = [8, 128], strides = [1, 1]} : vector<8x384xf32> to vector<8x128xf32>
    %336 = vector.extract_strided_slice %333 {offsets = [0, 256], sizes = [8, 128], strides = [1, 1]} : vector<8x384xf32> to vector<8x128xf32>
    %337 = vector.extract_strided_slice %327 {offsets = [0, 384], sizes = [8, 128], strides = [1, 1]} : vector<8x512xf32> to vector<8x128xf32>
    %338 = math.tanh %337 : vector<8x128xf32>
    %339 = arith.mulf %335, %318 : vector<8x128xf32>
    %340 = arith.mulf %334, %338 : vector<8x128xf32>
    %341 = arith.addf %339, %340 : vector<8x128xf32>
    %342 = math.tanh %341 : vector<8x128xf32>
    %343 = arith.mulf %336, %342 : vector<8x128xf32>
    %c80_130 = arith.constant 80 : index
    %c0_131 = arith.constant 0 : index
    %344 = vector.load %arg11[%c80_130, %c0_131] : memref<96x128xi32, #tpu.memory_space<vmem>>, vector<8x128xi32>
    %c0_i32_132 = arith.constant 0 : i32
    %345 = vector.broadcast %c0_i32_132 : i32 to vector<8x128xi32>
    %346 = arith.cmpi ne, %344, %345 : vector<8x128xi32>
    %347 = arith.select %346, %341, %318 : vector<8x128xi1>, vector<8x128xf32>
    %348 = arith.select %346, %343, %319 : vector<8x128xi1>, vector<8x128xf32>
    %cst_133 = arith.constant 0.000000e+00 : f32
    %349 = vector.broadcast %cst_133 : f32 to vector<8x128xf32>
    %350 = arith.select %346, %343, %349 : vector<8x128xi1>, vector<8x128xf32>
    %c80_134 = arith.constant 80 : index
    %c0_135 = arith.constant 0 : index
    %351 = vector.load %arg12[%c80_134, %c0_135] : memref<96x128xf32, #tpu.memory_space<vmem>>, vector<8x128xf32>
    tpu.vector_store %arg12[%c80_134, %c0_135], %350 {strides = array<i32>} : memref<96x128xf32, #tpu.memory_space<vmem>>, vector<8x128xf32>,
    %c8_136 = arith.constant 8 : index
    %c0_137 = arith.constant 0 : index
    %352 = vector.load %arg13[%c8_136, %c0_137] : memref<96x128xf32, #tpu.memory_space<vmem>>, vector<8x128xf32>
    tpu.vector_store %arg13[%c8_136, %c0_137], %350 {strides = array<i32>} : memref<96x128xf32, #tpu.memory_space<vmem>>, vector<8x128xf32>,
    %353 = arith.truncf %348 : vector<8x128xf32> to vector<8x128xbf16>
    %cst_138 = arith.constant dense<0.000000e+00> : vector<8x512xf32>
    %354 = tpu.matmul %353, %31, %cst_138 {dimension_numbers = #tpu.dot_dimension_numbers<[1], [0], [0], [1], [0, 0, 1, 1], [], []>} : vector<8x128xbf16>, vector<128x512xbf16>, vector<8x512xf32> -> vector<8x512xf32>
    %c88_139 = arith.constant 88 : index
    %c0_140 = arith.constant 0 : index
    %355 = vector.load %arg10[%c88_139, %c0_140] : memref<96x512xf32, #tpu.memory_space<vmem>>, vector<8x512xf32>
    %356 = arith.addf %354, %355 : vector<8x512xf32>
    %357 = vector.extract_strided_slice %356 {offsets = [0, 0], sizes = [8, 384], strides = [1, 1]} : vector<8x512xf32> to vector<8x384xf32>
    %358 = arith.negf %357 : vector<8x384xf32>
    %359 = math.exp %358 : vector<8x384xf32>
    %cst_141 = arith.constant 1.000000e+00 : f32
    %360 = vector.broadcast %cst_141 : f32 to vector<8x384xf32>
    %361 = arith.addf %360, %359 : vector<8x384xf32>
    %362 = arith.divf %360, %361 : vector<8x384xf32>
    %363 = vector.extract_strided_slice %362 {offsets = [0, 0], sizes = [8, 128], strides = [1, 1]} : vector<8x384xf32> to vector<8x128xf32>
    %364 = vector.extract_strided_slice %362 {offsets = [0, 128], sizes = [8, 128], strides = [1, 1]} : vector<8x384xf32> to vector<8x128xf32>
    %365 = vector.extract_strided_slice %362 {offsets = [0, 256], sizes = [8, 128], strides = [1, 1]} : vector<8x384xf32> to vector<8x128xf32>
    %366 = vector.extract_strided_slice %356 {offsets = [0, 384], sizes = [8, 128], strides = [1, 1]} : vector<8x512xf32> to vector<8x128xf32>
    %367 = math.tanh %366 : vector<8x128xf32>
    %368 = arith.mulf %364, %347 : vector<8x128xf32>
    %369 = arith.mulf %363, %367 : vector<8x128xf32>
    %370 = arith.addf %368, %369 : vector<8x128xf32>
    %371 = math.tanh %370 : vector<8x128xf32>
    %372 = arith.mulf %365, %371 : vector<8x128xf32>
    %c88_142 = arith.constant 88 : index
    %c0_143 = arith.constant 0 : index
    %373 = vector.load %arg11[%c88_142, %c0_143] : memref<96x128xi32, #tpu.memory_space<vmem>>, vector<8x128xi32>
    %c0_i32_144 = arith.constant 0 : i32
    %374 = vector.broadcast %c0_i32_144 : i32 to vector<8x128xi32>
    %375 = arith.cmpi ne, %373, %374 : vector<8x128xi32>
    %cst_145 = arith.constant 0.000000e+00 : f32
    %376 = vector.broadcast %cst_145 : f32 to vector<8x128xf32>
    %377 = arith.select %375, %372, %376 : vector<8x128xi1>, vector<8x128xf32>
    %c88_146 = arith.constant 88 : index
    %c0_147 = arith.constant 0 : index
    %378 = vector.load %arg12[%c88_146, %c0_147] : memref<96x128xf32, #tpu.memory_space<vmem>>, vector<8x128xf32>
    tpu.vector_store %arg12[%c88_146, %c0_147], %377 {strides = array<i32>} : memref<96x128xf32, #tpu.memory_space<vmem>>, vector<8x128xf32>,
    %c0_148 = arith.constant 0 : index
    %c0_149 = arith.constant 0 : index
    %379 = vector.load %arg13[%c0_148, %c0_149] : memref<96x128xf32, #tpu.memory_space<vmem>>, vector<8x128xf32>
    tpu.vector_store %arg13[%c0_148, %c0_149], %377 {strides = array<i32>} : memref<96x128xf32, #tpu.memory_space<vmem>>, vector<8x128xf32>,
    %c0_150 = arith.constant 0 : index
    %c0_151 = arith.constant 0 : index
    %380 = vector.load %arg12[%c0_150, %c0_151] : memref<96x128xf32, #tpu.memory_space<vmem>>, vector<96x128xf32>
    %381 = arith.truncf %380 : vector<96x128xf32> to vector<96x128xbf16>
    %c0_152 = arith.constant 0 : index
    %c0_153 = arith.constant 0 : index
    %382 = vector.load %arg6[%c0_152, %c0_153] : memref<128x128xbf16, #tpu.memory_space<vmem>>, vector<128x128xbf16>
    %cst_154 = arith.constant dense<0.000000e+00> : vector<96x128xf32>
    %383 = tpu.matmul %381, %382, %cst_154 {dimension_numbers = #tpu.dot_dimension_numbers<[1], [0], [0], [1], [0, 0, 1, 1], [], []>} : vector<96x128xbf16>, vector<128x128xbf16>, vector<96x128xf32> -> vector<96x128xf32>
    %c0_155 = arith.constant 0 : index
    %c0_156 = arith.constant 0 : index
    %384 = vector.load %arg13[%c0_155, %c0_156] : memref<96x128xf32, #tpu.memory_space<vmem>>, vector<96x128xf32>
    %385 = arith.truncf %384 : vector<96x128xf32> to vector<96x128xbf16>
    %c0_157 = arith.constant 0 : index
    %c0_158 = arith.constant 0 : index
    %386 = vector.load %arg7[%c0_157, %c0_158] : memref<128x128xbf16, #tpu.memory_space<vmem>>, vector<128x128xbf16>
    %cst_159 = arith.constant dense<0.000000e+00> : vector<96x128xf32>
    %387 = tpu.matmul %385, %386, %cst_159 {dimension_numbers = #tpu.dot_dimension_numbers<[1], [0], [0], [1], [0, 0, 1, 1], [], []>} : vector<96x128xbf16>, vector<128x128xbf16>, vector<96x128xf32> -> vector<96x128xf32>
    %388 = arith.addf %383, %387 : vector<96x128xf32>
    %c0_160 = arith.constant 0 : index
    %c0_161 = arith.constant 0 : index
    %389 = vector.load %arg8[%c0_160, %c0_161] : memref<1x128xf32, #tpu.memory_space<vmem>>, vector<1x128xf32>
    %390 = vector.broadcast %389 : vector<1x128xf32> to vector<96x128xf32>
    %391 = arith.addf %388, %390 : vector<96x128xf32>
    %c0_162 = arith.constant 0 : index
    %c0_163 = arith.constant 0 : index
    %392 = vector.load %arg9[%c0_162, %c0_163] : memref<96x128xf32, #tpu.memory_space<vmem>>, vector<96x128xf32>
    tpu.vector_store %arg9[%c0_162, %c0_163], %391 {strides = array<i32>} : memref<96x128xf32, #tpu.memory_space<vmem>>, vector<96x128xf32>,
    return
  }
}

</mosaic_0001>

<bundles_post_ra>
// kernel: bilstm_tagger_forward.1
= control target key start
LH: loop header
LB: loop body
LE: loop exit
PB: predicated region body
PF: predicated region fallthrough
CT: control target
= control target key end

     0   :  { %14 = vsyncpa [#allocation7], 0  ;;  %s5523_s0 = inlined_call_operand.vmem [shape: s32[96,1], index: 0, kind: input, shape index: {}]   ;;  %s5524_s1 = inlined_call_operand.vmem [shape: s32[96,1], index: 1, kind: input, shape index: {}]   ;;  %s5525_s2 = inlined_call_operand.hbm [shape: bf16[64,512], index: 2, kind: input, shape index: {}]   ;;  %s5526_s3 = inlined_call_operand.hbm [shape: bf16[64,512], index: 3, kind: input, shape index: {}]   ;;  %s5527_s4 = inlined_call_operand.vmem [shape: f32[1,512], index: 4, kind: input, shape index: {}]   ;;  %s5528_s5 = inlined_call_operand.vmem [shape: bf16[128,512], index: 5, kind: input, shape index: {}]   ;;  %s5529_s6 = inlined_call_operand.hbm [shape: bf16[128,128], index: 6, kind: input, shape index: {}]   ;;  %s5530_s7 = inlined_call_operand.hbm [shape: bf16[128,128], index: 7, kind: input, shape index: {}]   ;;  %s5531_s8 = inlined_call_operand.vmem [shape: f32[1,128], index: 8, kind: input, shape index: {}]   ;;  %s5532_s9 = inlined_call_operand.vmem [shape: f32[96,128], index: 9, kind: output, shape index: {}]  }
   0x1   :  { %15 = vsyncpa [#allocation9], 0 }
   0x2   :  { %16 = vsyncpa [#allocation12], 0  ;;  %s38_s11 = sshll.u32 %s5526_s3, 4  ;;  %s3811_s12 = smov [#allocation8]   ;;  %s39_s11 = int_to_ptr.hbm [resolvable:$true] %s38_s11 }
   0x3   :  { %s40_s13 = sshll.u32 %s3811_s12, 4  ;;  %s25_s16 = sshll.u32 %s5525_s2, 4  ;;  %s41_s13 = int_to_ptr.vmem [resolvable:$true] %s40_s13  ;;  %s26_s16 = int_to_ptr.hbm [resolvable:$true] %s25_s16 }
   0x4   :  { %s3812_s17 = smov 256   ;;  %s3813_s18 = smov 16  }
   0x5   :  { %46 = dma.hbm_to_vmem [thread:$0]  %s39_s11, 2048, %s41_s13, [#allocation9], %s3812_s17, %s3812_s17, %s3813_s18  }
   0x6   :  { %s3814_s19 = smov [#allocation6]   ;;  %s55_s23 = sshll.u32 %s5529_s6, 4  ;;  %s56_s23 = int_to_ptr.hbm [resolvable:$true] %s55_s23 }
   0x7   :  { %s27_s20 = sshll.u32 %s3814_s19, 4  ;;  %s3815_s3 = smov [#allocation10]   ;;  %s28_s20 = int_to_ptr.vmem [resolvable:$true] %s27_s20 }
   0x8   :  { %33 = dma.hbm_to_vmem [thread:$0]  %s26_s16, 2048, %s28_s20, [#allocation7], %s3812_s17, %s3812_s17, %s3813_s18  }
   0x9   :  { %s57_s24 = sshll.u32 %s3815_s3, 4  ;;  %s68_s2 = sshll.u32 %s5530_s7, 4  ;;  %s58_s24 = int_to_ptr.vmem [resolvable:$true] %s57_s24  ;;  %s69_s2 = int_to_ptr.hbm [resolvable:$true] %s68_s2 }
   0xa   :  { %s3816_s27 = smov 64   ;;  %s3817_s28 = smov 4  }
   0xb   :  { %63 = dma.hbm_to_vmem [thread:$0]  %s56_s23, 1024, %s58_s24, [#allocation9], %s3816_s27, %s3816_s27, %s3817_s28  }
   0xc   :  { %s3818_s29 = smov [#allocation11]  }
   0xd   :  { %s70_s30 = sshll.u32 %s3818_s29, 4  ;;  %s71_s30 = int_to_ptr.vmem [resolvable:$true] %s70_s30 }
   0xe   :  { %76 = dma.hbm_to_vmem [thread:$0]  %s69_s2, 1024, %s71_s30, [#allocation12], %s3816_s27, %s3816_s27, %s3817_s28  }
   0xf   :  { %3805 = dma.done.wait [#allocation7], 2048  }
  0x10   :  { %3806 = vsyncadd [#allocation7], 4294965248 }
  0x11   :  { %3807 = dma.done.wait [#allocation9], 3072  }
  0x12   :  { %3808 = vsyncadd [#allocation9], 4294964224 }
  0x13   :  { %3809 = dma.done.wait [#allocation12], 1024  }
  0x14   :  { %3810 = vsyncadd [#allocation12], 4294966272  ;;  %v5533_v0 = vmov 0   ;;  %v118_v1 = vld [vmem:[%s5524_s1 + $0x50] sm:$0xff]  ;;  %v116_v2 = vld [vmem:[%s5524_s1 + $0x40] sm:$0xff]  ;;  %v120_v61 = vlaneseq  ;;  %vm390_vm3 = vcmask 523264  }
  0x15   :  { %3515 = vset.pattern.permute.xlu2 %v5533_v0  ;;  %3514 = vset.pattern.permute.xlu1 %v5533_v0  ;;  %v114_v3 = vld [vmem:[%s5524_s1 + $0x30] sm:$0xff]  ;;  %v119_v4 = vld [vmem:[%s5524_s1 + $0x58] sm:$0xff]  ;;  %v117_v5 = vld [vmem:[%s5524_s1 + $0x48] sm:$0xff] }
  0x16   :  { %3513 = vset.pattern.permute.xlu0 %v5533_v0  ;;  %231 = vperm.xlu2 %3515, %v118_v1   ;;  %v115_v6 = vld [vmem:[%s5524_s1 + $0x38] sm:$0xff]  ;;  %v110_v7 = vld [vmem:[%s5524_s1 + $0x10] sm:$0xff]  ;;  %v109_v8 = vld [vmem:[%s5524_s1 + $0x8] sm:$0xff] }
  0x17   :  { %225 = vperm.xlu1 %3514, %v116_v2   ;;  %219 = vperm.xlu0 %3513, %v114_v3   ;;  %v108_v9 = vld [vmem:[%s5524_s1] sm:$0xff]  ;;  %v113_v10 = vld [vmem:[%s5524_s1 + $0x28] sm:$0xff]  ;;  %v111_v12 = vld [vmem:[%s5524_s1 + $0x18] sm:$0xff]  ;;  %v3968_v2 = vand.u32 127, %v120_v61 }
  0x18   :  { %v112_v11 = vld [vmem:[%s5524_s1 + $0x20] sm:$0xff]  ;;  %v98_v13 = vld [vmem:[%s5523_s0 + $0x10] sm:$0xff]  ;;  %v97_v14 = vld [vmem:[%s5523_s0 + $0x8] sm:$0xff] }
  0x19   :  { %v96_v15 = vld [vmem:[%s5523_s0] sm:$0xff]  ;;  %v101_v16 = vld [vmem:[%s5523_s0 + $0x28] sm:$0xff]  ;;  %v99_v18 = vld [vmem:[%s5523_s0 + $0x18] sm:$0xff]  ;;  %vm925_vm1 = vcmp.lt.s32.totalorder %v3968_v2, 64 }
  0x1a   :  { %v100_v17 = vld [vmem:[%s5523_s0 + $0x20] sm:$0xff]  ;;  %v103_v20 = vld [vmem:[%s5523_s0 + $0x38] sm:$0xff]  ;;  %v102_v21 = vld [vmem:[%s5523_s0 + $0x30] sm:$0xff] }
  0x1b   :  { %v104_v19 = vld [vmem:[%s5523_s0 + $0x40] sm:$0xff]  ;;  %v107_v22 = vld [vmem:[%s5523_s0 + $0x58] sm:$0xff]  ;;  %v106_v23 = vld [vmem:[%s5523_s0 + $0x50] sm:$0xff] }
  0x1c   :  { %v105_v24 = vld [vmem:[%s5523_s0 + $0x48] sm:$0xff]  ;;  %v3013_v25 = vld [vmem:[#allocation8 + $0x60] sm:$0xf]  ;;  %v3409_v26 = vld [vmem:[#allocation8 + $0x6c] sm:$0xf0] }
  0x1d   :  { %v3407_v27 = vld [vmem:[#allocation8 + $0x64] sm:$0xf]  ;;  %v3014_v28 = vor.u32 %v3409_v26, %v3013_v25  ;;  %v3015_v29 = vld [vmem:[#allocation8 + $0x70] sm:$0xf0]  ;;  %v2997_v31 = vld [vmem:[#allocation8 + $0x40] sm:$0xf] }
  0x1e   :  { %234 = vperm.xlu2 %3515, %v119_v4   ;;  %v3018_v30 = vor.u32 %v3407_v27, %v3015_v29  ;;  %v3405_v32 = vld [vmem:[#allocation8 + $0x4c] sm:$0xf0]  ;;  %v3403_v33 = vld [vmem:[#allocation8 + $0x44] sm:$0xf]  ;;  %v2999_v35 = vld [vmem:[#allocation8 + $0x50] sm:$0xf0] }
  0x1f   :  { %228 = vperm.xlu1 %3514, %v117_v5   ;;  %222 = vperm.xlu0 %3513, %v115_v6   ;;  %v2998_v34 = vor.u32 %v3405_v32, %v2997_v31  ;;  %v3002_v36 = vor.u32 %v3403_v33, %v2999_v35  ;;  %v2981_v37 = vld [vmem:[#allocation8 + $0x20] sm:$0xf]  ;;  %v3401_v38 = vld [vmem:[#allocation8 + $0x2c] sm:$0xf0]  ;;  %v3399_v39 = vld [vmem:[#allocation8 + $0x24] sm:$0xf] }
  0x20   :  { %3495 = vmatpush.bf16.msra.mxu2 %v3014_v28  ;;  %413 = vmatpush.bf16.msra.mxu0 %v3014_v28  ;;  %v2982_v40 = vor.u32 %v3401_v38, %v2981_v37  ;;  %v2983_v41 = vld [vmem:[#allocation8 + $0x30] sm:$0xf0]  ;;  %v2965_v44 = vld [vmem:[#allocation8] sm:$0xf]  ;;  %v3397_v45 = vld [vmem:[#allocation8 + $0xc] sm:$0xf0] }
  0x21   :  { %3499 = vmatpush.bf16.msra.mxu3 %v3018_v30  ;;  %452 = vmatpush.bf16.msra.mxu1 %v3018_v30  ;;  %v2986_v42 = vor.u32 %v3399_v39, %v2983_v41  ;;  %v3395_v46 = vld [vmem:[#allocation8 + $0x4] sm:$0xf]  ;;  %v2966_v47 = vor.u32 %v3397_v45, %v2965_v44  ;;  %v2967_v48 = vld [vmem:[#allocation8 + $0x10] sm:$0xf0]  ;;  %v3021_v50 = vld [vmem:[#allocation8 + $0x68] sm:$0xf] }
  0x22   :  { %v2970_v49 = vor.u32 %v3395_v46, %v2967_v48  ;;  %v3410_v51 = vld [vmem:[#allocation8 + $0x74] sm:$0xf0]  ;;  %v3408_v54 = vld [vmem:[#allocation8 + $0x6c] sm:$0xf]  ;;  %v3023_v55 = vld [vmem:[#allocation8 + $0x78] sm:$0xf0] }
  0x23   :  { %v3022_v52 = vor.u32 %v3410_v51, %v3021_v50  ;;  %v3026_v56 = vor.u32 %v3408_v54, %v3023_v55  ;;  %v3005_v58 = vld [vmem:[#allocation8 + $0x48] sm:$0xf]  ;;  %v3406_v59 = vld [vmem:[#allocation8 + $0x54] sm:$0xf0]  ;;  %v3404_v3 = vld [vmem:[#allocation8 + $0x4c] sm:$0xf] }
  0x24   :  { %3496 = vmatpush.bf16.msra.mxu2 %v2998_v34  ;;  %414 = vmatpush.bf16.msra.mxu0 %v2998_v34  ;;  %v3006_v60 = vor.u32 %v3406_v59, %v3005_v58  ;;  %v3007_v4 = vld [vmem:[#allocation8 + $0x58] sm:$0xf0]  ;;  %v2989_v6 = vld [vmem:[#allocation8 + $0x28] sm:$0xf]  ;;  %v3398_v28 = vld [vmem:[#allocation8 + $0x14] sm:$0xf0] }
  0x25   :  { %3500 = vmatpush.bf16.msra.mxu3 %v3002_v36  ;;  %453 = vmatpush.bf16.msra.mxu1 %v3002_v36  ;;  %v3010_v5 = vor.u32 %v3404_v3, %v3007_v4  ;;  %v2973_v27 = vld [vmem:[#allocation8 + $0x8] sm:$0xf]  ;;  %v3101_v30 = vld [vmem:[#allocation6 + $0x60] sm:$0xf]  ;;  %v3393_v31 = vld [vmem:[#allocation6 + $0x6c] sm:$0xf0] }
  0x26   :  { %207 = vperm.xlu2 %3515, %v110_v7   ;;  %v3402_v7 = vld [vmem:[#allocation8 + $0x34] sm:$0xf0]  ;;  %v2974_v29 = vor.u32 %v3398_v28, %v2973_v27  ;;  %v3391_v32 = vld [vmem:[#allocation6 + $0x64] sm:$0xf]  ;;  %v3102_v33 = vor.u32 %v3393_v31, %v3101_v30  ;;  %v3103_v34 = vld [vmem:[#allocation6 + $0x70] sm:$0xf0] }
  0x27   :  { %204 = vperm.xlu1 %3514, %v109_v8   ;;  %201 = vperm.xlu0 %3513, %v108_v9   ;;  %v2990_v8 = vor.u32 %v3402_v7, %v2989_v6  ;;  %v3106_v35 = vor.u32 %v3391_v32, %v3103_v34  ;;  %v2975_v44 = vld [vmem:[#allocation8 + $0x18] sm:$0xf0]  ;;  %v3085_v45 = vld [vmem:[#allocation6 + $0x40] sm:$0xf]  ;;  %v3389_v46 = vld [vmem:[#allocation6 + $0x4c] sm:$0xf0] }
  0x28   :  { %3497 = vmatpush.bf16.msra.mxu2 %v2982_v40  ;;  %415 = vmatpush.bf16.msra.mxu0 %v2982_v40  ;;  %v3086_v48 = vor.u32 %v3389_v46, %v3085_v45  ;;  %v3087_v50 = vld [vmem:[#allocation6 + $0x50] sm:$0xf0]  ;;  %v3069_v54 = vld [vmem:[#allocation6 + $0x20] sm:$0xf]  ;;  %v3385_v55 = vld [vmem:[#allocation6 + $0x2c] sm:$0xf0] }
  0x29   :  { %3501 = vmatpush.bf16.msra.mxu3 %v2986_v42  ;;  %454 = vmatpush.bf16.msra.mxu1 %v2986_v42  ;;  %v3396_v42 = vld [vmem:[#allocation8 + $0xc] sm:$0xf]  ;;  %v3109_v58 = vld [vmem:[#allocation6 + $0x68] sm:$0xf]  ;;  %v3394_v59 = vld [vmem:[#allocation6 + $0x74] sm:$0xf0] }
  0x2a   :  { %v3071_v61 = vld [vmem:[#allocation6 + $0x30] sm:$0xf0]  ;;  %v3053_v4 = vld [vmem:[#allocation6] sm:$0xf]  ;;  %v3381_v7 = vld [vmem:[#allocation6 + $0xc] sm:$0xf0] }
  0x2b   :  { %v3093_v45 = vld [vmem:[#allocation6 + $0x48] sm:$0xf]  ;;  %v3390_v46 = vld [vmem:[#allocation6 + $0x54] sm:$0xf0] }
  0x2c   :  { %3498 = vmatpush.bf16.msra.mxu2 %v2966_v47  ;;  %416 = vmatpush.bf16.msra.mxu0 %v2966_v47  ;;  %v2978_v47 = vor.u32 %v3396_v42, %v2975_v44 }
  0x2d   :  { %3502 = vmatpush.bf16.msra.mxu3 %v2970_v49  ;;  %455 = vmatpush.bf16.msra.mxu1 %v2970_v49  ;;  %v3387_v49 = vld [vmem:[#allocation6 + $0x44] sm:$0xf] }
  0x2e   :  { %216 = vperm.xlu2 %3515, %v113_v10  }
  0x2f   :  { %213 = vperm.xlu1 %3514, %v112_v11   ;;  %210 = vperm.xlu0 %3513, %v111_v12  }
  0x30   :  { %491 = vmatpush.bf16.msrb.mxu2 %v3022_v52  ;;  %667 = vmatpush.bf16.msrb.mxu0 %v3102_v33  ;;  %v3090_v52 = vor.u32 %v3387_v49, %v3087_v50  ;;  %v3095_v50 = vld [vmem:[#allocation6 + $0x58] sm:$0xf0] }
  0x31   :  { %530 = vmatpush.bf16.msrb.mxu3 %v3026_v56  ;;  %706 = vmatpush.bf16.msrb.mxu1 %v3106_v35  ;;  %v3383_v56 = vld [vmem:[#allocation6 + $0x24] sm:$0xf] }
  0x32   :  { %v3074_v3 = vor.u32 %v3383_v56, %v3071_v61  ;;  %v3386_v56 = vld [vmem:[#allocation6 + $0x34] sm:$0xf0] }
  0x34   :  { %492 = vmatpush.bf16.msrb.mxu2 %v3006_v60  ;;  %668 = vmatpush.bf16.msrb.mxu0 %v3086_v48  ;;  %v3070_v60 = vor.u32 %v3385_v55, %v3069_v54 }
  0x35   :  { %531 = vmatpush.bf16.msrb.mxu3 %v3010_v5  ;;  %707 = vmatpush.bf16.msrb.mxu1 %v3090_v52 }
  0x36   :  { %129 = vperm.xlu2 %3515, %v98_v13   ;;  %v3820_v13 = vmov 0.0  }
  0x37   :  { %126 = vperm.xlu1 %3514, %v97_v14   ;;  %123 = vperm.xlu0 %3513, %v96_v15  }
  0x38   :  { %493 = vmatpush.bf16.msrb.mxu2 %v2990_v8  ;;  %v3379_v8 = vld [vmem:[#allocation6 + $0x4] sm:$0xf]  ;;  %669 = vmatpush.bf16.msrb.mxu0 %v3070_v60 }
  0x39   :  { %708 = vmatpush.bf16.msrb.mxu1 %v3074_v3  ;;  %v3079_v3 = vld [vmem:[#allocation6 + $0x38] sm:$0xf0] }
  0x3c   :  { %494 = vmatpush.bf16.msrb.mxu2 %v2974_v29  ;;  %v3111_v29 = vld [vmem:[#allocation6 + $0x78] sm:$0xf0] }
  0x3e   :  { %138 = vperm.xlu2 %3515, %v101_v16  }
  0x3f   :  { %135 = vperm.xlu1 %3514, %v100_v17   ;;  %132 = vperm.xlu0 %3513, %v99_v18   ;;  %v3400_v17 = vld [vmem:[#allocation8 + $0x2c] sm:$0xf]  ;;  %v2991_v18 = vld [vmem:[#allocation8 + $0x38] sm:$0xf0] }
  0x46   :  { %147 = vperm.xlu2 %3515, %v104_v19   ;;  %v2994_v19 = vor.u32 %v3400_v17, %v2991_v18 }
  0x47   :  { %144 = vperm.xlu1 %3514, %v103_v20   ;;  %141 = vperm.xlu0 %3513, %v102_v21  }
  0x48   :  { %532 = vmatpush.bf16.msrb.mxu3 %v2994_v19 }
  0x4c   :  { %533 = vmatpush.bf16.msrb.mxu3 %v2978_v47  ;;  %v3094_v47 = vor.u32 %v3390_v46, %v3093_v45  ;;  %v3063_v45 = vld [vmem:[#allocation6 + $0x18] sm:$0xf0] }
  0x4e   :  { %156 = vperm.xlu2 %3515, %v107_v22  }
  0x4f   :  { %153 = vperm.xlu1 %3514, %v106_v23   ;;  %150 = vperm.xlu0 %3513, %v105_v24  }
  0x70   :  { %v3958_v43 = vpop.permute.xlu2 %231 }
  0x71   :  { %vm246_vm10 = vcmp.eq.s32.totalorder %v3958_v43, %v3968_v2 }
  0x72   :  { %v2961_v31 = vsel %vm246_vm10, 1.0, %v3820_v13 }
  0x78   :  { %v3960_v53 = vpop.permute.xlu2 %234 }
  0x79   :  { %vm247_vm11 = vcmp.eq.s32.totalorder %v3960_v53, %v3968_v2 }
  0x7a   :  { %v2962_v32 = vsel %vm247_vm11, 1.0, %v3820_v13 }
  0x7b   :  { %v4092_v35 = vpack.c.bf16 %v2962_v32, %v2961_v31  ;;  %v3239_v31 = vld [vmem:[%s5528_s5 + $0xd0] sm:$0xf0] }
  0x80   :  { %v3962_v57 = vpop.permute.xlu2 %207 }
  0x81   :  { %vm238_vm8 = vcmp.eq.s32.totalorder %v3962_v57, %v3968_v2 }
  0x88   :  { %v3964_v63 = vpop.permute.xlu2 %216 }
  0x89   :  { %v226_v62 = vpop.permute.xlu1 %225  ;;  %v3966_v1 = vpop.permute.xlu0 %219  ;;  %vm241_vm12 = vcmp.eq.s32.totalorder %v3964_v63, %v3968_v2 }
  0x8a   :  { %vm242_vm0 = vcmp.eq.s32.totalorder %v3966_v1, %v3968_v2  ;;  %vm244_vm6 = vcmp.eq.s32.totalorder %v226_v62, %v3968_v2 }
  0x8b   :  { %v2957_v14 = vsel %vm242_vm0, 1.0, %v3820_v13  ;;  %v2959_v36 = vsel %vm244_vm6, 1.0, %v3820_v13 }
  0x90   :  { %v3975_v10 = vpop.permute.xlu2 %129 }
  0x91   :  { %v3972_v9 = vpop.permute.xlu1 %228  ;;  %v3977_v11 = vpop.permute.xlu0 %222  ;;  %v3983_v12 = vsel %vm925_vm1, %v3975_v10, %v3962_v57 }
  0x92   :  { %5576 = vst [vmem:[#allocation16_spill] sm:$0xff] %v3983_v12  ;;  %vm243_vm2 = vcmp.eq.s32.totalorder %v3977_v11, %v3968_v2  ;;  %vm245_vm7 = vcmp.eq.s32.totalorder %v3972_v9, %v3968_v2 }
  0x93   :  { %v2958_v15 = vsel %vm243_vm2, 1.0, %v3820_v13  ;;  %v2960_v37 = vsel %vm245_vm7, 1.0, %v3820_v13 }
  0x94   :  { %v3989_v16 = vpack.c.bf16 %v2958_v15, %v2957_v14  ;;  %v4035_v51 = vpack.c.bf16 %v2960_v37, %v2959_v36  ;;  %v3055_v14 = vld [vmem:[#allocation6 + $0x10] sm:$0xf0]  ;;  %v2953_v15 = vsel %vm238_vm8, 1.0, %v3820_v13  ;;  %v2956_v37 = vsel %vm241_vm12, 1.0, %v3820_v13 }
  0x95   :  { %v3058_v27 = vor.u32 %v3379_v8, %v3055_v14  ;;  %v3253_v8 = vld [vmem:[%s5528_s5 + $0xe0] sm:$0xf]  ;;  %v3441_v14 = vld [vmem:[%s5528_s5 + $0xec] sm:$0xf0] }
  0x96   :  { %3030 = vmatmul.msk.bf16.vlgmr.msra.gmra.mxu2 %vm390_vm3, %v3989_v16  ;;  %3036 = vmatmul.msk.bf16.vlgmr.msra.gmra.mxu3 %vm390_vm3, %v3989_v16 }
  0x97   :  { %709 = vmatpush.bf16.msrb.mxu1 %v3058_v27 }
  0x98   :  { %v3997_v21 = vpop.permute.xlu2 %138 }
  0x99   :  { %v3995_v20 = vpop.permute.xlu1 %204  ;;  %v4001_v22 = vpop.permute.xlu0 %201  ;;  %v4007_v23 = vsel %vm925_vm1, %v3997_v21, %v3964_v63 }
  0x9a   :  { %vm237_vm4 = vcmp.eq.s32.totalorder %v3995_v20, %v3968_v2  ;;  %5577 = vst [vmem:[#allocation17_spill] sm:$0xff] %v4007_v23  ;;  %vm236_vm5 = vcmp.eq.s32.totalorder %v4001_v22, %v3968_v2 }
  0x9b   :  { %v2952_v24 = vsel %vm237_vm4, 1.0, %v3820_v13  ;;  %v2951_v25 = vsel %vm236_vm5, 1.0, %v3820_v13  ;;  %vm163_vm4 = vcmp.eq.s32.totalorder %v3997_v21, %v3968_v2  ;;  %v3061_v21 = vld [vmem:[#allocation6 + $0x8] sm:$0xf] }
  0x9c   :  { %v4013_v26 = vpack.c.bf16 %v2952_v24, %v2951_v25  ;;  %v3054_v25 = vor.u32 %v3381_v7, %v3053_v4 }
  0x9e   :  { %3027 = vmatmul.msk.bf16.vlgmr.msra.gmra.mxu0 %vm390_vm3, %v4013_v26  ;;  %3033 = vmatmul.msk.bf16.vlgmr.msra.gmra.mxu1 %vm390_vm3, %v4013_v26 }
  0x9f   :  { %670 = vmatpush.bf16.msrb.mxu0 %v3054_v25  ;;  %v3255_v25 = vld [vmem:[%s5528_s5 + $0xf0] sm:$0xf0] }
  0xa0   :  { %v4026_v39 = vpop.permute.xlu2 %147 }
  0xa1   :  { %v4024_v38 = vpop.permute.xlu1 %213  ;;  %v4028_v40 = vpop.permute.xlu0 %210  ;;  %v4033_v41 = vsel %vm925_vm1, %v4026_v39, %v226_v62  ;;  %v3110_v62 = vor.u32 %v3394_v59, %v3109_v58  ;;  %vm166_vm8 = vcmp.eq.s32.totalorder %v4026_v39, %v3968_v2  ;;  %v3411_v39 = vld [vmem:[%s5528_s5 + $0x4] sm:$0xf] }
  0xa2   :  { %5578 = vst [vmem:[#allocation18_spill] sm:$0xff] %v4033_v41  ;;  %vm239_vm9 = vcmp.eq.s32.totalorder %v4028_v40, %v3968_v2  ;;  %vm240_vm13 = vcmp.eq.s32.totalorder %v4024_v38, %v3968_v2  ;;  %v3183_v41 = vld [vmem:[%s5528_s5 + $0x58] sm:$0xf0] }
  0xa3   :  { %v2954_v17 = vsel %vm239_vm9, 1.0, %v3820_v13  ;;  %745 = vmatpush.bf16.msra.mxu2 %v3110_v62  ;;  %v3384_v62 = vld [vmem:[#allocation6 + $0x2c] sm:$0xf] }
  0xa4   :  { %v273_v28 = vpack.c.bf16 %v2954_v17, %v2953_v15  ;;  %v3082_v4 = vor.u32 %v3384_v62, %v3079_v3  ;;  %v3439_v15 = vld [vmem:[%s5528_s5 + $0xe4] sm:$0xf]  ;;  %v3382_v17 = vld [vmem:[#allocation6 + $0x14] sm:$0xf0] }
  0xa5   :  { %v3062_v27 = vor.u32 %v3382_v17, %v3061_v21  ;;  %v3423_v62 = vld [vmem:[%s5528_s5 + $0x64] sm:$0xf]  ;;  %v3175_v21 = vld [vmem:[%s5528_s5 + $0x50] sm:$0xf0] }
  0xa6   :  { %3031 = vmatmul.msk.bf16.gmra.mxu2 %vm390_vm3, %v4035_v51  ;;  %3037 = vmatmul.msk.bf16.gmra.mxu3 %vm390_vm3, %v4035_v51 }
  0xa7   :  { %746 = vmatpush.bf16.msra.mxu2 %v3094_v47 }
  0xa8   :  { %v4045_v5 = vpop.permute.xlu2 %156 }
  0xa9   :  { %v127_v6 = vpop.permute.xlu1 %126  ;;  %v4059_v18 = vsel %vm925_vm1, %v4045_v5, %v3960_v53  ;;  %v124_v24 = vpop.permute.xlu0 %123  ;;  %vm169_vm10 = vcmp.eq.s32.totalorder %v4045_v5, %v3968_v2  ;;  %v3247_v5 = vld [vmem:[%s5528_s5 + $0xd8] sm:$0xf0] }
  0xaa   :  { %5579 = vst [vmem:[#allocation19_spill] sm:$0xff] %v4059_v18  ;;  %v4064_v19 = vsel %vm925_vm1, %v127_v6, %v3995_v20  ;;  %v4069_v57 = vsel %vm925_vm1, %v124_v24, %v4001_v22  ;;  %v3392_v20 = vld [vmem:[#allocation6 + $0x6c] sm:$0xf]  ;;  %vm159_vm14 = vcmp.eq.s32.totalorder %v127_v6, %v3968_v2  ;;  %vm158_vm15 = vcmp.eq.s32.totalorder %v124_v24, %v3968_v2 }
  0xab   :  { %5580 = vst [vmem:[#allocation20_spill] sm:$0xff] %v4064_v19  ;;  %v3114_v22 = vor.u32 %v3392_v20, %v3111_v29  ;;  %v2940_v54 = vsel %vm159_vm14, 1.0, %v3820_v13  ;;  %v2939_v55 = vsel %vm158_vm15, 1.0, %v3820_v13  ;;  %v2944_v6 = vsel %vm163_vm4, 1.0, %v3820_v13  ;;  %v3237_v20 = vld [vmem:[%s5528_s5 + $0xc0] sm:$0xf] }
  0xac   :  { %5581 = vst [vmem:[#allocation21_spill] sm:$0xff] %v4069_v57  ;;  %v4188_v24 = vor.u32 %v3441_v14, %v3253_v8  ;;  %v3437_v29 = vld [vmem:[%s5528_s5 + $0xcc] sm:$0xf0]  ;;  %v3419_v14 = vld [vmem:[%s5528_s5 + $0x44] sm:$0xf] }
  0xad   :  { %784 = vmatpush.bf16.msra.mxu3 %v3114_v22  ;;  %v3435_v22 = vld [vmem:[%s5528_s5 + $0xc4] sm:$0xf]  ;;  %v3421_v8 = vld [vmem:[%s5528_s5 + $0x4c] sm:$0xf0]  ;;  %v4299_v17 = vor.u32 %v3419_v14, %v3175_v21 }
  0xae   :  { %3028 = vmatmul.msk.bf16.gmra.mxu0 %vm390_vm3, %v273_v28  ;;  %3034 = vmatmul.msk.bf16.gmra.mxu1 %vm390_vm3, %v273_v28  ;;  %v4211_v32 = vor.u32 %v3435_v22, %v3239_v31  ;;  %v3159_v31 = vld [vmem:[%s5528_s5 + $0x30] sm:$0xf0] }
  0xaf   :  { %1146 = vmatpush.bf16.msra.mxu0 %v4188_v24 }
  0xb1   :  { %v4077_v30 = vpop.permute.xlu1 %135  ;;  %v133_v33 = vpop.permute.xlu0 %132 }
  0xb2   :  { %v4085_v53 = vsel %vm925_vm1, %v4077_v30, %v4024_v38  ;;  %v4090_v34 = vsel %vm925_vm1, %v133_v33, %v4028_v40  ;;  %v2955_v40 = vsel %vm240_vm13, 1.0, %v3820_v13  ;;  %vm161_vm0 = vcmp.eq.s32.totalorder %v133_v33, %v3968_v2  ;;  %v3221_v33 = vld [vmem:[%s5528_s5 + $0xa0] sm:$0xf] }
  0xb3   :  { %5582 = vst [vmem:[#allocation22_spill] sm:$0xff] %v4085_v53  ;;  %v274_v44 = vpack.c.bf16 %v2956_v37, %v2955_v40  ;;  %v2942_v59 = vsel %vm161_vm0, 1.0, %v3820_v13  ;;  %vm162_vm2 = vcmp.eq.s32.totalorder %v4077_v30, %v3968_v2  ;;  %v4205_v30 = vor.u32 %v3437_v29, %v3237_v20  ;;  %v3433_v37 = vld [vmem:[%s5528_s5 + $0xac] sm:$0xf0]  ;;  %v3431_v40 = vld [vmem:[%s5528_s5 + $0xa4] sm:$0xf] }
  0xb4   :  { %5583 = vst [vmem:[#allocation23_spill] sm:$0xff] %v4090_v34  ;;  %v3415_v20 = vld [vmem:[%s5528_s5 + $0x24] sm:$0xf]  ;;  %v3442_v29 = vld [vmem:[%s5528_s5 + $0xf4] sm:$0xf0] }
  0xb5   :  { %1147 = vmatpush.bf16.msra.mxu0 %v4205_v30 }
  0xb6   :  { %3032 = vmatmul.msk.bf16.gmra.mxu2 %vm390_vm3, %v4092_v35  ;;  %3038 = vmatmul.msk.bf16.gmra.mxu3 %vm390_vm3, %v4092_v35 }
  0xb9   :  { %v4102_v36 = vpop.permute.xlu1 %144  ;;  %v4112_v42 = vpop.permute.xlu0 %141 }
  0xba   :  { %v4110_v63 = vsel %vm925_vm1, %v4102_v36, %v3977_v11  ;;  %v4118_v38 = vsel %vm925_vm1, %v4112_v42, %v3966_v1  ;;  %vm165_vm5 = vcmp.eq.s32.totalorder %v4102_v36, %v3968_v2  ;;  %vm164_vm6 = vcmp.eq.s32.totalorder %v4112_v42, %v3968_v2  ;;  %v3223_v42 = vld [vmem:[%s5528_s5 + $0xb0] sm:$0xf0] }
  0xbb   :  { %5584 = vst [vmem:[#allocation24_spill] sm:$0xff] %v4110_v63  ;;  %v4232_v36 = vor.u32 %v3433_v37, %v3221_v33  ;;  %v4237_v46 = vor.u32 %v3431_v40, %v3223_v42  ;;  %v4331_v37 = vor.u32 %v3415_v20, %v3159_v31  ;;  %v3141_v40 = vld [vmem:[%s5528_s5] sm:$0xf]  ;;  %v3413_v42 = vld [vmem:[%s5528_s5 + $0xc] sm:$0xf0] }
  0xbc   :  { %5585 = vst [vmem:[#allocation25_spill] sm:$0xff] %v4118_v38  ;;  %v3414_v38 = vld [vmem:[%s5528_s5 + $0x14] sm:$0xf0] }
  0xbd   :  { %1148 = vmatpush.bf16.msra.mxu0 %v4232_v36 }
  0xbe   :  { %3029 = vmatmul.msk.bf16.gmra.mxu0 %vm390_vm3, %v274_v44  ;;  %3035 = vmatmul.msk.bf16.gmra.mxu1 %vm390_vm3, %v274_v44 }
  0xc1   :  { %v4122_v48 = vpop.permute.xlu1 %153  ;;  %v4130_v49 = vpop.permute.xlu0 %150 }
  0xc2   :  { %v4128_v11 = vsel %vm925_vm1, %v4122_v48, %v3958_v43  ;;  %v4136_v1 = vsel %vm925_vm1, %v4130_v49, %v3972_v9  ;;  %v3388_v43 = vld [vmem:[#allocation6 + $0x4c] sm:$0xf]  ;;  %v4146_v9 = vpack.c.bf16 %v2940_v54, %v2939_v55  ;;  %vm160_vm1 = vcmp.eq.s32.totalorder %v3975_v10, %v3968_v2  ;;  %v3427_v54 = vld [vmem:[%s5528_s5 + $0x84] sm:$0xf] }
  0xc3   :  { %5586 = vst [vmem:[#allocation26_spill] sm:$0xff] %v4128_v11  ;;  %v3098_v52 = vor.u32 %v3388_v43, %v3095_v50  ;;  %v2941_v60 = vsel %vm160_vm1, 1.0, %v3820_v13  ;;  %v2943_v10 = vsel %vm162_vm2, 1.0, %v3820_v13  ;;  %v2946_v43 = vsel %vm165_vm5, 1.0, %v3820_v13 }
  0xc4   :  { %5587 = vst [vmem:[#allocation27_spill] sm:$0xff] %v4136_v1  ;;  %v4159_v61 = vpack.c.bf16 %v2942_v59, %v2941_v60  ;;  %v4173_v7 = vpack.c.bf16 %v2944_v6, %v2943_v10  ;;  %v2945_v50 = vsel %vm164_vm6, 1.0, %v3820_v13  ;;  %v3189_v59 = vld [vmem:[%s5528_s5 + $0x60] sm:$0xf]  ;;  %v3425_v60 = vld [vmem:[%s5528_s5 + $0x6c] sm:$0xf0]  ;;  %vm167_vm7 = vcmp.eq.s32.totalorder %v4130_v49, %v3968_v2 }
  0xc5   :  { %785 = vmatpush.bf16.msra.mxu3 %v3098_v52  ;;  %v3429_v52 = vld [vmem:[%s5528_s5 + $0x8c] sm:$0xf0]  ;;  %v4276_v3 = vor.u32 %v3425_v60, %v3189_v59  ;;  %v3173_v6 = vld [vmem:[%s5528_s5 + $0x40] sm:$0xf]  ;;  %v3261_v49 = vld [vmem:[%s5528_s5 + $0xe8] sm:$0xf]  ;;  %vm168_vm9 = vcmp.eq.s32.totalorder %v4122_v48, %v3968_v2 }
  0xc6   :  { %3039 = vmatmul.msk.bf16.vlgmr.msrb.gmra.mxu2 %vm390_vm3, %v4013_v26  ;;  %3045 = vmatmul.msk.bf16.vlgmr.msrb.gmra.mxu3 %vm390_vm3, %v4013_v26  ;;  %v3077_v26 = vld [vmem:[#allocation6 + $0x28] sm:$0xf]  ;;  %v4329_v33 = vor.u32 %v3442_v29, %v3261_v49  ;;  %v3438_v59 = vld [vmem:[%s5528_s5 + $0xd4] sm:$0xf0]  ;;  %v2950_v48 = vsel %vm169_vm10, 1.0, %v3820_v13 }
  0xc7   :  { %v3078_v58 = vor.u32 %v3386_v56, %v3077_v26  ;;  %v3207_v26 = vld [vmem:[%s5528_s5 + $0x90] sm:$0xf0]  ;;  %v3436_v2 = vld [vmem:[%s5528_s5 + $0xcc] sm:$0xf] }
  0xc8   :  { %v4257_v56 = vor.u32 %v3427_v54, %v3207_v26  ;;  %v3245_v26 = vld [vmem:[%s5528_s5 + $0xc8] sm:$0xf] }
  0xc9   :  { %747 = vmatpush.bf16.msra.mxu2 %v3078_v58  ;;  %786 = vmatpush.bf16.msra.mxu3 %v3082_v4  ;;  %v4259_v58 = vpack.c.bf16 %v2946_v43, %v2945_v50  ;;  %v3191_v4 = vld [vmem:[%s5528_s5 + $0x70] sm:$0xf0]  ;;  %v4382_v60 = vor.u32 %v3438_v59, %v3245_v26 }
  0xca   :  { %v4281_v10 = vor.u32 %v3423_v62, %v3191_v4  ;;  %v2949_v62 = vsel %vm168_vm9, 1.0, %v3820_v13 }
  0xcb   :  { %v4417_v21 = vpack.c.bf16 %v2950_v48, %v2949_v62 }
  0xcd   :  { %748 = vmatpush.bf16.msra.mxu2 %v3062_v27  ;;  %v3417_v27 = vld [vmem:[%s5528_s5 + $0x2c] sm:$0xf0] }
  0xce   :  { %3115 = vmatmul.msk.bf16.vlgmr.msrb.gmra.mxu0 %vm390_vm3, %v4146_v9  ;;  %3121 = vmatmul.msk.bf16.vlgmr.msrb.gmra.mxu1 %vm390_vm3, %v4146_v9 }
  0xd1   :  { %1172 = vmatpush.bf16.msrb.mxu2 %v4329_v33 }
  0xd5   :  { %1173 = vmatpush.bf16.msrb.mxu2 %v4382_v60 }
  0xd6   :  { %3040 = vmatmul.msk.bf16.gmra.mxu2 %vm390_vm3, %v273_v28  ;;  %3046 = vmatmul.msk.bf16.gmra.mxu3 %vm390_vm3, %v273_v28  ;;  %v4193_v28 = vor.u32 %v3439_v15, %v3255_v25  ;;  %v4294_v15 = vor.u32 %v3421_v8, %v3173_v6  ;;  %v3157_v25 = vld [vmem:[%s5528_s5 + $0x20] sm:$0xf] }
  0xd7   :  { %v4324_v22 = vor.u32 %v3417_v27, %v3157_v25  ;;  %v3434_v25 = vld [vmem:[%s5528_s5 + $0xb4] sm:$0xf0] }
  0xd8   :  { %1159 = vmatpush.bf16.msra.mxu1 %v4193_v28 }
  0xdc   :  { %1160 = vmatpush.bf16.msra.mxu1 %v4211_v32 }
  0xde   :  { %3116 = vmatmul.msk.bf16.gmra.mxu0 %vm390_vm3, %v4159_v61  ;;  %3122 = vmatmul.msk.bf16.gmra.mxu1 %vm390_vm3, %v4159_v61 }
  0xe0   :  { %1161 = vmatpush.bf16.msra.mxu1 %v4237_v46 }
  0xe4   :  { %1162 = vmatpush.bf16.msra.mxu1 %v4257_v56 }
  0xe6   :  { %3041 = vmatmul.msk.bf16.gmra.mxu2 %vm390_vm3, %v274_v44  ;;  %3047 = vmatmul.msk.bf16.gmra.mxu3 %vm390_vm3, %v274_v44  ;;  %v3380_v44 = vld [vmem:[#allocation6 + $0xc] sm:$0xf] }
  0xe7   :  { %v3066_v47 = vor.u32 %v3380_v44, %v3063_v45  ;;  %v4348_v44 = vor.u32 %v3413_v42, %v3141_v40  ;;  %v3143_v45 = vld [vmem:[%s5528_s5 + $0x10] sm:$0xf0]  ;;  %v3231_v40 = vld [vmem:[%s5528_s5 + $0xb8] sm:$0xf0] }
  0xe8   :  { %1163 = vmatpush.bf16.msra.mxu1 %v4281_v10  ;;  %v4354_v43 = vor.u32 %v3411_v39, %v3143_v45 }
  0xe9   :  { %787 = vmatpush.bf16.msra.mxu3 %v3066_v47  ;;  %v2947_v47 = vsel %vm166_vm8, 1.0, %v3820_v13 }
  0xec   :  { %1164 = vmatpush.bf16.msra.mxu1 %v4299_v17 }
  0xee   :  { %3117 = vmatmul.msk.bf16.gmra.mxu0 %vm390_vm3, %v4173_v7  ;;  %3123 = vmatmul.msk.bf16.gmra.mxu1 %vm390_vm3, %v4173_v7 }
  0xf0   :  { %1165 = vmatpush.bf16.msra.mxu1 %v4331_v37 }
  0xf4   :  { %1166 = vmatpush.bf16.msra.mxu1 %v4354_v43 }
  0xf6   :  { %3042 = vmatmul.msk.bf16.gmra.mxu2 %vm390_vm3, %v3989_v16  ;;  %3048 = vmatmul.msk.bf16.gmra.mxu3 %vm390_vm3, %v3989_v16  ;;  %v3205_v16 = vld [vmem:[%s5528_s5 + $0x80] sm:$0xf] }
  0xf7   :  { %v4252_v55 = vor.u32 %v3429_v52, %v3205_v16  ;;  %v3440_v16 = vld [vmem:[%s5528_s5 + $0xec] sm:$0xf]  ;;  %v3263_v52 = vld [vmem:[%s5528_s5 + $0xf8] sm:$0xf0] }
  0xf8   :  { %v4371_v54 = vor.u32 %v3440_v16, %v3263_v52  ;;  %1285 = vmatpush.bf16.msrb.mxu1 %v4193_v28 }
  0xf9   :  { %1149 = vmatpush.bf16.msra.mxu0 %v4252_v55 }
  0xfa   :  { %1185 = vmatpush.bf16.msrb.mxu3 %v4371_v54 }
  0xfc   :  { %1286 = vmatpush.bf16.msrb.mxu1 %v4211_v32 }
  0xfd   :  { %1150 = vmatpush.bf16.msra.mxu0 %v4276_v3 }
  0xfe   :  { %3118 = vmatmul.msk.bf16.gmra.mxu0 %vm390_vm3, %v4259_v58  ;;  %3124 = vmatmul.msk.bf16.gmra.mxu1 %vm390_vm3, %v4259_v58 }
 0x100   :  { %1287 = vmatpush.bf16.msrb.mxu1 %v4237_v46 }
 0x101   :  { %1151 = vmatpush.bf16.msra.mxu0 %v4294_v15 }
 0x104   :  { %1288 = vmatpush.bf16.msrb.mxu1 %v4257_v56 }
 0x105   :  { %1152 = vmatpush.bf16.msra.mxu0 %v4324_v22 }
 0x106   :  { %3043 = vmatmul.msk.bf16.gmra.mxu2 %vm390_vm3, %v4035_v51  ;;  %3049 = vmatmul.msk.bf16.gmra.mxu3 %vm390_vm3, %v4035_v51  ;;  %v2948_v51 = vsel %vm167_vm7, 1.0, %v3820_v13  ;;  %v4419_v13 = vor.u32 %v3436_v2, %v3247_v5  ;;  %v3428_v5 = vld [vmem:[%s5528_s5 + $0x8c] sm:$0xf]  ;;  %vm5574_vm7 = vcmp.ne.s32.totalorder %v4069_v57, 0 }
 0x107   :  { %v4356_v50 = vpack.c.bf16 %v2948_v51, %v2947_v47  ;;  %v3432_v51 = vld [vmem:[%s5528_s5 + $0xac] sm:$0xf]  ;;  %v3430_v47 = vld [vmem:[%s5528_s5 + $0x94] sm:$0xf0]  ;;  %vm3270_vm8 = vmpackc.low %vm5574_vm7, %vm5574_vm7 }
 0x108   :  { %1186 = vmatpush.bf16.msrb.mxu3 %v4419_v13  ;;  %1289 = vmatpush.bf16.msrb.mxu1 %v4281_v10  ;;  %v4455_v42 = vor.u32 %v3432_v51, %v3231_v40  ;;  %v3197_v51 = vld [vmem:[%s5528_s5 + $0x68] sm:$0xf]  ;;  %v3426_v40 = vld [vmem:[%s5528_s5 + $0x74] sm:$0xf0] }
 0x109   :  { %1153 = vmatpush.bf16.msra.mxu0 %v4348_v44 }
 0x10c   :  { %1290 = vmatpush.bf16.msrb.mxu1 %v4299_v17  ;;  %1187 = vmatpush.bf16.msrb.mxu3 %v4455_v42 }
 0x10d   :  { %1272 = vmatpush.bf16.msrb.mxu0 %v4188_v24 }
 0x10e   :  { %3119 = vmatmul.msk.bf16.gmra.mxu0 %vm390_vm3, %v4356_v50  ;;  %3125 = vmatmul.msk.bf16.gmra.mxu1 %vm390_vm3, %v4356_v50 }
 0x110   :  { %1291 = vmatpush.bf16.msrb.mxu1 %v4331_v37 }
 0x111   :  { %1273 = vmatpush.bf16.msrb.mxu0 %v4205_v30 }
 0x114   :  { %1292 = vmatpush.bf16.msrb.mxu1 %v4354_v43 }
 0x115   :  { %1274 = vmatpush.bf16.msrb.mxu0 %v4232_v36 }
 0x116   :  { %3044 = vmatmul.msk.bf16.gmra.mxu2 %vm390_vm3, %v4092_v35  ;;  %3050 = vmatmul.msk.bf16.gmra.mxu3 %vm390_vm3, %v4092_v35  ;;  %v3229_v35 = vld [vmem:[%s5528_s5 + $0xa8] sm:$0xf] }
 0x117   :  { %v4424_v27 = vor.u32 %v3434_v25, %v3229_v35  ;;  %v3215_v35 = vld [vmem:[%s5528_s5 + $0x98] sm:$0xf0] }
 0x118   :  { %v4498_v25 = vor.u32 %v3428_v5, %v3215_v35 }
 0x119   :  { %v4397_v4 = vpop.f32.mrf.mxu2  ;;  %v4399_v6 = vpop.f32.mrf.mxu3  ;;  %1275 = vmatpush.bf16.msrb.mxu0 %v4252_v55  ;;  %1174 = vmatpush.bf16.msrb.mxu2 %v4424_v27 }
 0x11a   :  { %5588 = vst [vmem:[#allocation28_spill] sm:$0xff] %v4397_v4  ;;  %1188 = vmatpush.bf16.msrb.mxu3 %v4498_v25 }
 0x11b   :  { %5589 = vst [vmem:[#allocation29_spill] sm:$0xff] %v4399_v6  ;;  %v4403_v8 = vpop.f32.mrf.mxu0  ;;  %v4405_v14 = vpop.f32.mrf.mxu1 }
 0x11d   :  { %1276 = vmatpush.bf16.msrb.mxu0 %v4276_v3 }
 0x11e   :  { %3120 = vmatmul.msk.bf16.gmra.mxu0 %vm390_vm3, %v4417_v21  ;;  %3126 = vmatmul.msk.bf16.gmra.mxu1 %vm390_vm3, %v4417_v21 }
 0x121   :  { %v4434_v20 = vpop.f32.mrf.mxu2  ;;  %v4436_v49 = vpop.f32.mrf.mxu3  ;;  %1277 = vmatpush.bf16.msrb.mxu0 %v4294_v15 }
 0x122   :  { %5590 = vst [vmem:[#allocation30_spill] sm:$0xff] %v4434_v20 }
 0x123   :  { %5591 = vst [vmem:[#allocation31_spill] sm:$0xff] %v4436_v49  ;;  %v4439_v29 = vpop.f32.mrf.mxu0  ;;  %v4441_v31 = vpop.f32.mrf.mxu1 }
 0x125   :  { %1278 = vmatpush.bf16.msrb.mxu0 %v4324_v22 }
 0x126   :  { %3127 = vmatmul.msk.bf16.vlgmr.msra.gmra.mxu2 %vm390_vm3, %v4146_v9  ;;  %3133 = vmatmul.msk.bf16.vlgmr.msra.gmra.mxu3 %vm390_vm3, %v4146_v9  ;;  %v3213_v9 = vld [vmem:[%s5528_s5 + $0x88] sm:$0xf] }
 0x127   :  { %v4470_v16 = vor.u32 %v3430_v47, %v3213_v9  ;;  %v4511_v9 = vor.u32 %v3426_v40, %v3197_v51  ;;  %v3424_v51 = vld [vmem:[%s5528_s5 + $0x6c] sm:$0xf]  ;;  %v3199_v40 = vld [vmem:[%s5528_s5 + $0x78] sm:$0xf0] }
 0x129   :  { %v4458_v39 = vpop.f32.mrf.mxu2  ;;  %v4460_v45 = vpop.f32.mrf.mxu3  ;;  %1279 = vmatpush.bf16.msrb.mxu0 %v4348_v44  ;;  %1175 = vmatpush.bf16.msrb.mxu2 %v4470_v16 }
 0x12a   :  { %5592 = vst [vmem:[#allocation32_spill] sm:$0xff] %v4458_v39 }
 0x12b   :  { %5593 = vst [vmem:[#allocation33_spill] sm:$0xff] %v4460_v45  ;;  %v4472_v52 = vpop.f32.mrf.mxu0  ;;  %v4474_v26 = vpop.f32.mrf.mxu1  ;;  %v3165_v45 = vld [vmem:[%s5528_s5 + $0x28] sm:$0xf] }
 0x12d   :  { %1176 = vmatpush.bf16.msrb.mxu2 %v4511_v9 }
 0x12e   :  { %1154 = vmatmul.bf16.vlgmr.msra.gmra.mxu0 %v5533_v0  ;;  %1167 = vmatmul.bf16.vlgmr.msra.gmra.mxu1 %v5533_v0  ;;  %v4532_v0 = vor.u32 %v3424_v51, %v3199_v40 }
 0x12f   :  { %1399 = vmatpush.bf16.msra.mxu0 %v4188_v24  ;;  %1412 = vmatpush.bf16.msra.mxu1 %v4193_v28 }
 0x130   :  { %1189 = vmatpush.bf16.msrb.mxu3 %v4532_v0 }
 0x131   :  { %v4482_v59 = vpop.f32.mrf.mxu2  ;;  %v4484_v62 = vpop.f32.mrf.mxu3 }
 0x132   :  { %5594 = vst [vmem:[#allocation34_spill] sm:$0xff] %v4482_v59 }
 0x133   :  { %5595 = vst [vmem:[#allocation35_spill] sm:$0xff] %v4484_v62  ;;  %v4486_v48 = vpop.f32.mrf.mxu0  ;;  %v4488_v2 = vpop.f32.mrf.mxu1  ;;  %1400 = vmatpush.bf16.msra.mxu0 %v4205_v30  ;;  %1413 = vmatpush.bf16.msra.mxu1 %v4211_v32 }
 0x134   :  { %5596 = vst [vmem:[#allocation36_spill] sm:$0xff] %v4486_v48 }
 0x135   :  { %5597 = vst [vmem:[#allocation37_spill] sm:$0xff] %v4488_v2 }
 0x136   :  { %3128 = vmatmul.msk.bf16.gmra.mxu2 %vm390_vm3, %v4159_v61  ;;  %3134 = vmatmul.msk.bf16.gmra.mxu3 %vm390_vm3, %v4159_v61 }
 0x137   :  { %1401 = vmatpush.bf16.msra.mxu0 %v4232_v36  ;;  %1414 = vmatpush.bf16.msra.mxu1 %v4237_v46 }
 0x139   :  { %v4515_v47 = vpop.f32.mrf.mxu2  ;;  %v4517_v5 = vpop.f32.mrf.mxu3 }
 0x13a   :  { %5598 = vst [vmem:[#allocation38_spill] sm:$0xff] %v4515_v47  ;;  %v3422_v47 = vld [vmem:[%s5528_s5 + $0x54] sm:$0xf0] }
 0x13b   :  { %5599 = vst [vmem:[#allocation39_spill] sm:$0xff] %v4517_v5  ;;  %v4520_v61 = vpop.f32.mrf.mxu0  ;;  %v4522_v35 = vpop.f32.mrf.mxu1  ;;  %1402 = vmatpush.bf16.msra.mxu0 %v4252_v55  ;;  %1415 = vmatpush.bf16.msra.mxu1 %v4257_v56  ;;  %v3181_v5 = vld [vmem:[%s5528_s5 + $0x48] sm:$0xf] }
 0x13c   :  { %v4547_v51 = vor.u32 %v3422_v47, %v3181_v5 }
 0x13e   :  { %1177 = vmatpush.bf16.msrb.mxu2 %v4547_v51 }
 0x13f   :  { %1403 = vmatpush.bf16.msra.mxu0 %v4276_v3  ;;  %1416 = vmatpush.bf16.msra.mxu1 %v4281_v10 }
 0x141   :  { %v4537_v18 = vpop.f32.mrf.mxu2  ;;  %v4539_v11 = vpop.f32.mrf.mxu3 }
 0x142   :  { %5600 = vst [vmem:[#allocation40_spill] sm:$0xff] %v4537_v18 }
 0x143   :  { %5601 = vst [vmem:[#allocation41_spill] sm:$0xff] %v4539_v11  ;;  %v4549_v40 = vpop.f32.mrf.mxu0  ;;  %v4551_v1 = vpop.f32.mrf.mxu1  ;;  %1404 = vmatpush.bf16.msra.mxu0 %v4294_v15  ;;  %1417 = vmatpush.bf16.msra.mxu1 %v4299_v17 }
 0x144   :  { %5602 = vst [vmem:[#allocation42_spill] sm:$0xff] %v4549_v40 }
 0x145   :  { %5603 = vst [vmem:[#allocation43_spill] sm:$0xff] %v4551_v1 }
 0x146   :  { %3129 = vmatmul.msk.bf16.gmra.mxu2 %vm390_vm3, %v4173_v7  ;;  %3135 = vmatmul.msk.bf16.gmra.mxu3 %vm390_vm3, %v4173_v7  ;;  %v3420_v7 = vld [vmem:[%s5528_s5 + $0x4c] sm:$0xf] }
 0x147   :  { %1405 = vmatpush.bf16.msra.mxu0 %v4324_v22  ;;  %1418 = vmatpush.bf16.msra.mxu1 %v4331_v37  ;;  %v4583_v39 = vor.u32 %v3420_v7, %v3183_v41  ;;  %v3416_v41 = vld [vmem:[%s5528_s5 + $0x2c] sm:$0xf] }
 0x149   :  { %v4562_v47 = vpop.f32.mrf.mxu2  ;;  %v4564_v5 = vpop.f32.mrf.mxu3  ;;  %1190 = vmatpush.bf16.msrb.mxu3 %v4583_v39 }
 0x14b   :  { %v672_v11 = vpop.f32.mrf.mxu0  ;;  %v711_v18 = vpop.f32.mrf.mxu1  ;;  %1406 = vmatpush.bf16.msra.mxu0 %v4348_v44  ;;  %1419 = vmatpush.bf16.msra.mxu1 %v4354_v43 }
 0x14c   :  { %v4568_v62 = vadd.f32 %v672_v11, %v4403_v8  ;;  %v4571_v59 = vadd.f32 %v711_v18, %v4405_v14  ;;  %v3418_v18 = vld [vmem:[%s5528_s5 + $0x34] sm:$0xf0] }
 0x14d   :  { %v4588_v11 = vor.u32 %v3418_v18, %v3165_v45  ;;  %v3167_v45 = vld [vmem:[%s5528_s5 + $0x38] sm:$0xf0] }
 0x14e   :  { %v4610_v7 = vor.u32 %v3416_v41, %v3167_v45 }
 0x14f   :  { %1178 = vmatpush.bf16.msrb.mxu2 %v4588_v11 }
 0x150   :  { %1191 = vmatpush.bf16.msrb.mxu3 %v4610_v7 }
 0x151   :  { %v4592_v8 = vpop.f32.mrf.mxu2  ;;  %v4594_v14 = vpop.f32.mrf.mxu3 }
 0x152   :  { %5604 = vst [vmem:[#allocation44_spill] sm:$0xff] %v4592_v8 }
 0x153   :  { %5605 = vst [vmem:[#allocation45_spill] sm:$0xff] %v4594_v14  ;;  %v4596_v63 = vpop.f32.mrf.mxu0  ;;  %v4598_v49 = vpop.f32.mrf.mxu1 }
 0x156   :  { %3130 = vmatmul.msk.bf16.gmra.mxu2 %vm390_vm3, %v4259_v58  ;;  %3136 = vmatmul.msk.bf16.gmra.mxu3 %vm390_vm3, %v4259_v58  ;;  %v3149_v58 = vld [vmem:[%s5528_s5 + $0x8] sm:$0xf] }
 0x157   :  { %v4623_v6 = vor.u32 %v3414_v38, %v3149_v58  ;;  %v3412_v38 = vld [vmem:[%s5528_s5 + $0xc] sm:$0xf] }
 0x159   :  { %v4612_v18 = vpop.f32.mrf.mxu2  ;;  %v4614_v20 = vpop.f32.mrf.mxu3  ;;  %1179 = vmatpush.bf16.msrb.mxu2 %v4623_v6 }
 0x15a   :  { %5606 = vst [vmem:[#allocation46_spill] sm:$0xff] %v4612_v18 }
 0x15b   :  { %5607 = vst [vmem:[#allocation47_spill] sm:$0xff] %v4614_v20  ;;  %v677_v4 = vpop.f32.mrf.mxu0  ;;  %v716_v23 = vpop.f32.mrf.mxu1 }
 0x15c   :  { %v4626_v41 = vadd.f32 %v677_v4, %v4472_v52  ;;  %v4629_v45 = vadd.f32 %v716_v23, %v4474_v26  ;;  %v3151_v4 = vld [vmem:[%s5528_s5 + $0x18] sm:$0xf0] }
 0x15d   :  { %1298 = vmatpush.bf16.msra.mxu2 %v4329_v33  ;;  %v4644_v23 = vor.u32 %v3412_v38, %v3151_v4 }
 0x15e   :  { %5608 = vst [vmem:[#allocation48_spill] sm:$0xff] %v4626_v41 }
 0x15f   :  { %5609 = vst [vmem:[#allocation49_spill] sm:$0xff] %v4629_v45  ;;  %1192 = vmatpush.bf16.msrb.mxu3 %v4644_v23 }
 0x161   :  { %v4633_v1 = vpop.f32.mrf.mxu2  ;;  %v4635_v40 = vpop.f32.mrf.mxu3  ;;  %1299 = vmatpush.bf16.msra.mxu2 %v4382_v60 }
 0x162   :  { %5610 = vst [vmem:[#allocation50_spill] sm:$0xff] %v4633_v1 }
 0x163   :  { %5611 = vst [vmem:[#allocation51_spill] sm:$0xff] %v4635_v40  ;;  %v4646_v52 = vpop.f32.mrf.mxu0  ;;  %v4648_v26 = vpop.f32.mrf.mxu1  ;;  %1311 = vmatpush.bf16.msra.mxu3 %v4371_v54 }
 0x164   :  { %5612 = vst [vmem:[#allocation52_spill] sm:$0xff] %v4646_v52 }
 0x165   :  { %5613 = vst [vmem:[#allocation53_spill] sm:$0xff] %v4648_v26  ;;  %1300 = vmatpush.bf16.msra.mxu2 %v4424_v27 }
 0x166   :  { %3131 = vmatmul.msk.bf16.gmra.mxu2 %vm390_vm3, %v4356_v50  ;;  %3137 = vmatmul.msk.bf16.gmra.mxu3 %vm390_vm3, %v4356_v50 }
 0x167   :  { %1312 = vmatpush.bf16.msra.mxu3 %v4419_v13 }
 0x169   :  { %v4657_v58 = vpop.f32.mrf.mxu2  ;;  %v4659_v38 = vpop.f32.mrf.mxu3  ;;  %1301 = vmatpush.bf16.msra.mxu2 %v4470_v16 }
 0x16a   :  { %5614 = vst [vmem:[#allocation54_spill] sm:$0xff] %v4657_v58 }
 0x16b   :  { %5615 = vst [vmem:[#allocation55_spill] sm:$0xff] %v4659_v38  ;;  %v682_v4 = vpop.f32.mrf.mxu0  ;;  %v721_v53 = vpop.f32.mrf.mxu1  ;;  %1313 = vmatpush.bf16.msra.mxu3 %v4455_v42 }
 0x16c   :  { %v4664_v34 = vadd.f32 %v682_v4, %v4520_v61  ;;  %v4667_v40 = vadd.f32 %v721_v53, %v4522_v35 }
 0x16d   :  { %1302 = vmatpush.bf16.msra.mxu2 %v4511_v9 }
 0x16e   :  { %5616 = vst [vmem:[#allocation56_spill] sm:$0xff] %v4664_v34 }
 0x16f   :  { %5617 = vst [vmem:[#allocation57_spill] sm:$0xff] %v4667_v40  ;;  %1314 = vmatpush.bf16.msra.mxu3 %v4498_v25 }
 0x171   :  { %v4671_v50 = vpop.f32.mrf.mxu2  ;;  %v4673_v58 = vpop.f32.mrf.mxu3  ;;  %1303 = vmatpush.bf16.msra.mxu2 %v4547_v51 }
 0x172   :  { %5618 = vst [vmem:[#allocation58_spill] sm:$0xff] %v4671_v50 }
 0x173   :  { %5619 = vst [vmem:[#allocation59_spill] sm:$0xff] %v4673_v58  ;;  %v4677_v38 = vpop.f32.mrf.mxu0  ;;  %v4679_v1 = vpop.f32.mrf.mxu1  ;;  %1315 = vmatpush.bf16.msra.mxu3 %v4532_v0 }
 0x174   :  { %5620 = vst [vmem:[#allocation60_spill] sm:$0xff] %v4677_v38 }
 0x175   :  { %5621 = vst [vmem:[#allocation61_spill] sm:$0xff] %v4679_v1  ;;  %1304 = vmatpush.bf16.msra.mxu2 %v4588_v11 }
 0x176   :  { %3132 = vmatmul.msk.bf16.gmra.mxu2 %vm390_vm3, %v4417_v21  ;;  %3138 = vmatmul.msk.bf16.gmra.mxu3 %vm390_vm3, %v4417_v21 }
 0x177   :  { %1316 = vmatpush.bf16.msra.mxu3 %v4583_v39 }
 0x179   :  { %v4687_v53 = vpop.f32.mrf.mxu2  ;;  %v4689_v61 = vpop.f32.mrf.mxu3  ;;  %1305 = vmatpush.bf16.msra.mxu2 %v4623_v6 }
 0x17a   :  { %5622 = vst [vmem:[#allocation62_spill] sm:$0xff] %v4687_v53 }
 0x17b   :  { %5623 = vst [vmem:[#allocation63_spill] sm:$0xff] %v4689_v61  ;;  %v4693_v35 = vpop.f32.mrf.mxu0  ;;  %v4695_v4 = vpop.f32.mrf.mxu1  ;;  %1317 = vmatpush.bf16.msra.mxu3 %v4610_v7  ;;  %v5630_v61 = vmov 0  }
 0x17c   :  { %5624 = vst [vmem:[#allocation64_spill] sm:$0xff] %v4693_v35 }
 0x17d   :  { %5625 = vst [vmem:[#allocation65_spill] sm:$0xff] %v4695_v4 }
 0x17f   :  { %1318 = vmatpush.bf16.msra.mxu3 %v4644_v23 }
 0x181   :  { %v4698_v58 = vpop.f32.mrf.mxu2  ;;  %v4700_v50 = vpop.f32.mrf.mxu3 }
 0x182   :  { %5626 = vst [vmem:[#allocation66_spill] sm:$0xff] %v4698_v58 }
 0x183   :  { %5627 = vst [vmem:[#allocation67_spill] sm:$0xff] %v4700_v50  ;;  %v4703_v21 = vpop.f32.mrf.mxu0  ;;  %v4705_v53 = vpop.f32.mrf.mxu1 }
 0x184   :  { %5628 = vst [vmem:[#allocation68_spill] sm:$0xff] %v4703_v21 }
 0x185   :  { %5629 = vst [vmem:[#allocation69_spill] sm:$0xff] %v4705_v53 }
 0x186   :  { %1180 = vmatmul.bf16.vlgmr.msrb.gmra.mxu2 %v5630_v61  ;;  %1193 = vmatmul.bf16.vlgmr.msrb.gmra.mxu3 %v5630_v61 }
 0x187   :  { %1425 = vmatpush.bf16.msrb.mxu2 %v4329_v33  ;;  %1438 = vmatpush.bf16.msrb.mxu3 %v4371_v54 }
 0x189   :  { %v4711_v4 = vpop.f32.mrf.mxu2  ;;  %v4713_v35 = vpop.f32.mrf.mxu3 }
 0x18a   :  { %5631 = vst [vmem:[#allocation70_spill] sm:$0xff] %v4711_v4 }
 0x18b   :  { %5632 = vst [vmem:[#allocation71_spill] sm:$0xff] %v4713_v35  ;;  %v4715_v58 = vpop.f32.mrf.mxu0  ;;  %v4717_v50 = vpop.f32.mrf.mxu1  ;;  %1426 = vmatpush.bf16.msrb.mxu2 %v4382_v60  ;;  %1439 = vmatpush.bf16.msrb.mxu3 %v4419_v13 }
 0x18c   :  { %5633 = vst [vmem:[#allocation72_spill] sm:$0xff] %v4715_v58 }
 0x18d   :  { %5634 = vst [vmem:[#allocation73_spill] sm:$0xff] %v4717_v50 }
 0x18f   :  { %1427 = vmatpush.bf16.msrb.mxu2 %v4424_v27  ;;  %1440 = vmatpush.bf16.msrb.mxu3 %v4455_v42 }
 0x191   :  { %v4723_v61 = vpop.f32.mrf.mxu2  ;;  %v4725_v53 = vpop.f32.mrf.mxu3 }
 0x192   :  { %5635 = vst [vmem:[#allocation74_spill] sm:$0xff] %v4723_v61 }
 0x193   :  { %5636 = vst [vmem:[#allocation75_spill] sm:$0xff] %v4725_v53  ;;  %v4727_v21 = vpop.f32.mrf.mxu0  ;;  %v4729_v4 = vpop.f32.mrf.mxu1  ;;  %1428 = vmatpush.bf16.msrb.mxu2 %v4470_v16  ;;  %1441 = vmatpush.bf16.msrb.mxu3 %v4498_v25 }
 0x194   :  { %5637 = vst [vmem:[#allocation76_spill] sm:$0xff] %v4727_v21 }
 0x195   :  { %5638 = vst [vmem:[#allocation77_spill] sm:$0xff] %v4729_v4 }
 0x197   :  { %1429 = vmatpush.bf16.msrb.mxu2 %v4511_v9  ;;  %1442 = vmatpush.bf16.msrb.mxu3 %v4532_v0 }
 0x199   :  { %v4735_v35 = vpop.f32.mrf.mxu2  ;;  %v4737_v50 = vpop.f32.mrf.mxu3 }
 0x19a   :  { %5639 = vst [vmem:[#allocation78_spill] sm:$0xff] %v4735_v35 }
 0x19b   :  { %5640 = vst [vmem:[#allocation79_spill] sm:$0xff] %v4737_v50  ;;  %v4739_v58 = vpop.f32.mrf.mxu0  ;;  %v4741_v61 = vpop.f32.mrf.mxu1  ;;  %1430 = vmatpush.bf16.msrb.mxu2 %v4547_v51  ;;  %1443 = vmatpush.bf16.msrb.mxu3 %v4583_v39  ;;  %v819_v50 = vld [vmem:[%s5527_s4] sm:$0xf] }
 0x19c   :  { %5641 = vst [vmem:[#allocation80_spill] sm:$0xff] %v4739_v58  ;;  %v4762_v58 = vperm.slane %v819_v50, 1  ;;  %v4816_v19 = vperm.slane %v819_v50, 3 }
 0x19d   :  { %5642 = vst [vmem:[#allocation81_spill] sm:$0xff] %v4741_v61  ;;  %v4760_v61 = vperm.slane %v819_v50, 0 }
 0x19e   :  { %5669 = vst [vmem:[#allocation108_spill] sm:$0xff] %v4816_v19 }
 0x19f   :  { %1431 = vmatpush.bf16.msrb.mxu2 %v4588_v11  ;;  %1444 = vmatpush.bf16.msrb.mxu3 %v4610_v7 }
 0x1a1   :  { %v4747_v53 = vpop.f32.mrf.mxu2  ;;  %v4749_v4 = vpop.f32.mrf.mxu3 }
 0x1a2   :  { %5643 = vst [vmem:[#allocation82_spill] sm:$0xff] %v4747_v53 }
 0x1a3   :  { %5644 = vst [vmem:[#allocation83_spill] sm:$0xff] %v4749_v4  ;;  %v4751_v21 = vpop.f32.mrf.mxu0  ;;  %v4753_v35 = vpop.f32.mrf.mxu1  ;;  %1432 = vmatpush.bf16.msrb.mxu2 %v4623_v6  ;;  %1445 = vmatpush.bf16.msrb.mxu3 %v4644_v23  ;;  %v829_v4 = vadd.f32 %v4760_v61, %v4568_v62 }
 0x1a4   :  { %5645 = vst [vmem:[#allocation84_spill] sm:$0xff] %v4751_v21 }
 0x1a5   :  { %5646 = vst [vmem:[#allocation85_spill] sm:$0xff] %v4753_v35  ;;  %v830_v35 = vadd.f32 %v4762_v58, %v4571_v59 }
 0x1a9   :  { %v750_v1 = vpop.f32.mrf.mxu2  ;;  %v789_v53 = vpop.f32.mrf.mxu3 }
 0x1ab   :  { %v1155_v21 = vpop.f32.mrf.mxu0  ;;  %v1168_v38 = vpop.f32.mrf.mxu1 }
 0x1ac   :  { %v1156_v40 = vadd.f32 %v1155_v21, %v829_v4  ;;  %v1169_v34 = vadd.f32 %v1168_v38, %v830_v35 }
 0x1b1   :  { %v4768_v26 = vpop.f32.mrf.mxu2  ;;  %v4770_v2 = vpop.f32.mrf.mxu3 }
 0x1b2   :  { %5647 = vst [vmem:[#allocation86_spill] sm:$0xff] %v4768_v26 }
 0x1b3   :  { %5648 = vst [vmem:[#allocation87_spill] sm:$0xff] %v4770_v2  ;;  %v1157_v52 = vpop.f32.mrf.mxu0  ;;  %v1170_v48 = vpop.f32.mrf.mxu1 }
 0x1b9   :  { %v4772_v12 = vpop.f32.mrf.mxu2  ;;  %v4774_v20 = vpop.f32.mrf.mxu3 }
 0x1ba   :  { %5649 = vst [vmem:[#allocation88_spill] sm:$0xff] %v4772_v12 }
 0x1bb   :  { %5650 = vst [vmem:[#allocation89_spill] sm:$0xff] %v4774_v20  ;;  %v3268_v20 = vmul.f32 -1.442695, %v1169_v34 }
 0x1bd   :  { %3517 = vpow2.f32 %v3268_v20 }
 0x1c1   :  { %v4776_v18 = vpop.f32.mrf.mxu2  ;;  %v4778_v62 = vpop.f32.mrf.mxu3 }
 0x1c2   :  { %5651 = vst [vmem:[#allocation90_spill] sm:$0xff] %v4776_v18  ;;  %v3267_v18 = vmul.f32 -1.442695, %v1156_v40 }
 0x1c3   :  { %5652 = vst [vmem:[#allocation91_spill] sm:$0xff] %v4778_v62 }
 0x1c4   :  { %3519 = vpow2.f32 %v3267_v18 }
 0x1c9   :  { %v4780_v45 = vpop.f32.mrf.mxu2  ;;  %v4782_v59 = vpop.f32.mrf.mxu3 }
 0x1ca   :  { %5653 = vst [vmem:[#allocation92_spill] sm:$0xff] %v4780_v45 }
 0x1cb   :  { %5654 = vst [vmem:[#allocation93_spill] sm:$0xff] %v4782_v59  ;;  %v3518_v59 = vpop.eup %3517 }
 0x1cc   :  { %v1208_v12 = vadd.f32 1.0, %v3518_v59 }
 0x1ce   :  { %3521 = vrcp.f32 %v1208_v12  ;;  %vm1230_vm11 = vweird.f32 %v1208_v12 }
 0x1d1   :  { %v4784_v4 = vpop.f32.mrf.mxu2  ;;  %v4786_v38 = vpop.f32.mrf.mxu3 }
 0x1d2   :  { %5655 = vst [vmem:[#allocation94_spill] sm:$0xff] %v4784_v4  ;;  %v3520_v4 = vpop.eup %3519 }
 0x1d3   :  { %5656 = vst [vmem:[#allocation95_spill] sm:$0xff] %v4786_v38 }
 0x1d4   :  { %v3522_v20 = vpop.eup %3521 }
 0x1d5   :  { %v1226_v18 = vmul.f32 %v3522_v20, %v1208_v12  ;;  %vm1231_vm3 = vweird.f32 %v3522_v20 }
 0x1d6   :  { %vm1232_vm13 = vmor %vm1230_vm11, %vm1231_vm3 }
 0x1d9   :  { %v4788_v35 = vpop.f32.mrf.mxu2  ;;  %v4790_v52 = vpop.f32.mrf.mxu3 }
 0x1da   :  { %5657 = vst [vmem:[#allocation96_spill] sm:$0xff] %v4788_v35 }
 0x1db   :  { %5658 = vst [vmem:[#allocation97_spill] sm:$0xff] %v4790_v52  ;;  %v1207_v52 = vadd.f32 1.0, %v3520_v4  ;;  %v790_v4 = vadd.f32 %v789_v53, %v4564_v5 }
 0x1dd   :  { %3523 = vrcp.f32 %v1207_v52  ;;  %v832_v14 = vadd.f32 %v4816_v19, %v790_v4  ;;  %vm1215_vm14 = vweird.f32 %v1207_v52  ;;  %v1219_v53 = vand.u32 2147483647, %v1207_v52 }
 0x1df   :  { %vm1220_vm1 = vcmp.eq.f32.partialorder %v1219_v53, 8.507059e+37 }
 0x1e1   :  { %v4792_v48 = vpop.f32.mrf.mxu2  ;;  %v4794_v21 = vpop.f32.mrf.mxu3 }
 0x1e2   :  { %5659 = vst [vmem:[#allocation98_spill] sm:$0xff] %v4792_v48 }
 0x1e3   :  { %5660 = vst [vmem:[#allocation99_spill] sm:$0xff] %v4794_v21  ;;  %v3524_v40 = vpop.eup %3523  ;;  %v1227_v21 = vsub.f32 1.0, %v1226_v18 }
 0x1e4   :  { %vm1216_vm12 = vweird.f32 %v3524_v40 }
 0x1e5   :  { %vm1217_vm15 = vmor %vm1215_vm14, %vm1216_vm12 }
 0x1e9   :  { %v4796_v62 = vpop.f32.mrf.mxu2  ;;  %v4798_v45 = vpop.f32.mrf.mxu3 }
 0x1ea   :  { %5661 = vst [vmem:[#allocation100_spill] sm:$0xff] %v4796_v62  ;;  %v1211_v62 = vmul.f32 %v3524_v40, %v1207_v52 }
 0x1eb   :  { %5662 = vst [vmem:[#allocation101_spill] sm:$0xff] %v4798_v45 }
 0x1ec   :  { %v1212_v59 = vsub.f32 1.0, %v1211_v62 }
 0x1f1   :  { %v4800_v38 = vpop.f32.mrf.mxu2  ;;  %v4802_v35 = vpop.f32.mrf.mxu3 }
 0x1f2   :  { %5663 = vst [vmem:[#allocation102_spill] sm:$0xff] %v4800_v38  ;;  %v751_v38 = vadd.f32 %v750_v1, %v4562_v47  ;;  %v1234_v47 = vand.u32 2147483647, %v1208_v12 }
 0x1f3   :  { %5664 = vst [vmem:[#allocation103_spill] sm:$0xff] %v4802_v35  ;;  %v4814_v35 = vperm.slane %v819_v50, 2  ;;  %v1221_v50 = vand.u32 2147483648, %v1207_v52 }
 0x1f4   :  { %vm1235_vm0 = vcmp.eq.f32.partialorder %v1234_v47, 8.507059e+37 }
 0x1f5   :  { %v831_v2 = vadd.f32 %v4814_v35, %v751_v38 }
 0x1f9   :  { %v4804_v48 = vpop.f32.mrf.mxu2  ;;  %v4806_v34 = vpop.f32.mrf.mxu3 }
 0x1fa   :  { %5665 = vst [vmem:[#allocation104_spill] sm:$0xff] %v4804_v48  ;;  %v1228_v48 = vmul.f32 %v3522_v20, %v1227_v21 }
 0x1fb   :  { %5666 = vst [vmem:[#allocation105_spill] sm:$0xff] %v4806_v34  ;;  %v1213_v34 = vmul.f32 %v3524_v40, %v1212_v59 }
 0x1fd   :  { %v1214_v1 = vadd.f32 %v3524_v40, %v1213_v34 }
 0x1ff   :  { %v1218_v59 = vsel %vm1217_vm15, %v3524_v40, %v1214_v1 }
 0x201   :  { %v4808_v45 = vpop.f32.mrf.mxu2  ;;  %v4810_v41 = vpop.f32.mrf.mxu3 }
 0x202   :  { %5667 = vst [vmem:[#allocation106_spill] sm:$0xff] %v4808_v45  ;;  %v1229_v45 = vadd.f32 %v3522_v20, %v1228_v48  ;;  %v1222_v48 = vor.u32 1.1754944e-38, %v1221_v50 }
 0x203   :  { %5668 = vst [vmem:[#allocation107_spill] sm:$0xff] %v4810_v41  ;;  %v1236_v41 = vand.u32 2147483648, %v1208_v12 }
 0x204   :  { %v1233_v38 = vsel %vm1232_vm13, %v3522_v20, %v1229_v45  ;;  %v1223_v34 = vsel %vm1220_vm1, %v1222_v48, %v1218_v59  ;;  %v714_v48 = vadd.f32 %v4598_v49, %v4441_v31 }
 0x205   :  { %v1237_v21 = vor.u32 1.1754944e-38, %v1236_v41 }
 0x207   :  { %v1238_v4 = vsel %vm1235_vm0, %v1237_v21, %v1233_v38 }
 0x208   :  { %v1256_v12 = vmul.f32 0.0, %v1238_v4 }
 0x209   :  { %v1181_v18 = vpop.f32.mrf.mxu2  ;;  %v1194_v26 = vpop.f32.mrf.mxu3 }
 0x20a   :  { %v1182_v62 = vadd.f32 %v1181_v18, %v831_v2  ;;  %v1195_v8 = vadd.f32 %v1194_v26, %v832_v14 }
 0x20c   :  { %v3269_v5 = vmul.f32 -1.442695, %v1182_v62  ;;  %3525 = vtanh.f32 %v1195_v8 }
 0x20e   :  { %3527 = vpow2.f32 %v3269_v5 }
 0x211   :  { %v1183_v2 = vpop.f32.mrf.mxu2  ;;  %v1196_v14 = vpop.f32.mrf.mxu3 }
 0x212   :  { %v3526_v26 = vpop.eup %3525  ;;  %v834_v2 = vadd.f32 %v4762_v58, %v714_v48 }
 0x213   :  { %v1257_v18 = vmul.f32 %v3526_v26, %v1223_v34 }
 0x214   :  { %v3528_v62 = vpop.eup %3527 }
 0x215   :  { %v1209_v19 = vadd.f32 1.0, %v3528_v62  ;;  %v4820_v8 = vadd.f32 %v1257_v18, %v1256_v12  ;;  %v5671_v18 = vld [vmem:[#allocation44_spill] sm:$0xff]  ;;  %v5672_v62 = vld [vmem:[#allocation86_spill] sm:$0xff] }
 0x217   :  { %3529 = vrcp.f32 %v1209_v19  ;;  %v1251_v20 = vand.u32 2147483648, %v1209_v19  ;;  %v1249_v1 = vand.u32 2147483647, %v1209_v19  ;;  %vm1245_vm4 = vweird.f32 %v1209_v19 }
 0x218   :  { %3531 = vtanh.f32 %v4820_v8 }
 0x219   :  { %v1252_v5 = vor.u32 1.1754944e-38, %v1251_v20  ;;  %vm1250_vm6 = vcmp.eq.f32.partialorder %v1249_v1, 8.507059e+37 }
 0x21d   :  { %v3530_v45 = vpop.eup %3529 }
 0x21e   :  { %v1241_v41 = vmul.f32 %v3530_v45, %v1209_v19  ;;  %vm1246_vm2 = vweird.f32 %v3530_v45  ;;  %v3532_v53 = vpop.eup %3531  ;;  %v675_v19 = vadd.f32 %v4596_v63, %v4439_v29 }
 0x21f   :  { %vm1247_vm5 = vmor %vm1245_vm4, %vm1246_vm2 }
 0x220   :  { %v1242_v52 = vsub.f32 1.0, %v1241_v41  ;;  %v833_v4 = vadd.f32 %v4760_v61, %v675_v19 }
 0x222   :  { %v1243_v40 = vmul.f32 %v3530_v45, %v1242_v52 }
 0x224   :  { %v1244_v47 = vadd.f32 %v3530_v45, %v1243_v40 }
 0x226   :  { %v1248_v50 = vsel %vm1247_vm5, %v3530_v45, %v1244_v47  ;;  %v753_v45 = vadd.f32 %v5672_v62, %v5671_v18 }
 0x227   :  { %v1253_v38 = vsel %vm1250_vm6, %v1252_v5, %v1248_v50 }
 0x228   :  { %v4824_v21 = vmul.f32 %v3532_v53, %v1253_v38  ;;  %v835_v63 = vadd.f32 %v4814_v35, %v753_v45  ;;  %v5673_v38 = vld [vmem:[#allocation45_spill] sm:$0xff] }
 0x22a   :  { %5670 = vst [vmem:[#allocation109_spill] sm:$0xff] %v4824_v21  ;;  %v3271_v59 = vpack.c.bf16 %v4824_v21, %v4824_v21 }
 0x22c   :  { %3272 = vmatmul.msk.bf16.vlgmr.msrb.gmra.mxu0 %vm3270_vm8, %v3271_v59  ;;  %3275 = vmatmul.msk.bf16.vlgmr.msrb.gmra.mxu1 %vm3270_vm8, %v3271_v59 }
 0x22d   :  { %3278 = vmatmul.msk.bf16.vlgmr.msra.gmra.mxu2 %vm3270_vm8, %v3271_v59  ;;  %3281 = vmatmul.msk.bf16.vlgmr.msra.gmra.mxu3 %vm3270_vm8, %v3271_v59  ;;  %v5674_v59 = vld [vmem:[#allocation87_spill] sm:$0xff] }
 0x22e   :  { %1526 = vmatpush.bf16.msrb.mxu0 %v4188_v24  ;;  %1539 = vmatpush.bf16.msrb.mxu1 %v4193_v28  ;;  %v792_v19 = vadd.f32 %v5674_v59, %v5673_v38 }
 0x22f   :  { %1552 = vmatpush.bf16.msra.mxu2 %v4329_v33  ;;  %1565 = vmatpush.bf16.msra.mxu3 %v4371_v54 }
 0x232   :  { %1527 = vmatpush.bf16.msrb.mxu0 %v4205_v30  ;;  %1540 = vmatpush.bf16.msrb.mxu1 %v4211_v32 }
 0x233   :  { %1553 = vmatpush.bf16.msra.mxu2 %v4382_v60  ;;  %1566 = vmatpush.bf16.msra.mxu3 %v4419_v13 }
 0x236   :  { %1528 = vmatpush.bf16.msrb.mxu0 %v4232_v36  ;;  %1541 = vmatpush.bf16.msrb.mxu1 %v4237_v46 }
 0x237   :  { %1554 = vmatpush.bf16.msra.mxu2 %v4424_v27  ;;  %1567 = vmatpush.bf16.msra.mxu3 %v4455_v42 }
 0x23a   :  { %1529 = vmatpush.bf16.msrb.mxu0 %v4252_v55  ;;  %1542 = vmatpush.bf16.msrb.mxu1 %v4257_v56 }
 0x23b   :  { %1555 = vmatpush.bf16.msra.mxu2 %v4470_v16  ;;  %1568 = vmatpush.bf16.msra.mxu3 %v4498_v25 }
 0x23e   :  { %1530 = vmatpush.bf16.msrb.mxu0 %v4276_v3  ;;  %1543 = vmatpush.bf16.msrb.mxu1 %v4281_v10 }
 0x23f   :  { %1556 = vmatpush.bf16.msra.mxu2 %v4511_v9  ;;  %1569 = vmatpush.bf16.msra.mxu3 %v4532_v0 }
 0x242   :  { %1531 = vmatpush.bf16.msrb.mxu0 %v4294_v15  ;;  %1544 = vmatpush.bf16.msrb.mxu1 %v4299_v17 }
 0x243   :  { %1557 = vmatpush.bf16.msra.mxu2 %v4547_v51  ;;  %1570 = vmatpush.bf16.msra.mxu3 %v4583_v39 }
 0x246   :  { %1532 = vmatpush.bf16.msrb.mxu0 %v4324_v22  ;;  %1545 = vmatpush.bf16.msrb.mxu1 %v4331_v37 }
 0x247   :  { %1558 = vmatpush.bf16.msra.mxu2 %v4588_v11  ;;  %1571 = vmatpush.bf16.msra.mxu3 %v4610_v7 }
 0x24a   :  { %1533 = vmatpush.bf16.msrb.mxu0 %v4348_v44  ;;  %1546 = vmatpush.bf16.msrb.mxu1 %v4354_v43 }
 0x24b   :  { %1559 = vmatpush.bf16.msra.mxu2 %v4623_v6  ;;  %1572 = vmatpush.bf16.msra.mxu3 %v4644_v23 }
 0x2a9   :  { %v1281_v14 = vpop.f32.mrf.mxu0  ;;  %v1294_v26 = vpop.f32.mrf.mxu1 }
 0x2aa   :  { %v1282_v34 = vadd.f32 %v1281_v14, %v833_v4  ;;  %v1295_v12 = vadd.f32 %v1294_v26, %v834_v2  ;;  %v5675_v14 = vld [vmem:[#allocation108_spill] sm:$0xff] }
 0x2ab   :  { %v836_v26 = vadd.f32 %v5675_v14, %v792_v19 }
 0x2ac   :  { %v3282_v41 = vmul.f32 -1.442695, %v1282_v34  ;;  %v3283_v52 = vmul.f32 -1.442695, %v1295_v12 }
 0x2ae   :  { %3533 = vpow2.f32 %v3282_v41 }
 0x2af   :  { %3535 = vpow2.f32 %v3283_v52 }
 0x2b0   :  { %v1307_v29 = vpop.f32.mrf.mxu2  ;;  %v1320_v20 = vpop.f32.mrf.mxu3 }
 0x2b1   :  { %v1308_v49 = vadd.f32 %v1307_v29, %v835_v63  ;;  %v1283_v31 = vpop.f32.mrf.mxu0  ;;  %v1296_v40 = vpop.f32.mrf.mxu1  ;;  %v1321_v18 = vadd.f32 %v1320_v20, %v836_v26 }
 0x2b3   :  { %v3284_v1 = vmul.f32 -1.442695, %v1308_v49 }
 0x2b4   :  { %v3534_v47 = vpop.eup %3533 }
 0x2b5   :  { %v3536_v5 = vpop.eup %3535  ;;  %v1333_v50 = vadd.f32 1.0, %v3534_v47  ;;  %3537 = vpow2.f32 %v3284_v1 }
 0x2b6   :  { %v1334_v53 = vadd.f32 1.0, %v3536_v5 }
 0x2b7   :  { %3539 = vrcp.f32 %v1333_v50  ;;  %v1347_v29 = vand.u32 2147483648, %v1333_v50  ;;  %v1345_v40 = vand.u32 2147483647, %v1333_v50  ;;  %vm1341_vm3 = vweird.f32 %v1333_v50 }
 0x2b8   :  { %3541 = vrcp.f32 %v1334_v53  ;;  %v1309_v48 = vpop.f32.mrf.mxu2  ;;  %v1322_v4 = vpop.f32.mrf.mxu3  ;;  %v1362_v49 = vand.u32 2147483648, %v1334_v53  ;;  %v1360_v47 = vand.u32 2147483647, %v1334_v53  ;;  %vm1356_vm11 = vweird.f32 %v1334_v53 }
 0x2b9   :  { %v1348_v59 = vor.u32 1.1754944e-38, %v1347_v29  ;;  %vm1346_vm14 = vcmp.eq.f32.partialorder %v1345_v40, 8.507059e+37  ;;  %v5676_v29 = vld [vmem:[#allocation20_spill] sm:$0xff] }
 0x2ba   :  { %v1363_v48 = vor.u32 1.1754944e-38, %v1362_v49  ;;  %vm1361_vm15 = vcmp.eq.f32.partialorder %v1360_v47, 8.507059e+37  ;;  %vm5575_vm0 = vcmp.ne.s32.totalorder %v5676_v29, 0 }
 0x2bb   :  { %v3538_v2 = vpop.eup %3537 }
 0x2bc   :  { %v1335_v34 = vadd.f32 1.0, %v3538_v2 }
 0x2bd   :  { %v3540_v12 = vpop.eup %3539 }
 0x2be   :  { %v3542_v62 = vpop.eup %3541  ;;  %v1337_v45 = vmul.f32 %v3540_v12, %v1333_v50  ;;  %3543 = vrcp.f32 %v1335_v34  ;;  %vm1342_vm9 = vweird.f32 %v3540_v12  ;;  %vm1371_vm2 = vweird.f32 %v1335_v34 }
 0x2bf   :  { %v1352_v41 = vmul.f32 %v3542_v62, %v1334_v53  ;;  %3545 = vtanh.f32 %v1321_v18  ;;  %vm1357_vm10 = vweird.f32 %v3542_v62  ;;  %vm1343_vm12 = vmor %vm1341_vm3, %vm1342_vm9 }
 0x2c0   :  { %v1338_v52 = vsub.f32 1.0, %v1337_v45  ;;  %vm1358_vm13 = vmor %vm1356_vm11, %vm1357_vm10 }
 0x2c1   :  { %v1353_v63 = vsub.f32 1.0, %v1352_v41  ;;  %v1263_v41 = vsel %vm5574_vm7, %v4820_v8, 0.0 }
 0x2c2   :  { %v1339_v31 = vmul.f32 %v3540_v12, %v1338_v52 }
 0x2c3   :  { %v1354_v1 = vmul.f32 %v3542_v62, %v1353_v63 }
 0x2c4   :  { %v3544_v5 = vpop.eup %3543  ;;  %v1340_v38 = vadd.f32 %v3540_v12, %v1339_v31 }
 0x2c5   :  { %v1367_v20 = vmul.f32 %v3544_v5, %v1335_v34  ;;  %v1355_v19 = vadd.f32 %v3542_v62, %v1354_v1  ;;  %v3546_v2 = vpop.eup %3545  ;;  %vm1372_vm1 = vweird.f32 %v3544_v5 }
 0x2c6   :  { %v1344_v4 = vsel %vm1343_vm12, %v3540_v12, %v1340_v38  ;;  %v1377_v12 = vand.u32 2147483648, %v1335_v34  ;;  %vm1373_vm4 = vmor %vm1371_vm2, %vm1372_vm1 }
 0x2c7   :  { %v1368_v26 = vsub.f32 1.0, %v1367_v20  ;;  %v1349_v18 = vsel %vm1346_vm14, %v1348_v59, %v1344_v4  ;;  %v1359_v45 = vsel %vm1358_vm13, %v3542_v62, %v1355_v19  ;;  %v1375_v62 = vand.u32 2147483647, %v1335_v34  ;;  %v5679_v4 = vld [vmem:[#allocation49_spill] sm:$0xff] }
 0x2c8   :  { %v1364_v52 = vsel %vm1361_vm15, %v1363_v48, %v1359_v45  ;;  %v1383_v50 = vmul.f32 %v3546_v2, %v1349_v18  ;;  %v1378_v8 = vor.u32 1.1754944e-38, %v1377_v12  ;;  %v1264_v59 = vsel %vm5574_vm7, %v4824_v21, 0.0 }
 0x2c9   :  { %v1369_v53 = vmul.f32 %v3544_v5, %v1368_v26  ;;  %v1382_v63 = vmul.f32 %v1364_v52, %v1263_v41  ;;  %vm1376_vm5 = vcmp.eq.f32.partialorder %v1375_v62, 8.507059e+37  ;;  %v838_v2 = vadd.f32 %v4762_v58, %v5679_v4  ;;  %v5680_v52 = vld [vmem:[#allocation46_spill] sm:$0xff]  ;;  %v5682_v4 = vld [vmem:[#allocation47_spill] sm:$0xff] }
 0x2cb   :  { %v1384_v31 = vadd.f32 %v1383_v50, %v1382_v63  ;;  %v1370_v1 = vadd.f32 %v3544_v5, %v1369_v53  ;;  %v5681_v50 = vld [vmem:[#allocation88_spill] sm:$0xff] }
 0x2cc   :  { %v756_v53 = vadd.f32 %v5681_v50, %v5680_v52 }
 0x2cd   :  { %3547 = vtanh.f32 %v1384_v31  ;;  %v4881_v49 = vsel %vm5575_vm0, %v1384_v31, %v1263_v41  ;;  %v1374_v40 = vsel %vm1373_vm4, %v3544_v5, %v1370_v1  ;;  %v5678_v5 = vld [vmem:[#allocation48_spill] sm:$0xff] }
 0x2ce   :  { %v1379_v38 = vsel %vm1376_vm5, %v1378_v8, %v1374_v40  ;;  %v837_v48 = vadd.f32 %v4760_v61, %v5678_v5  ;;  %v839_v1 = vadd.f32 %v4814_v35, %v756_v53 }
 0x2d3   :  { %v3548_v47 = vpop.eup %3547 }
 0x2d4   :  { %v4883_v20 = vmul.f32 %v3548_v47, %v1379_v38 }
 0x2d6   :  { %5677 = vst [vmem:[#allocation44_spill] sm:$0xff] %v4883_v20  ;;  %v4891_v19 = vsel %vm5575_vm0, %v4883_v20, %v1264_v59 }
 0x2d7   :  { %v1394_v34 = vpack.c.bf16 %v4891_v19, %v4891_v19 }
 0x2d9   :  { %1407 = vmatmul.bf16.vlgmr.msra.gmra.mxu0 %v1394_v34  ;;  %1420 = vmatmul.bf16.vlgmr.msra.gmra.mxu1 %v1394_v34 }
 0x2da   :  { %1433 = vmatmul.bf16.vlgmr.msrb.gmra.mxu2 %v1394_v34  ;;  %1446 = vmatmul.bf16.vlgmr.msrb.gmra.mxu3 %v1394_v34 }
 0x2db   :  { %1653 = vmatpush.bf16.msra.mxu0 %v4188_v24  ;;  %1666 = vmatpush.bf16.msra.mxu1 %v4193_v28 }
 0x2dc   :  { %1679 = vmatpush.bf16.msrb.mxu2 %v4329_v33  ;;  %1692 = vmatpush.bf16.msrb.mxu3 %v4371_v54 }
 0x2df   :  { %1654 = vmatpush.bf16.msra.mxu0 %v4205_v30  ;;  %1667 = vmatpush.bf16.msra.mxu1 %v4211_v32 }
 0x2e0   :  { %1680 = vmatpush.bf16.msrb.mxu2 %v4382_v60  ;;  %1693 = vmatpush.bf16.msrb.mxu3 %v4419_v13 }
 0x2e3   :  { %1655 = vmatpush.bf16.msra.mxu0 %v4232_v36  ;;  %1668 = vmatpush.bf16.msra.mxu1 %v4237_v46 }
 0x2e4   :  { %1681 = vmatpush.bf16.msrb.mxu2 %v4424_v27  ;;  %1694 = vmatpush.bf16.msrb.mxu3 %v4455_v42 }
 0x2e7   :  { %1656 = vmatpush.bf16.msra.mxu0 %v4252_v55  ;;  %1669 = vmatpush.bf16.msra.mxu1 %v4257_v56 }
 0x2e8   :  { %1682 = vmatpush.bf16.msrb.mxu2 %v4470_v16  ;;  %1695 = vmatpush.bf16.msrb.mxu3 %v4498_v25 }
 0x2eb   :  { %1657 = vmatpush.bf16.msra.mxu0 %v4276_v3  ;;  %1670 = vmatpush.bf16.msra.mxu1 %v4281_v10 }
 0x2ec   :  { %1683 = vmatpush.bf16.msrb.mxu2 %v4511_v9  ;;  %1696 = vmatpush.bf16.msrb.mxu3 %v4532_v0 }
 0x2ef   :  { %1658 = vmatpush.bf16.msra.mxu0 %v4294_v15  ;;  %1671 = vmatpush.bf16.msra.mxu1 %v4299_v17 }
 0x2f0   :  { %1684 = vmatpush.bf16.msrb.mxu2 %v4547_v51  ;;  %1697 = vmatpush.bf16.msrb.mxu3 %v4583_v39 }
 0x2f3   :  { %1659 = vmatpush.bf16.msra.mxu0 %v4324_v22  ;;  %1672 = vmatpush.bf16.msra.mxu1 %v4331_v37 }
 0x2f4   :  { %1685 = vmatpush.bf16.msrb.mxu2 %v4588_v11  ;;  %1698 = vmatpush.bf16.msrb.mxu3 %v4610_v7 }
 0x2f7   :  { %1660 = vmatpush.bf16.msra.mxu0 %v4348_v44  ;;  %1673 = vmatpush.bf16.msra.mxu1 %v4354_v43 }
 0x2f8   :  { %1686 = vmatpush.bf16.msrb.mxu2 %v4623_v6  ;;  %1699 = vmatpush.bf16.msrb.mxu3 %v4644_v23 }
 0x356   :  { %v1408_v26 = vpop.f32.mrf.mxu0  ;;  %v1421_v18 = vpop.f32.mrf.mxu1 }
 0x357   :  { %v1409_v45 = vadd.f32 %v1408_v26, %v837_v48  ;;  %v1422_v41 = vadd.f32 %v1421_v18, %v838_v2  ;;  %v5683_v2 = vld [vmem:[#allocation89_spill] sm:$0xff] }
 0x358   :  { %v795_v26 = vadd.f32 %v5683_v2, %v5682_v4 }
 0x359   :  { %v3285_v63 = vmul.f32 -1.442695, %v1409_v45  ;;  %v3286_v31 = vmul.f32 -1.442695, %v1422_v41 }
 0x35a   :  { %v840_v52 = vadd.f32 %v5675_v14, %v795_v26 }
 0x35b   :  { %3549 = vpow2.f32 %v3285_v63 }
 0x35c   :  { %3551 = vpow2.f32 %v3286_v31 }
 0x35d   :  { %v1434_v12 = vpop.f32.mrf.mxu2  ;;  %v1447_v62 = vpop.f32.mrf.mxu3 }
 0x35e   :  { %v1435_v40 = vadd.f32 %v1434_v12, %v839_v1  ;;  %v1410_v8 = vpop.f32.mrf.mxu0  ;;  %v1423_v47 = vpop.f32.mrf.mxu1  ;;  %v1448_v63 = vadd.f32 %v1447_v62, %v840_v52 }
 0x360   :  { %v3287_v38 = vmul.f32 -1.442695, %v1435_v40 }
 0x361   :  { %v3550_v59 = vpop.eup %3549 }
 0x362   :  { %v3552_v34 = vpop.eup %3551  ;;  %v1460_v5 = vadd.f32 1.0, %v3550_v59  ;;  %3553 = vpow2.f32 %v3287_v38 }
 0x363   :  { %v1461_v48 = vadd.f32 1.0, %v3552_v34 }
 0x364   :  { %3555 = vrcp.f32 %v1460_v5  ;;  %v1474_v47 = vand.u32 2147483648, %v1460_v5  ;;  %v1472_v34 = vand.u32 2147483647, %v1460_v5  ;;  %vm1468_vm9 = vweird.f32 %v1460_v5 }
 0x365   :  { %3557 = vrcp.f32 %v1461_v48  ;;  %v1436_v18 = vpop.f32.mrf.mxu2  ;;  %v1449_v45 = vpop.f32.mrf.mxu3  ;;  %v1489_v38 = vand.u32 2147483648, %v1461_v48  ;;  %v1487_v2 = vand.u32 2147483647, %v1461_v48  ;;  %vm1483_vm10 = vweird.f32 %v1461_v48 }
 0x366   :  { %v1475_v45 = vor.u32 1.1754944e-38, %v1474_v47  ;;  %vm1473_vm12 = vcmp.eq.f32.partialorder %v1472_v34, 8.507059e+37 }
 0x367   :  { %v1490_v52 = vor.u32 1.1754944e-38, %v1489_v38  ;;  %vm1488_vm13 = vcmp.eq.f32.partialorder %v1487_v2, 8.507059e+37  ;;  %v5688_v2 = vld [vmem:[#allocation37_spill] sm:$0xff] }
 0x368   :  { %v3554_v41 = vpop.eup %3553 }
 0x369   :  { %v1462_v50 = vadd.f32 1.0, %v3554_v41 }
 0x36a   :  { %v3556_v53 = vpop.eup %3555 }
 0x36b   :  { %v3558_v31 = vpop.eup %3557  ;;  %v1464_v1 = vmul.f32 %v3556_v53, %v1460_v5  ;;  %3559 = vrcp.f32 %v1462_v50  ;;  %vm1469_vm6 = vweird.f32 %v3556_v53  ;;  %v1504_v47 = vand.u32 2147483648, %v1462_v50 }
 0x36c   :  { %v1479_v12 = vmul.f32 %v3558_v31, %v1461_v48  ;;  %3561 = vtanh.f32 %v1448_v63  ;;  %vm1484_vm8 = vweird.f32 %v3558_v31  ;;  %vm1470_vm3 = vmor %vm1468_vm9, %vm1469_vm6  ;;  %v5684_v48 = vld [vmem:[#allocation16_spill] sm:$0xff]  ;;  %vm1498_vm1 = vweird.f32 %v1462_v50 }
 0x36d   :  { %v1465_v40 = vsub.f32 1.0, %v1464_v1  ;;  %vm1485_vm11 = vmor %vm1483_vm10, %vm1484_vm8  ;;  %vm1515_vm14 = vcmp.ne.s32.totalorder %v5684_v48, 0  ;;  %v1505_v38 = vor.u32 1.1754944e-38, %v1504_v47 }
 0x36e   :  { %v1480_v8 = vsub.f32 1.0, %v1479_v12 }
 0x36f   :  { %v1466_v59 = vmul.f32 %v3556_v53, %v1465_v40 }
 0x370   :  { %v1481_v4 = vmul.f32 %v3558_v31, %v1480_v8 }
 0x371   :  { %v3560_v18 = vpop.eup %3559  ;;  %v1467_v26 = vadd.f32 %v3556_v53, %v1466_v59 }
 0x372   :  { %v1494_v62 = vmul.f32 %v3560_v18, %v1462_v50  ;;  %v1482_v41 = vadd.f32 %v3558_v31, %v1481_v4  ;;  %v3562_v63 = vpop.eup %3561  ;;  %vm1499_vm15 = vweird.f32 %v3560_v18 }
 0x373   :  { %v1471_v1 = vsel %vm1470_vm3, %v3556_v53, %v1467_v26  ;;  %vm1500_vm2 = vmor %vm1498_vm1, %vm1499_vm15 }
 0x374   :  { %v1495_v12 = vsub.f32 1.0, %v1494_v62  ;;  %v1476_v40 = vsel %vm1473_vm12, %v1475_v45, %v1471_v1  ;;  %v1486_v29 = vsel %vm1485_vm11, %v3558_v31, %v1482_v41  ;;  %v1502_v31 = vand.u32 2147483647, %v1462_v50 }
 0x375   :  { %v1491_v8 = vsel %vm1488_vm13, %v1490_v52, %v1486_v29  ;;  %v1510_v57 = vmul.f32 %v3562_v63, %v1476_v40  ;;  %v5691_v40 = vld [vmem:[#allocation90_spill] sm:$0xff] }
 0x376   :  { %v1496_v20 = vmul.f32 %v3560_v18, %v1495_v12  ;;  %v1509_v59 = vmul.f32 %v1491_v8, %v4881_v49  ;;  %vm1503_vm4 = vcmp.eq.f32.partialorder %v1502_v31, 8.507059e+37  ;;  %v5690_v12 = vld [vmem:[#allocation50_spill] sm:$0xff] }
 0x377   :  { %v758_v8 = vadd.f32 %v5691_v40, %v5690_v12 }
 0x378   :  { %v1511_v5 = vadd.f32 %v1510_v57, %v1509_v59  ;;  %v1497_v21 = vadd.f32 %v3560_v18, %v1496_v20 }
 0x379   :  { %v843_v47 = vadd.f32 %v4814_v35, %v758_v8 }
 0x37a   :  { %3563 = vtanh.f32 %v1511_v5  ;;  %v4942_v53 = vsel %vm1515_vm14, %v1511_v5, %v4881_v49  ;;  %v1501_v29 = vsel %vm1500_vm2, %v3560_v18, %v1497_v21  ;;  %v5686_v21 = vld [vmem:[#allocation36_spill] sm:$0xff]  ;;  %v5689_v18 = vld [vmem:[#allocation53_spill] sm:$0xff] }
 0x37b   :  { %v1506_v4 = vsel %vm1503_vm4, %v1505_v38, %v1501_v29  ;;  %v719_v26 = vadd.f32 %v5689_v18, %v5688_v2  ;;  %v5692_v18 = vld [vmem:[#allocation51_spill] sm:$0xff] }
 0x37d   :  { %v842_v45 = vadd.f32 %v4762_v58, %v719_v26  ;;  %v5693_v26 = vld [vmem:[#allocation91_spill] sm:$0xff] }
 0x380   :  { %v3564_v34 = vpop.eup %3563 }
 0x381   :  { %v4944_v57 = vmul.f32 %v3564_v34, %v1506_v4 }
 0x383   :  { %5685 = vst [vmem:[#allocation86_spill] sm:$0xff] %v4944_v57  ;;  %v4950_v20 = vsel %vm1515_vm14, %v4944_v57, %v4891_v19  ;;  %v5687_v19 = vld [vmem:[#allocation52_spill] sm:$0xff] }
 0x384   :  { %v1521_v49 = vpack.c.bf16 %v4950_v20, %v4950_v20  ;;  %v680_v50 = vadd.f32 %v5687_v19, %v5686_v21 }
 0x386   :  { %1534 = vmatmul.bf16.vlgmr.msrb.gmra.mxu0 %v1521_v49  ;;  %1547 = vmatmul.bf16.vlgmr.msrb.gmra.mxu1 %v1521_v49  ;;  %v841_v62 = vadd.f32 %v4760_v61, %v680_v50 }
 0x387   :  { %1560 = vmatmul.bf16.vlgmr.msra.gmra.mxu2 %v1521_v49  ;;  %1573 = vmatmul.bf16.vlgmr.msra.gmra.mxu3 %v1521_v49 }
 0x388   :  { %1780 = vmatpush.bf16.msrb.mxu0 %v4188_v24  ;;  %1793 = vmatpush.bf16.msrb.mxu1 %v4193_v28 }
 0x389   :  { %1806 = vmatpush.bf16.msra.mxu2 %v4329_v33  ;;  %1819 = vmatpush.bf16.msra.mxu3 %v4371_v54 }
 0x38c   :  { %1781 = vmatpush.bf16.msrb.mxu0 %v4205_v30  ;;  %1794 = vmatpush.bf16.msrb.mxu1 %v4211_v32 }
 0x38d   :  { %1807 = vmatpush.bf16.msra.mxu2 %v4382_v60  ;;  %1820 = vmatpush.bf16.msra.mxu3 %v4419_v13 }
 0x390   :  { %1782 = vmatpush.bf16.msrb.mxu0 %v4232_v36  ;;  %1795 = vmatpush.bf16.msrb.mxu1 %v4237_v46 }
 0x391   :  { %1808 = vmatpush.bf16.msra.mxu2 %v4424_v27  ;;  %1821 = vmatpush.bf16.msra.mxu3 %v4455_v42 }
 0x394   :  { %1783 = vmatpush.bf16.msrb.mxu0 %v4252_v55  ;;  %1796 = vmatpush.bf16.msrb.mxu1 %v4257_v56 }
 0x395   :  { %1809 = vmatpush.bf16.msra.mxu2 %v4470_v16  ;;  %1822 = vmatpush.bf16.msra.mxu3 %v4498_v25 }
 0x398   :  { %1784 = vmatpush.bf16.msrb.mxu0 %v4276_v3  ;;  %1797 = vmatpush.bf16.msrb.mxu1 %v4281_v10 }
 0x399   :  { %1810 = vmatpush.bf16.msra.mxu2 %v4511_v9  ;;  %1823 = vmatpush.bf16.msra.mxu3 %v4532_v0 }
 0x39c   :  { %1785 = vmatpush.bf16.msrb.mxu0 %v4294_v15  ;;  %1798 = vmatpush.bf16.msrb.mxu1 %v4299_v17 }
 0x39d   :  { %1811 = vmatpush.bf16.msra.mxu2 %v4547_v51  ;;  %1824 = vmatpush.bf16.msra.mxu3 %v4583_v39 }
 0x3a0   :  { %1786 = vmatpush.bf16.msrb.mxu0 %v4324_v22  ;;  %1799 = vmatpush.bf16.msrb.mxu1 %v4331_v37 }
 0x3a1   :  { %1812 = vmatpush.bf16.msra.mxu2 %v4588_v11  ;;  %1825 = vmatpush.bf16.msra.mxu3 %v4610_v7 }
 0x3a4   :  { %1787 = vmatpush.bf16.msrb.mxu0 %v4348_v44  ;;  %1800 = vmatpush.bf16.msrb.mxu1 %v4354_v43 }
 0x3a5   :  { %1813 = vmatpush.bf16.msra.mxu2 %v4623_v6  ;;  %1826 = vmatpush.bf16.msra.mxu3 %v4644_v23 }
 0x403   :  { %v1535_v41 = vpop.f32.mrf.mxu0  ;;  %v1548_v52 = vpop.f32.mrf.mxu1 }
 0x404   :  { %v1536_v1 = vadd.f32 %v1535_v41, %v841_v62  ;;  %v1549_v63 = vadd.f32 %v1548_v52, %v842_v45  ;;  %v797_v62 = vadd.f32 %v5693_v26, %v5692_v18 }
 0x406   :  { %v3288_v59 = vmul.f32 -1.442695, %v1536_v1  ;;  %v3289_v5 = vmul.f32 -1.442695, %v1549_v63  ;;  %v844_v1 = vadd.f32 %v5675_v14, %v797_v62 }
 0x408   :  { %3565 = vpow2.f32 %v3288_v59 }
 0x409   :  { %3567 = vpow2.f32 %v3289_v5 }
 0x40a   :  { %v1561_v31 = vpop.f32.mrf.mxu2  ;;  %v1574_v29 = vpop.f32.mrf.mxu3 }
 0x40b   :  { %v1562_v38 = vadd.f32 %v1561_v31, %v843_v47  ;;  %v1537_v34 = vpop.f32.mrf.mxu0  ;;  %v1550_v4 = vpop.f32.mrf.mxu1  ;;  %v1575_v40 = vadd.f32 %v1574_v29, %v844_v1 }
 0x40d   :  { %v3290_v49 = vmul.f32 -1.442695, %v1562_v38 }
 0x40e   :  { %v3566_v21 = vpop.eup %3565 }
 0x40f   :  { %v3568_v19 = vpop.eup %3567  ;;  %v1587_v50 = vadd.f32 1.0, %v3566_v21  ;;  %3569 = vpow2.f32 %v3290_v49 }
 0x410   :  { %v1588_v2 = vadd.f32 1.0, %v3568_v19 }
 0x411   :  { %3571 = vrcp.f32 %v1587_v50  ;;  %v1601_v38 = vand.u32 2147483648, %v1587_v50  ;;  %v1599_v49 = vand.u32 2147483647, %v1587_v50  ;;  %vm1595_vm8 = vweird.f32 %v1587_v50 }
 0x412   :  { %3573 = vrcp.f32 %v1588_v2  ;;  %v1563_v45 = vpop.f32.mrf.mxu2  ;;  %v1576_v41 = vpop.f32.mrf.mxu3  ;;  %v1616_v34 = vand.u32 2147483648, %v1588_v2  ;;  %v1614_v19 = vand.u32 2147483647, %v1588_v2  ;;  %vm1610_vm9 = vweird.f32 %v1588_v2 }
 0x413   :  { %v1602_v62 = vor.u32 1.1754944e-38, %v1601_v38  ;;  %vm1600_vm11 = vcmp.eq.f32.partialorder %v1599_v49, 8.507059e+37 }
 0x414   :  { %v1617_v41 = vor.u32 1.1754944e-38, %v1616_v34  ;;  %vm1615_vm12 = vcmp.eq.f32.partialorder %v1614_v19, 8.507059e+37 }
 0x415   :  { %v3570_v52 = vpop.eup %3569 }
 0x416   :  { %v1589_v63 = vadd.f32 1.0, %v3570_v52 }
 0x417   :  { %v3572_v12 = vpop.eup %3571 }
 0x418   :  { %v3574_v8 = vpop.eup %3573  ;;  %v1591_v59 = vmul.f32 %v3572_v12, %v1587_v50  ;;  %3575 = vrcp.f32 %v1589_v63  ;;  %vm1596_vm5 = vweird.f32 %v3572_v12  ;;  %v1631_v38 = vand.u32 2147483648, %v1589_v63 }
 0x419   :  { %v1606_v5 = vmul.f32 %v3574_v8, %v1588_v2  ;;  %3577 = vtanh.f32 %v1575_v40  ;;  %vm1611_vm6 = vweird.f32 %v3574_v8  ;;  %vm1597_vm10 = vmor %vm1595_vm8, %vm1596_vm5  ;;  %v5694_v2 = vld [vmem:[#allocation23_spill] sm:$0xff]  ;;  %vm1625_vm1 = vweird.f32 %v1589_v63 }
 0x41a   :  { %v1592_v47 = vsub.f32 1.0, %v1591_v59  ;;  %vm1612_vm3 = vmor %vm1610_vm9, %vm1611_vm6  ;;  %vm1642_vm13 = vcmp.ne.s32.totalorder %v5694_v2, 0  ;;  %v1632_v49 = vor.u32 1.1754944e-38, %v1631_v38 }
 0x41b   :  { %v1607_v31 = vsub.f32 1.0, %v1606_v5 }
 0x41c   :  { %v1593_v4 = vmul.f32 %v3572_v12, %v1592_v47 }
 0x41d   :  { %v1608_v21 = vmul.f32 %v3574_v8, %v1607_v31 }
 0x41e   :  { %v3576_v18 = vpop.eup %3575  ;;  %v1594_v26 = vadd.f32 %v3572_v12, %v1593_v4 }
 0x41f   :  { %v1621_v29 = vmul.f32 %v3576_v18, %v1589_v63  ;;  %v1609_v45 = vadd.f32 %v3574_v8, %v1608_v21  ;;  %v3578_v1 = vpop.eup %3577  ;;  %vm1626_vm15 = vweird.f32 %v3576_v18 }
 0x420   :  { %v1598_v52 = vsel %vm1597_vm10, %v3572_v12, %v1594_v26  ;;  %vm1627_vm2 = vmor %vm1625_vm1, %vm1626_vm15 }
 0x421   :  { %v1622_v40 = vsub.f32 1.0, %v1621_v29  ;;  %v1603_v59 = vsel %vm1600_vm11, %v1602_v62, %v1598_v52  ;;  %v1613_v5 = vsel %vm1612_vm3, %v3574_v8, %v1609_v45  ;;  %v1629_v8 = vand.u32 2147483647, %v1589_v63  ;;  %v5697_v63 = vld [vmem:[#allocation57_spill] sm:$0xff]  ;;  %v5698_v52 = vld [vmem:[#allocation54_spill] sm:$0xff] }
 0x422   :  { %v1618_v47 = vsel %vm1615_vm12, %v1617_v41, %v1613_v5  ;;  %v1637_v31 = vmul.f32 %v3578_v1, %v1603_v59  ;;  %v5699_v1 = vld [vmem:[#allocation92_spill] sm:$0xff] }
 0x423   :  { %v1623_v48 = vmul.f32 %v3576_v18, %v1622_v40  ;;  %v1636_v4 = vmul.f32 %v1618_v47, %v4942_v53  ;;  %vm1630_vm4 = vcmp.eq.f32.partialorder %v1629_v8, 8.507059e+37  ;;  %v761_v40 = vadd.f32 %v5699_v1, %v5698_v52 }
 0x425   :  { %v1638_v50 = vadd.f32 %v1637_v31, %v1636_v4  ;;  %v1624_v57 = vadd.f32 %v3576_v18, %v1623_v48  ;;  %v847_v47 = vadd.f32 %v4814_v35, %v761_v40 }
 0x427   :  { %3579 = vtanh.f32 %v1638_v50  ;;  %v5003_v12 = vsel %vm1642_vm13, %v1638_v50, %v4942_v53  ;;  %v1628_v34 = vsel %vm1627_vm2, %v3576_v18, %v1624_v57  ;;  %v5696_v57 = vld [vmem:[#allocation56_spill] sm:$0xff]  ;;  %v846_v18 = vadd.f32 %v4762_v58, %v5697_v63 }
 0x428   :  { %v1633_v19 = vsel %vm1630_vm4, %v1632_v49, %v1628_v34 }
 0x42d   :  { %v3580_v21 = vpop.eup %3579 }
 0x42e   :  { %v5005_v26 = vmul.f32 %v3580_v21, %v1633_v19 }
 0x430   :  { %5695 = vst [vmem:[#allocation45_spill] sm:$0xff] %v5005_v26  ;;  %v5011_v48 = vsel %vm1642_vm13, %v5005_v26, %v4950_v20  ;;  %v845_v20 = vadd.f32 %v4760_v61, %v5696_v57  ;;  %v5700_v57 = vld [vmem:[#allocation55_spill] sm:$0xff] }
 0x431   :  { %v1648_v53 = vpack.c.bf16 %v5011_v48, %v5011_v48 }
 0x433   :  { %1661 = vmatmul.bf16.vlgmr.msra.gmra.mxu0 %v1648_v53  ;;  %1674 = vmatmul.bf16.vlgmr.msra.gmra.mxu1 %v1648_v53 }
 0x434   :  { %1687 = vmatmul.bf16.vlgmr.msrb.gmra.mxu2 %v1648_v53  ;;  %1700 = vmatmul.bf16.vlgmr.msrb.gmra.mxu3 %v1648_v53 }
 0x435   :  { %1907 = vmatpush.bf16.msra.mxu0 %v4188_v24  ;;  %1920 = vmatpush.bf16.msra.mxu1 %v4193_v28 }
 0x436   :  { %1933 = vmatpush.bf16.msrb.mxu2 %v4329_v33  ;;  %1946 = vmatpush.bf16.msrb.mxu3 %v4371_v54 }
 0x439   :  { %1908 = vmatpush.bf16.msra.mxu0 %v4205_v30  ;;  %1921 = vmatpush.bf16.msra.mxu1 %v4211_v32 }
 0x43a   :  { %1934 = vmatpush.bf16.msrb.mxu2 %v4382_v60  ;;  %1947 = vmatpush.bf16.msrb.mxu3 %v4419_v13 }
 0x43d   :  { %1909 = vmatpush.bf16.msra.mxu0 %v4232_v36  ;;  %1922 = vmatpush.bf16.msra.mxu1 %v4237_v46 }
 0x43e   :  { %1935 = vmatpush.bf16.msrb.mxu2 %v4424_v27  ;;  %1948 = vmatpush.bf16.msrb.mxu3 %v4455_v42 }
 0x441   :  { %1910 = vmatpush.bf16.msra.mxu0 %v4252_v55  ;;  %1923 = vmatpush.bf16.msra.mxu1 %v4257_v56 }
 0x442   :  { %1936 = vmatpush.bf16.msrb.mxu2 %v4470_v16  ;;  %1949 = vmatpush.bf16.msrb.mxu3 %v4498_v25 }
 0x445   :  { %1911 = vmatpush.bf16.msra.mxu0 %v4276_v3  ;;  %1924 = vmatpush.bf16.msra.mxu1 %v4281_v10 }
 0x446   :  { %1937 = vmatpush.bf16.msrb.mxu2 %v4511_v9  ;;  %1950 = vmatpush.bf16.msrb.mxu3 %v4532_v0 }
 0x449   :  { %1912 = vmatpush.bf16.msra.mxu0 %v4294_v15  ;;  %1925 = vmatpush.bf16.msra.mxu1 %v4299_v17 }
 0x44a   :  { %1938 = vmatpush.bf16.msrb.mxu2 %v4547_v51  ;;  %1951 = vmatpush.bf16.msrb.mxu3 %v4583_v39 }
 0x44d   :  { %1913 = vmatpush.bf16.msra.mxu0 %v4324_v22  ;;  %1926 = vmatpush.bf16.msra.mxu1 %v4331_v37 }
 0x44e   :  { %1939 = vmatpush.bf16.msrb.mxu2 %v4588_v11  ;;  %1952 = vmatpush.bf16.msrb.mxu3 %v4610_v7 }
 0x451   :  { %1914 = vmatpush.bf16.msra.mxu0 %v4348_v44  ;;  %1927 = vmatpush.bf16.msra.mxu1 %v4354_v43 }
 0x452   :  { %1940 = vmatpush.bf16.msrb.mxu2 %v4623_v6  ;;  %1953 = vmatpush.bf16.msrb.mxu3 %v4644_v23 }
 0x4b0   :  { %v1662_v29 = vpop.f32.mrf.mxu0  ;;  %v1675_v62 = vpop.f32.mrf.mxu1 }
 0x4b1   :  { %v1663_v45 = vadd.f32 %v1662_v29, %v845_v20  ;;  %v1676_v41 = vadd.f32 %v1675_v62, %v846_v18  ;;  %v5701_v20 = vld [vmem:[#allocation93_spill] sm:$0xff] }
 0x4b2   :  { %v800_v63 = vadd.f32 %v5701_v20, %v5700_v57 }
 0x4b3   :  { %v3291_v59 = vmul.f32 -1.442695, %v1663_v45  ;;  %v3292_v5 = vmul.f32 -1.442695, %v1676_v41 }
 0x4b4   :  { %v848_v45 = vadd.f32 %v5675_v14, %v800_v63 }
 0x4b5   :  { %3581 = vpow2.f32 %v3291_v59 }
 0x4b6   :  { %3583 = vpow2.f32 %v3292_v5 }
 0x4b7   :  { %v1688_v31 = vpop.f32.mrf.mxu2  ;;  %v1701_v4 = vpop.f32.mrf.mxu3 }
 0x4b8   :  { %v1689_v50 = vadd.f32 %v1688_v31, %v847_v47  ;;  %v1664_v38 = vpop.f32.mrf.mxu0  ;;  %v1677_v8 = vpop.f32.mrf.mxu1  ;;  %v1702_v1 = vadd.f32 %v1701_v4, %v848_v45 }
 0x4ba   :  { %v3293_v34 = vmul.f32 -1.442695, %v1689_v50 }
 0x4bb   :  { %v3582_v49 = vpop.eup %3581 }
 0x4bc   :  { %v3584_v21 = vpop.eup %3583  ;;  %v1714_v19 = vadd.f32 1.0, %v3582_v49  ;;  %3585 = vpow2.f32 %v3293_v34 }
 0x4bd   :  { %v1715_v53 = vadd.f32 1.0, %v3584_v21 }
 0x4be   :  { %3587 = vrcp.f32 %v1714_v19  ;;  %v1728_v50 = vand.u32 2147483648, %v1714_v19  ;;  %v1726_v34 = vand.u32 2147483647, %v1714_v19  ;;  %vm1722_vm8 = vweird.f32 %v1714_v19 }
 0x4bf   :  { %3589 = vrcp.f32 %v1715_v53  ;;  %v1690_v18 = vpop.f32.mrf.mxu2  ;;  %v1703_v29 = vpop.f32.mrf.mxu3  ;;  %v1743_v38 = vand.u32 2147483648, %v1715_v53  ;;  %v1741_v21 = vand.u32 2147483647, %v1715_v53  ;;  %vm1737_vm9 = vweird.f32 %v1715_v53 }
 0x4c0   :  { %v1729_v63 = vor.u32 1.1754944e-38, %v1728_v50  ;;  %vm1727_vm11 = vcmp.eq.f32.partialorder %v1726_v34, 8.507059e+37 }
 0x4c1   :  { %v1744_v29 = vor.u32 1.1754944e-38, %v1743_v38  ;;  %vm1742_vm12 = vcmp.eq.f32.partialorder %v1741_v21, 8.507059e+37 }
 0x4c2   :  { %v3586_v62 = vpop.eup %3585 }
 0x4c3   :  { %v1716_v41 = vadd.f32 1.0, %v3586_v62 }
 0x4c4   :  { %v3588_v52 = vpop.eup %3587 }
 0x4c5   :  { %v3590_v40 = vpop.eup %3589  ;;  %v1718_v59 = vmul.f32 %v3588_v52, %v1714_v19  ;;  %3591 = vrcp.f32 %v1716_v41  ;;  %vm1723_vm5 = vweird.f32 %v3588_v52  ;;  %v1758_v50 = vand.u32 2147483648, %v1716_v41 }
 0x4c6   :  { %v1733_v5 = vmul.f32 %v3590_v40, %v1715_v53  ;;  %3593 = vtanh.f32 %v1702_v1  ;;  %vm1738_vm6 = vweird.f32 %v3590_v40  ;;  %vm1724_vm10 = vmor %vm1722_vm8, %vm1723_vm5  ;;  %v5702_v53 = vld [vmem:[#allocation22_spill] sm:$0xff]  ;;  %vm1752_vm2 = vweird.f32 %v1716_v41 }
 0x4c7   :  { %v1719_v47 = vsub.f32 1.0, %v1718_v59  ;;  %vm1739_vm3 = vmor %vm1737_vm9, %vm1738_vm6  ;;  %vm1769_vm15 = vcmp.ne.s32.totalorder %v5702_v53, 0  ;;  %v1759_v34 = vor.u32 1.1754944e-38, %v1758_v50 }
 0x4c8   :  { %v1734_v31 = vsub.f32 1.0, %v1733_v5 }
 0x4c9   :  { %v1720_v8 = vmul.f32 %v3588_v52, %v1719_v47 }
 0x4ca   :  { %v1735_v49 = vmul.f32 %v3590_v40, %v1734_v31 }
 0x4cb   :  { %v3592_v57 = vpop.eup %3591  ;;  %v1721_v20 = vadd.f32 %v3588_v52, %v1720_v8 }
 0x4cc   :  { %v1748_v4 = vmul.f32 %v3592_v57, %v1716_v41  ;;  %v1736_v18 = vadd.f32 %v3590_v40, %v1735_v49  ;;  %v3594_v45 = vpop.eup %3593  ;;  %vm1753_vm1 = vweird.f32 %v3592_v57 }
 0x4cd   :  { %v1725_v62 = vsel %vm1724_vm10, %v3588_v52, %v1721_v20  ;;  %vm1754_vm4 = vmor %vm1752_vm2, %vm1753_vm1 }
 0x4ce   :  { %v1749_v1 = vsub.f32 1.0, %v1748_v4  ;;  %v1730_v59 = vsel %vm1727_vm11, %v1729_v63, %v1725_v62  ;;  %v1740_v5 = vsel %vm1739_vm3, %v3590_v40, %v1736_v18  ;;  %v1756_v40 = vand.u32 2147483647, %v1716_v41  ;;  %v5707_v4 = vld [vmem:[#allocation61_spill] sm:$0xff] }
 0x4cf   :  { %v1745_v47 = vsel %vm1742_vm12, %v1744_v29, %v1740_v5  ;;  %v1764_v31 = vmul.f32 %v3594_v45, %v1730_v59  ;;  %v5708_v5 = vld [vmem:[#allocation58_spill] sm:$0xff] }
 0x4d0   :  { %v1750_v2 = vmul.f32 %v3592_v57, %v1749_v1  ;;  %v1763_v8 = vmul.f32 %v1745_v47, %v5003_v12  ;;  %vm1757_vm5 = vcmp.eq.f32.partialorder %v1756_v40, 8.507059e+37  ;;  %v5709_v47 = vld [vmem:[#allocation94_spill] sm:$0xff] }
 0x4d2   :  { %v1765_v19 = vadd.f32 %v1764_v31, %v1763_v8  ;;  %v1751_v26 = vadd.f32 %v3592_v57, %v1750_v2  ;;  %v763_v31 = vadd.f32 %v5709_v47, %v5708_v5 }
 0x4d4   :  { %3595 = vtanh.f32 %v1765_v19  ;;  %v5062_v52 = vsel %vm1769_vm15, %v1765_v19, %v5003_v12  ;;  %v1755_v38 = vsel %vm1754_vm4, %v3592_v57, %v1751_v26  ;;  %v5704_v26 = vld [vmem:[#allocation42_spill] sm:$0xff]  ;;  %v5706_v57 = vld [vmem:[#allocation43_spill] sm:$0xff]  ;;  %v851_v50 = vadd.f32 %v4814_v35, %v763_v31 }
 0x4d5   :  { %v1760_v21 = vsel %vm1757_vm5, %v1759_v34, %v1755_v38  ;;  %v724_v63 = vadd.f32 %v5707_v4, %v5706_v57  ;;  %v5710_v4 = vld [vmem:[#allocation59_spill] sm:$0xff] }
 0x4d7   :  { %v850_v29 = vadd.f32 %v4762_v58, %v724_v63  ;;  %v5711_v63 = vld [vmem:[#allocation95_spill] sm:$0xff] }
 0x4da   :  { %v3596_v49 = vpop.eup %3595 }
 0x4db   :  { %v5064_v20 = vmul.f32 %v3596_v49, %v1760_v21 }
 0x4dd   :  { %5703 = vst [vmem:[#allocation87_spill] sm:$0xff] %v5064_v20  ;;  %v5070_v2 = vsel %vm1769_vm15, %v5064_v20, %v5011_v48  ;;  %v5705_v48 = vld [vmem:[#allocation60_spill] sm:$0xff] }
 0x4de   :  { %v1775_v12 = vpack.c.bf16 %v5070_v2, %v5070_v2  ;;  %v685_v41 = vadd.f32 %v5705_v48, %v5704_v26 }
 0x4e0   :  { %1788 = vmatmul.bf16.vlgmr.msrb.gmra.mxu0 %v1775_v12  ;;  %1801 = vmatmul.bf16.vlgmr.msrb.gmra.mxu1 %v1775_v12  ;;  %v849_v18 = vadd.f32 %v4760_v61, %v685_v41 }
 0x4e1   :  { %1814 = vmatmul.bf16.vlgmr.msra.gmra.mxu2 %v1775_v12  ;;  %1827 = vmatmul.bf16.vlgmr.msra.gmra.mxu3 %v1775_v12 }
 0x4e2   :  { %2034 = vmatpush.bf16.msrb.mxu0 %v4188_v24  ;;  %2047 = vmatpush.bf16.msrb.mxu1 %v4193_v28 }
 0x4e3   :  { %2060 = vmatpush.bf16.msra.mxu2 %v4329_v33  ;;  %2073 = vmatpush.bf16.msra.mxu3 %v4371_v54 }
 0x4e6   :  { %2035 = vmatpush.bf16.msrb.mxu0 %v4205_v30  ;;  %2048 = vmatpush.bf16.msrb.mxu1 %v4211_v32 }
 0x4e7   :  { %2061 = vmatpush.bf16.msra.mxu2 %v4382_v60  ;;  %2074 = vmatpush.bf16.msra.mxu3 %v4419_v13 }
 0x4ea   :  { %2036 = vmatpush.bf16.msrb.mxu0 %v4232_v36  ;;  %2049 = vmatpush.bf16.msrb.mxu1 %v4237_v46 }
 0x4eb   :  { %2062 = vmatpush.bf16.msra.mxu2 %v4424_v27  ;;  %2075 = vmatpush.bf16.msra.mxu3 %v4455_v42 }
 0x4ee   :  { %2037 = vmatpush.bf16.msrb.mxu0 %v4252_v55  ;;  %2050 = vmatpush.bf16.msrb.mxu1 %v4257_v56 }
 0x4ef   :  { %2063 = vmatpush.bf16.msra.mxu2 %v4470_v16  ;;  %2076 = vmatpush.bf16.msra.mxu3 %v4498_v25 }
 0x4f2   :  { %2038 = vmatpush.bf16.msrb.mxu0 %v4276_v3  ;;  %2051 = vmatpush.bf16.msrb.mxu1 %v4281_v10 }
 0x4f3   :  { %2064 = vmatpush.bf16.msra.mxu2 %v4511_v9  ;;  %2077 = vmatpush.bf16.msra.mxu3 %v4532_v0 }
 0x4f6   :  { %2039 = vmatpush.bf16.msrb.mxu0 %v4294_v15  ;;  %2052 = vmatpush.bf16.msrb.mxu1 %v4299_v17 }
 0x4f7   :  { %2065 = vmatpush.bf16.msra.mxu2 %v4547_v51  ;;  %2078 = vmatpush.bf16.msra.mxu3 %v4583_v39 }
 0x4fa   :  { %2040 = vmatpush.bf16.msrb.mxu0 %v4324_v22  ;;  %2053 = vmatpush.bf16.msrb.mxu1 %v4331_v37 }
 0x4fb   :  { %2066 = vmatpush.bf16.msra.mxu2 %v4588_v11  ;;  %2079 = vmatpush.bf16.msra.mxu3 %v4610_v7 }
 0x4fe   :  { %2041 = vmatpush.bf16.msrb.mxu0 %v4348_v44  ;;  %2054 = vmatpush.bf16.msrb.mxu1 %v4354_v43 }
 0x4ff   :  { %2067 = vmatpush.bf16.msra.mxu2 %v4623_v6  ;;  %2080 = vmatpush.bf16.msra.mxu3 %v4644_v23 }
 0x55d   :  { %v1789_v62 = vpop.f32.mrf.mxu0  ;;  %v1802_v45 = vpop.f32.mrf.mxu1 }
 0x55e   :  { %v1790_v1 = vadd.f32 %v1789_v62, %v849_v18  ;;  %v1803_v59 = vadd.f32 %v1802_v45, %v850_v29  ;;  %v802_v18 = vadd.f32 %v5711_v63, %v5710_v4 }
 0x560   :  { %v3294_v8 = vmul.f32 -1.442695, %v1790_v1  ;;  %v3295_v19 = vmul.f32 -1.442695, %v1803_v59  ;;  %v852_v1 = vadd.f32 %v5675_v14, %v802_v18 }
 0x562   :  { %3597 = vpow2.f32 %v3294_v8 }
 0x563   :  { %3599 = vpow2.f32 %v3295_v19 }
 0x564   :  { %v1815_v40 = vpop.f32.mrf.mxu2  ;;  %v1828_v38 = vpop.f32.mrf.mxu3 }
 0x565   :  { %v1816_v34 = vadd.f32 %v1815_v40, %v851_v50  ;;  %v1791_v49 = vpop.f32.mrf.mxu0  ;;  %v1804_v21 = vpop.f32.mrf.mxu1  ;;  %v1829_v47 = vadd.f32 %v1828_v38, %v852_v1 }
 0x567   :  { %v3296_v12 = vmul.f32 -1.442695, %v1816_v34 }
 0x568   :  { %v3598_v26 = vpop.eup %3597 }
 0x569   :  { %v3600_v48 = vpop.eup %3599  ;;  %v1841_v41 = vadd.f32 1.0, %v3598_v26  ;;  %3601 = vpow2.f32 %v3296_v12 }
 0x56a   :  { %v1842_v57 = vadd.f32 1.0, %v3600_v48 }
 0x56b   :  { %3603 = vrcp.f32 %v1841_v41  ;;  %v1855_v34 = vand.u32 2147483648, %v1841_v41  ;;  %v1853_v12 = vand.u32 2147483647, %v1841_v41  ;;  %vm1849_vm9 = vweird.f32 %v1841_v41 }
 0x56c   :  { %3605 = vrcp.f32 %v1842_v57  ;;  %v1817_v29 = vpop.f32.mrf.mxu2  ;;  %v1830_v62 = vpop.f32.mrf.mxu3  ;;  %v1870_v49 = vand.u32 2147483648, %v1842_v57  ;;  %v1868_v48 = vand.u32 2147483647, %v1842_v57  ;;  %vm1864_vm10 = vweird.f32 %v1842_v57 }
 0x56d   :  { %v1856_v18 = vor.u32 1.1754944e-38, %v1855_v34  ;;  %vm1854_vm12 = vcmp.eq.f32.partialorder %v1853_v12, 8.507059e+37 }
 0x56e   :  { %v1871_v62 = vor.u32 1.1754944e-38, %v1870_v49  ;;  %vm1869_vm1 = vcmp.eq.f32.partialorder %v1868_v48, 8.507059e+37 }
 0x56f   :  { %v3602_v45 = vpop.eup %3601 }
 0x570   :  { %v1843_v59 = vadd.f32 1.0, %v3602_v45 }
 0x571   :  { %v3604_v5 = vpop.eup %3603 }
 0x572   :  { %v3606_v31 = vpop.eup %3605  ;;  %v1845_v8 = vmul.f32 %v3604_v5, %v1841_v41  ;;  %3607 = vrcp.f32 %v1843_v59  ;;  %vm1850_vm6 = vweird.f32 %v3604_v5  ;;  %v1885_v34 = vand.u32 2147483648, %v1843_v59 }
 0x573   :  { %v1860_v19 = vmul.f32 %v3606_v31, %v1842_v57  ;;  %3609 = vtanh.f32 %v1829_v47  ;;  %vm1865_vm8 = vweird.f32 %v3606_v31  ;;  %vm1851_vm3 = vmor %vm1849_vm9, %vm1850_vm6  ;;  %v5712_v57 = vld [vmem:[#allocation17_spill] sm:$0xff]  ;;  %vm1879_vm5 = vweird.f32 %v1843_v59 }
 0x574   :  { %v1846_v50 = vsub.f32 1.0, %v1845_v8  ;;  %vm1866_vm11 = vmor %vm1864_vm10, %vm1865_vm8  ;;  %vm1896_vm2 = vcmp.ne.s32.totalorder %v5712_v57, 0  ;;  %v1886_v12 = vor.u32 1.1754944e-38, %v1885_v34 }
 0x575   :  { %v1861_v40 = vsub.f32 1.0, %v1860_v19 }
 0x576   :  { %v1847_v21 = vmul.f32 %v3604_v5, %v1846_v50 }
 0x577   :  { %v1862_v26 = vmul.f32 %v3606_v31, %v1861_v40 }
 0x578   :  { %v3608_v4 = vpop.eup %3607  ;;  %v1848_v63 = vadd.f32 %v3604_v5, %v1847_v21 }
 0x579   :  { %v1875_v38 = vmul.f32 %v3608_v4, %v1843_v59  ;;  %v1863_v29 = vadd.f32 %v3606_v31, %v1862_v26  ;;  %v3610_v1 = vpop.eup %3609  ;;  %vm1880_vm4 = vweird.f32 %v3608_v4 }
 0x57a   :  { %v1852_v45 = vsel %vm1851_vm3, %v3604_v5, %v1848_v63  ;;  %vm1881_vm6 = vmor %vm1879_vm5, %vm1880_vm4 }
 0x57b   :  { %v1876_v47 = vsub.f32 1.0, %v1875_v38  ;;  %v1857_v8 = vsel %vm1854_vm12, %v1856_v18, %v1852_v45  ;;  %v1867_v19 = vsel %vm1866_vm11, %v3606_v31, %v1863_v29  ;;  %v1883_v31 = vand.u32 2147483647, %v1843_v59  ;;  %v5717_v38 = vld [vmem:[#allocation65_spill] sm:$0xff] }
 0x57c   :  { %v1872_v50 = vsel %vm1869_vm1, %v1871_v62, %v1867_v19  ;;  %v1891_v40 = vmul.f32 %v3610_v1, %v1857_v8  ;;  %v5718_v19 = vld [vmem:[#allocation62_spill] sm:$0xff] }
 0x57d   :  { %v1877_v53 = vmul.f32 %v3608_v4, %v1876_v47  ;;  %v1890_v21 = vmul.f32 %v1872_v50, %v5062_v52  ;;  %vm1884_vm8 = vcmp.eq.f32.partialorder %v1883_v31, 8.507059e+37  ;;  %v5719_v50 = vld [vmem:[#allocation96_spill] sm:$0xff] }
 0x57f   :  { %v1892_v41 = vadd.f32 %v1891_v40, %v1890_v21  ;;  %v1878_v20 = vadd.f32 %v3608_v4, %v1877_v53  ;;  %v766_v40 = vadd.f32 %v5719_v50, %v5718_v19 }
 0x581   :  { %3611 = vtanh.f32 %v1892_v41  ;;  %v5123_v5 = vsel %vm1896_vm2, %v1892_v41, %v5062_v52  ;;  %v1882_v49 = vsel %vm1881_vm6, %v3608_v4, %v1878_v20  ;;  %v5714_v20 = vld [vmem:[#allocation28_spill] sm:$0xff]  ;;  %v5716_v4 = vld [vmem:[#allocation29_spill] sm:$0xff]  ;;  %v855_v34 = vadd.f32 %v4814_v35, %v766_v40 }
 0x582   :  { %v1887_v48 = vsel %vm1884_vm8, %v1886_v12, %v1882_v49  ;;  %v727_v18 = vadd.f32 %v5717_v38, %v5716_v4  ;;  %v5720_v38 = vld [vmem:[#allocation63_spill] sm:$0xff] }
 0x584   :  { %v854_v62 = vadd.f32 %v4762_v58, %v727_v18  ;;  %v5721_v18 = vld [vmem:[#allocation97_spill] sm:$0xff] }
 0x587   :  { %v3612_v26 = vpop.eup %3611 }
 0x588   :  { %v5125_v63 = vmul.f32 %v3612_v26, %v1887_v48 }
 0x58a   :  { %5713 = vst [vmem:[#allocation108_spill] sm:$0xff] %v5125_v63  ;;  %v5131_v53 = vsel %vm1896_vm2, %v5125_v63, %v5070_v2  ;;  %v5715_v2 = vld [vmem:[#allocation64_spill] sm:$0xff] }
 0x58b   :  { %v1902_v52 = vpack.c.bf16 %v5131_v53, %v5131_v53  ;;  %v688_v59 = vadd.f32 %v5715_v2, %v5714_v20 }
 0x58d   :  { %1915 = vmatmul.bf16.vlgmr.msra.gmra.mxu0 %v1902_v52  ;;  %1928 = vmatmul.bf16.vlgmr.msra.gmra.mxu1 %v1902_v52  ;;  %v853_v29 = vadd.f32 %v4760_v61, %v688_v59 }
 0x58e   :  { %1941 = vmatmul.bf16.vlgmr.msrb.gmra.mxu2 %v1902_v52  ;;  %1954 = vmatmul.bf16.vlgmr.msrb.gmra.mxu3 %v1902_v52 }
 0x58f   :  { %2161 = vmatpush.bf16.msra.mxu0 %v4188_v24  ;;  %2174 = vmatpush.bf16.msra.mxu1 %v4193_v28 }
 0x590   :  { %2187 = vmatpush.bf16.msrb.mxu2 %v4329_v33  ;;  %2200 = vmatpush.bf16.msrb.mxu3 %v4371_v54 }
 0x593   :  { %2162 = vmatpush.bf16.msra.mxu0 %v4205_v30  ;;  %2175 = vmatpush.bf16.msra.mxu1 %v4211_v32 }
 0x594   :  { %2188 = vmatpush.bf16.msrb.mxu2 %v4382_v60  ;;  %2201 = vmatpush.bf16.msrb.mxu3 %v4419_v13 }
 0x597   :  { %2163 = vmatpush.bf16.msra.mxu0 %v4232_v36  ;;  %2176 = vmatpush.bf16.msra.mxu1 %v4237_v46 }
 0x598   :  { %2189 = vmatpush.bf16.msrb.mxu2 %v4424_v27  ;;  %2202 = vmatpush.bf16.msrb.mxu3 %v4455_v42 }
 0x59b   :  { %2164 = vmatpush.bf16.msra.mxu0 %v4252_v55  ;;  %2177 = vmatpush.bf16.msra.mxu1 %v4257_v56 }
 0x59c   :  { %2190 = vmatpush.bf16.msrb.mxu2 %v4470_v16  ;;  %2203 = vmatpush.bf16.msrb.mxu3 %v4498_v25 }
 0x59f   :  { %2165 = vmatpush.bf16.msra.mxu0 %v4276_v3  ;;  %2178 = vmatpush.bf16.msra.mxu1 %v4281_v10 }
 0x5a0   :  { %2191 = vmatpush.bf16.msrb.mxu2 %v4511_v9  ;;  %2204 = vmatpush.bf16.msrb.mxu3 %v4532_v0 }
 0x5a3   :  { %2166 = vmatpush.bf16.msra.mxu0 %v4294_v15  ;;  %2179 = vmatpush.bf16.msra.mxu1 %v4299_v17 }
 0x5a4   :  { %2192 = vmatpush.bf16.msrb.mxu2 %v4547_v51  ;;  %2205 = vmatpush.bf16.msrb.mxu3 %v4583_v39 }
 0x5a7   :  { %2167 = vmatpush.bf16.msra.mxu0 %v4324_v22  ;;  %2180 = vmatpush.bf16.msra.mxu1 %v4331_v37 }
 0x5a8   :  { %2193 = vmatpush.bf16.msrb.mxu2 %v4588_v11  ;;  %2206 = vmatpush.bf16.msrb.mxu3 %v4610_v7 }
 0x5ab   :  { %2168 = vmatpush.bf16.msra.mxu0 %v4348_v44  ;;  %2181 = vmatpush.bf16.msra.mxu1 %v4354_v43 }
 0x5ac   :  { %2194 = vmatpush.bf16.msrb.mxu2 %v4623_v6  ;;  %2207 = vmatpush.bf16.msrb.mxu3 %v4644_v23 }
 0x60a   :  { %v1916_v45 = vpop.f32.mrf.mxu0  ;;  %v1929_v1 = vpop.f32.mrf.mxu1 }
 0x60b   :  { %v1917_v47 = vadd.f32 %v1916_v45, %v853_v29  ;;  %v1930_v8 = vadd.f32 %v1929_v1, %v854_v62  ;;  %v805_v29 = vadd.f32 %v5721_v18, %v5720_v38 }
 0x60d   :  { %v3297_v21 = vmul.f32 -1.442695, %v1917_v47  ;;  %v3298_v41 = vmul.f32 -1.442695, %v1930_v8  ;;  %v856_v47 = vadd.f32 %v5675_v14, %v805_v29 }
 0x60f   :  { %3613 = vpow2.f32 %v3297_v21 }
 0x610   :  { %3615 = vpow2.f32 %v3298_v41 }
 0x611   :  { %v1942_v31 = vpop.f32.mrf.mxu2  ;;  %v1955_v49 = vpop.f32.mrf.mxu3 }
 0x612   :  { %v1943_v12 = vadd.f32 %v1942_v31, %v855_v34  ;;  %v1918_v26 = vpop.f32.mrf.mxu0  ;;  %v1931_v48 = vpop.f32.mrf.mxu1  ;;  %v1956_v50 = vadd.f32 %v1955_v49, %v856_v47 }
 0x614   :  { %v3299_v52 = vmul.f32 -1.442695, %v1943_v12 }
 0x615   :  { %v3614_v20 = vpop.eup %3613 }
 0x616   :  { %v3616_v2 = vpop.eup %3615  ;;  %v1968_v59 = vadd.f32 1.0, %v3614_v20  ;;  %3617 = vpow2.f32 %v3299_v52 }
 0x617   :  { %v1969_v4 = vadd.f32 1.0, %v3616_v2 }
 0x618   :  { %3619 = vrcp.f32 %v1968_v59  ;;  %v1982_v12 = vand.u32 2147483648, %v1968_v59  ;;  %v1980_v52 = vand.u32 2147483647, %v1968_v59  ;;  %vm1976_vm3 = vweird.f32 %v1968_v59 }
 0x619   :  { %3621 = vrcp.f32 %v1969_v4  ;;  %v1944_v62 = vpop.f32.mrf.mxu2  ;;  %v1957_v45 = vpop.f32.mrf.mxu3  ;;  %v1997_v26 = vand.u32 2147483648, %v1969_v4  ;;  %v1995_v2 = vand.u32 2147483647, %v1969_v4  ;;  %vm1991_vm11 = vweird.f32 %v1969_v4 }
 0x61a   :  { %v1983_v29 = vor.u32 1.1754944e-38, %v1982_v12  ;;  %vm1981_vm4 = vcmp.eq.f32.partialorder %v1980_v52, 8.507059e+37 }
 0x61b   :  { %v1998_v45 = vor.u32 1.1754944e-38, %v1997_v26  ;;  %vm1996_vm5 = vcmp.eq.f32.partialorder %v1995_v2, 8.507059e+37 }
 0x61c   :  { %v3618_v1 = vpop.eup %3617 }
 0x61d   :  { %v1970_v8 = vadd.f32 1.0, %v3618_v1 }
 0x61e   :  { %v3620_v19 = vpop.eup %3619 }
 0x61f   :  { %v3622_v40 = vpop.eup %3621  ;;  %v1972_v21 = vmul.f32 %v3620_v19, %v1968_v59  ;;  %3623 = vrcp.f32 %v1970_v8  ;;  %vm1977_vm9 = vweird.f32 %v3620_v19  ;;  %v2012_v12 = vand.u32 2147483648, %v1970_v8 }
 0x620   :  { %v1987_v41 = vmul.f32 %v3622_v40, %v1969_v4  ;;  %3625 = vtanh.f32 %v1956_v50  ;;  %vm1992_vm10 = vweird.f32 %v3622_v40  ;;  %vm1978_vm12 = vmor %vm1976_vm3, %vm1977_vm9  ;;  %v5722_v4 = vld [vmem:[#allocation25_spill] sm:$0xff]  ;;  %vm2006_vm9 = vweird.f32 %v1970_v8 }
 0x621   :  { %v1973_v34 = vsub.f32 1.0, %v1972_v21  ;;  %vm1993_vm1 = vmor %vm1991_vm11, %vm1992_vm10  ;;  %vm2023_vm6 = vcmp.ne.s32.totalorder %v5722_v4, 0  ;;  %v2013_v52 = vor.u32 1.1754944e-38, %v2012_v12 }
 0x622   :  { %v1988_v31 = vsub.f32 1.0, %v1987_v41 }
 0x623   :  { %v1974_v48 = vmul.f32 %v3620_v19, %v1973_v34 }
 0x624   :  { %v1989_v20 = vmul.f32 %v3622_v40, %v1988_v31 }
 0x625   :  { %v3624_v38 = vpop.eup %3623  ;;  %v1975_v18 = vadd.f32 %v3620_v19, %v1974_v48 }
 0x626   :  { %v2002_v49 = vmul.f32 %v3624_v38, %v1970_v8  ;;  %v1990_v62 = vadd.f32 %v3622_v40, %v1989_v20  ;;  %v3626_v47 = vpop.eup %3625  ;;  %vm2007_vm8 = vweird.f32 %v3624_v38 }
 0x627   :  { %v1979_v1 = vsel %vm1978_vm12, %v3620_v19, %v1975_v18  ;;  %vm2008_vm10 = vmor %vm2006_vm9, %vm2007_vm8 }
 0x628   :  { %v2003_v50 = vsub.f32 1.0, %v2002_v49  ;;  %v1984_v21 = vsel %vm1981_vm4, %v1983_v29, %v1979_v1  ;;  %v1994_v41 = vsel %vm1993_vm1, %v3622_v40, %v1990_v62  ;;  %v2010_v40 = vand.u32 2147483647, %v1970_v8  ;;  %v5727_v49 = vld [vmem:[#allocation69_spill] sm:$0xff] }
 0x629   :  { %v1999_v34 = vsel %vm1996_vm5, %v1998_v45, %v1994_v41  ;;  %v2018_v31 = vmul.f32 %v3626_v47, %v1984_v21  ;;  %v5728_v41 = vld [vmem:[#allocation66_spill] sm:$0xff] }
 0x62a   :  { %v2004_v57 = vmul.f32 %v3624_v38, %v2003_v50  ;;  %v2017_v48 = vmul.f32 %v1999_v34, %v5123_v5  ;;  %vm2011_vm3 = vcmp.eq.f32.partialorder %v2010_v40, 8.507059e+37  ;;  %v5729_v34 = vld [vmem:[#allocation98_spill] sm:$0xff] }
 0x62c   :  { %v2019_v59 = vadd.f32 %v2018_v31, %v2017_v48  ;;  %v2005_v63 = vadd.f32 %v3624_v38, %v2004_v57  ;;  %v768_v31 = vadd.f32 %v5729_v34, %v5728_v41 }
 0x62e   :  { %3627 = vtanh.f32 %v2019_v59  ;;  %v5184_v19 = vsel %vm2023_vm6, %v2019_v59, %v5123_v5  ;;  %v2009_v26 = vsel %vm2008_vm10, %v3624_v38, %v2005_v63  ;;  %v5724_v63 = vld [vmem:[#allocation30_spill] sm:$0xff]  ;;  %v5726_v38 = vld [vmem:[#allocation31_spill] sm:$0xff]  ;;  %v859_v12 = vadd.f32 %v4814_v35, %v768_v31 }
 0x62f   :  { %v2014_v2 = vsel %vm2011_vm3, %v2013_v52, %v2009_v26  ;;  %v729_v29 = vadd.f32 %v5727_v49, %v5726_v38  ;;  %v5730_v49 = vld [vmem:[#allocation67_spill] sm:$0xff] }
 0x631   :  { %v858_v45 = vadd.f32 %v4762_v58, %v729_v29  ;;  %v5731_v29 = vld [vmem:[#allocation99_spill] sm:$0xff] }
 0x634   :  { %v3628_v20 = vpop.eup %3627 }
 0x635   :  { %v5186_v18 = vmul.f32 %v3628_v20, %v2014_v2 }
 0x637   :  { %5723 = vst [vmem:[#allocation48_spill] sm:$0xff] %v5186_v18  ;;  %v5192_v57 = vsel %vm2023_vm6, %v5186_v18, %v5131_v53  ;;  %v5725_v53 = vld [vmem:[#allocation68_spill] sm:$0xff] }
 0x638   :  { %v2029_v5 = vpack.c.bf16 %v5192_v57, %v5192_v57  ;;  %v690_v8 = vadd.f32 %v5725_v53, %v5724_v63 }
 0x63a   :  { %2042 = vmatmul.bf16.vlgmr.msrb.gmra.mxu0 %v2029_v5  ;;  %2055 = vmatmul.bf16.vlgmr.msrb.gmra.mxu1 %v2029_v5  ;;  %v857_v62 = vadd.f32 %v4760_v61, %v690_v8 }
 0x63b   :  { %2068 = vmatmul.bf16.vlgmr.msra.gmra.mxu2 %v2029_v5  ;;  %2081 = vmatmul.bf16.vlgmr.msra.gmra.mxu3 %v2029_v5 }
 0x63c   :  { %2288 = vmatpush.bf16.msrb.mxu0 %v4188_v24  ;;  %2301 = vmatpush.bf16.msrb.mxu1 %v4193_v28 }
 0x63d   :  { %2314 = vmatpush.bf16.msra.mxu2 %v4329_v33  ;;  %2327 = vmatpush.bf16.msra.mxu3 %v4371_v54 }
 0x640   :  { %2289 = vmatpush.bf16.msrb.mxu0 %v4205_v30  ;;  %2302 = vmatpush.bf16.msrb.mxu1 %v4211_v32 }
 0x641   :  { %2315 = vmatpush.bf16.msra.mxu2 %v4382_v60  ;;  %2328 = vmatpush.bf16.msra.mxu3 %v4419_v13 }
 0x644   :  { %2290 = vmatpush.bf16.msrb.mxu0 %v4232_v36  ;;  %2303 = vmatpush.bf16.msrb.mxu1 %v4237_v46 }
 0x645   :  { %2316 = vmatpush.bf16.msra.mxu2 %v4424_v27  ;;  %2329 = vmatpush.bf16.msra.mxu3 %v4455_v42 }
 0x648   :  { %2291 = vmatpush.bf16.msrb.mxu0 %v4252_v55  ;;  %2304 = vmatpush.bf16.msrb.mxu1 %v4257_v56 }
 0x649   :  { %2317 = vmatpush.bf16.msra.mxu2 %v4470_v16  ;;  %2330 = vmatpush.bf16.msra.mxu3 %v4498_v25 }
 0x64c   :  { %2292 = vmatpush.bf16.msrb.mxu0 %v4276_v3  ;;  %2305 = vmatpush.bf16.msrb.mxu1 %v4281_v10 }
 0x64d   :  { %2318 = vmatpush.bf16.msra.mxu2 %v4511_v9  ;;  %2331 = vmatpush.bf16.msra.mxu3 %v4532_v0 }
 0x650   :  { %2293 = vmatpush.bf16.msrb.mxu0 %v4294_v15  ;;  %2306 = vmatpush.bf16.msrb.mxu1 %v4299_v17 }
 0x651   :  { %2319 = vmatpush.bf16.msra.mxu2 %v4547_v51  ;;  %2332 = vmatpush.bf16.msra.mxu3 %v4583_v39 }
 0x654   :  { %2294 = vmatpush.bf16.msrb.mxu0 %v4324_v22  ;;  %2307 = vmatpush.bf16.msrb.mxu1 %v4331_v37 }
 0x655   :  { %2320 = vmatpush.bf16.msra.mxu2 %v4588_v11  ;;  %2333 = vmatpush.bf16.msra.mxu3 %v4610_v7 }
 0x658   :  { %2295 = vmatpush.bf16.msrb.mxu0 %v4348_v44  ;;  %2308 = vmatpush.bf16.msrb.mxu1 %v4354_v43 }
 0x659   :  { %2321 = vmatpush.bf16.msra.mxu2 %v4623_v6  ;;  %2334 = vmatpush.bf16.msra.mxu3 %v4644_v23 }
 0x6b7   :  { %v2043_v1 = vpop.f32.mrf.mxu0  ;;  %v2056_v47 = vpop.f32.mrf.mxu1 }
 0x6b8   :  { %v2044_v50 = vadd.f32 %v2043_v1, %v857_v62  ;;  %v2057_v21 = vadd.f32 %v2056_v47, %v858_v45  ;;  %v807_v62 = vadd.f32 %v5731_v29, %v5730_v49 }
 0x6ba   :  { %v3300_v48 = vmul.f32 -1.442695, %v2044_v50  ;;  %v3301_v59 = vmul.f32 -1.442695, %v2057_v21  ;;  %v860_v50 = vadd.f32 %v5675_v14, %v807_v62 }
 0x6bc   :  { %3629 = vpow2.f32 %v3300_v48 }
 0x6bd   :  { %3631 = vpow2.f32 %v3301_v59 }
 0x6be   :  { %v2069_v40 = vpop.f32.mrf.mxu2  ;;  %v2082_v26 = vpop.f32.mrf.mxu3 }
 0x6bf   :  { %v2070_v52 = vadd.f32 %v2069_v40, %v859_v12  ;;  %v2045_v20 = vpop.f32.mrf.mxu0  ;;  %v2058_v2 = vpop.f32.mrf.mxu1  ;;  %v2083_v34 = vadd.f32 %v2082_v26, %v860_v50 }
 0x6c1   :  { %v3302_v5 = vmul.f32 -1.442695, %v2070_v52 }
 0x6c2   :  { %v3630_v63 = vpop.eup %3629 }
 0x6c3   :  { %v3632_v53 = vpop.eup %3631  ;;  %v2095_v8 = vadd.f32 1.0, %v3630_v63  ;;  %3633 = vpow2.f32 %v3302_v5 }
 0x6c4   :  { %v2096_v38 = vadd.f32 1.0, %v3632_v53 }
 0x6c5   :  { %3635 = vrcp.f32 %v2095_v8  ;;  %v2109_v52 = vand.u32 2147483648, %v2095_v8  ;;  %v2107_v5 = vand.u32 2147483647, %v2095_v8  ;;  %vm2103_vm1 = vweird.f32 %v2095_v8 }
 0x6c6   :  { %3637 = vrcp.f32 %v2096_v38  ;;  %v2071_v45 = vpop.f32.mrf.mxu2  ;;  %v2084_v1 = vpop.f32.mrf.mxu3  ;;  %v2124_v20 = vand.u32 2147483648, %v2096_v38  ;;  %v2122_v53 = vand.u32 2147483647, %v2096_v38  ;;  %vm2118_vm4 = vweird.f32 %v2096_v38 }
 0x6c7   :  { %v2110_v62 = vor.u32 1.1754944e-38, %v2109_v52  ;;  %vm2108_vm9 = vcmp.eq.f32.partialorder %v2107_v5, 8.507059e+37 }
 0x6c8   :  { %v2125_v1 = vor.u32 1.1754944e-38, %v2124_v20  ;;  %vm2123_vm10 = vcmp.eq.f32.partialorder %v2122_v53, 8.507059e+37 }
 0x6c9   :  { %v3634_v47 = vpop.eup %3633 }
 0x6ca   :  { %v2097_v21 = vadd.f32 1.0, %v3634_v47 }
 0x6cb   :  { %v3636_v41 = vpop.eup %3635 }
 0x6cc   :  { %v3638_v31 = vpop.eup %3637  ;;  %v2099_v48 = vmul.f32 %v3636_v41, %v2095_v8  ;;  %3639 = vrcp.f32 %v2097_v21  ;;  %vm2104_vm11 = vweird.f32 %v3636_v41  ;;  %v2139_v52 = vand.u32 2147483648, %v2097_v21 }
 0x6cd   :  { %v2114_v59 = vmul.f32 %v3638_v31, %v2096_v38  ;;  %3641 = vtanh.f32 %v2083_v34  ;;  %vm2119_vm12 = vweird.f32 %v3638_v31  ;;  %vm2105_vm5 = vmor %vm2103_vm1, %vm2104_vm11  ;;  %v5732_v38 = vld [vmem:[#allocation24_spill] sm:$0xff] }
 0x6ce   :  { %v2100_v12 = vsub.f32 1.0, %v2099_v48  ;;  %vm2120_vm8 = vmor %vm2118_vm4, %vm2119_vm12  ;;  %vm5570_vm3 = vcmp.ne.s32.totalorder %v5732_v38, 0  ;;  %vm2133_vm12 = vweird.f32 %v2097_v21  ;;  %v2140_v5 = vor.u32 1.1754944e-38, %v2139_v52 }
 0x6cf   :  { %v2115_v40 = vsub.f32 1.0, %v2114_v59 }
 0x6d0   :  { %v2101_v2 = vmul.f32 %v3636_v41, %v2100_v12 }
 0x6d1   :  { %v2116_v63 = vmul.f32 %v3638_v31, %v2115_v40 }
 0x6d2   :  { %v3640_v49 = vpop.eup %3639  ;;  %v2102_v29 = vadd.f32 %v3636_v41, %v2101_v2 }
 0x6d3   :  { %v2129_v26 = vmul.f32 %v3640_v49, %v2097_v21  ;;  %v2117_v45 = vadd.f32 %v3638_v31, %v2116_v63  ;;  %v3642_v50 = vpop.eup %3641  ;;  %vm2134_vm11 = vweird.f32 %v3640_v49 }
 0x6d4   :  { %v2106_v47 = vsel %vm2105_vm5, %v3636_v41, %v2102_v29  ;;  %vm2135_vm1 = vmor %vm2133_vm12, %vm2134_vm11 }
 0x6d5   :  { %v2130_v34 = vsub.f32 1.0, %v2129_v26  ;;  %v2111_v48 = vsel %vm2108_vm9, %v2110_v62, %v2106_v47  ;;  %v2121_v59 = vsel %vm2120_vm8, %v3638_v31, %v2117_v45  ;;  %v2137_v31 = vand.u32 2147483647, %v2097_v21  ;;  %v5737_v26 = vld [vmem:[#allocation73_spill] sm:$0xff] }
 0x6d6   :  { %v2126_v12 = vsel %vm2123_vm10, %v2125_v1, %v2121_v59  ;;  %v2145_v40 = vmul.f32 %v3642_v50, %v2111_v48  ;;  %v5738_v59 = vld [vmem:[#allocation70_spill] sm:$0xff] }
 0x6d7   :  { %v2131_v4 = vmul.f32 %v3640_v49, %v2130_v34  ;;  %v2144_v2 = vmul.f32 %v2126_v12, %v5184_v19  ;;  %vm2138_vm4 = vcmp.eq.f32.partialorder %v2137_v31, 8.507059e+37  ;;  %v5739_v12 = vld [vmem:[#allocation100_spill] sm:$0xff] }
 0x6d9   :  { %v2146_v8 = vadd.f32 %v2145_v40, %v2144_v2  ;;  %v2132_v18 = vadd.f32 %v3640_v49, %v2131_v4  ;;  %v771_v40 = vadd.f32 %v5739_v12, %v5738_v59 }
 0x6db   :  { %3643 = vtanh.f32 %v2146_v8  ;;  %v5245_v41 = vsel %vm5570_vm3, %v2146_v8, %v5184_v19  ;;  %v2136_v20 = vsel %vm2135_vm1, %v3640_v49, %v2132_v18  ;;  %v5734_v18 = vld [vmem:[#allocation32_spill] sm:$0xff]  ;;  %v5736_v49 = vld [vmem:[#allocation33_spill] sm:$0xff]  ;;  %v863_v52 = vadd.f32 %v4814_v35, %v771_v40 }
 0x6dc   :  { %v2141_v53 = vsel %vm2138_vm4, %v2140_v5, %v2136_v20  ;;  %v732_v62 = vadd.f32 %v5737_v26, %v5736_v49  ;;  %v5740_v26 = vld [vmem:[#allocation71_spill] sm:$0xff] }
 0x6de   :  { %v862_v1 = vadd.f32 %v4762_v58, %v732_v62  ;;  %v5741_v62 = vld [vmem:[#allocation101_spill] sm:$0xff] }
 0x6e1   :  { %v3644_v63 = vpop.eup %3643 }
 0x6e2   :  { %v5247_v29 = vmul.f32 %v3644_v63, %v2141_v53 }
 0x6e4   :  { %5733 = vst [vmem:[#allocation49_spill] sm:$0xff] %v5247_v29  ;;  %v5253_v4 = vsel %vm5570_vm3, %v5247_v29, %v5192_v57  ;;  %v5735_v57 = vld [vmem:[#allocation72_spill] sm:$0xff] }
 0x6e5   :  { %v2156_v19 = vpack.c.bf16 %v5253_v4, %v5253_v4  ;;  %v693_v21 = vadd.f32 %v5735_v57, %v5734_v18 }
 0x6e7   :  { %2169 = vmatmul.bf16.vlgmr.msra.gmra.mxu0 %v2156_v19  ;;  %2182 = vmatmul.bf16.vlgmr.msra.gmra.mxu1 %v2156_v19  ;;  %v861_v45 = vadd.f32 %v4760_v61, %v693_v21 }
 0x6e8   :  { %2195 = vmatmul.bf16.vlgmr.msrb.gmra.mxu2 %v2156_v19  ;;  %2208 = vmatmul.bf16.vlgmr.msrb.gmra.mxu3 %v2156_v19 }
 0x6e9   :  { %2415 = vmatpush.bf16.msra.mxu0 %v4188_v24  ;;  %2428 = vmatpush.bf16.msra.mxu1 %v4193_v28 }
 0x6ea   :  { %2441 = vmatpush.bf16.msrb.mxu2 %v4329_v33  ;;  %2454 = vmatpush.bf16.msrb.mxu3 %v4371_v54 }
 0x6ed   :  { %2416 = vmatpush.bf16.msra.mxu0 %v4205_v30  ;;  %2429 = vmatpush.bf16.msra.mxu1 %v4211_v32 }
 0x6ee   :  { %2442 = vmatpush.bf16.msrb.mxu2 %v4382_v60  ;;  %2455 = vmatpush.bf16.msrb.mxu3 %v4419_v13 }
 0x6f1   :  { %2417 = vmatpush.bf16.msra.mxu0 %v4232_v36  ;;  %2430 = vmatpush.bf16.msra.mxu1 %v4237_v46 }
 0x6f2   :  { %2443 = vmatpush.bf16.msrb.mxu2 %v4424_v27  ;;  %2456 = vmatpush.bf16.msrb.mxu3 %v4455_v42 }
 0x6f5   :  { %2418 = vmatpush.bf16.msra.mxu0 %v4252_v55  ;;  %2431 = vmatpush.bf16.msra.mxu1 %v4257_v56 }
 0x6f6   :  { %2444 = vmatpush.bf16.msrb.mxu2 %v4470_v16  ;;  %2457 = vmatpush.bf16.msrb.mxu3 %v4498_v25 }
 0x6f9   :  { %2419 = vmatpush.bf16.msra.mxu0 %v4276_v3  ;;  %2432 = vmatpush.bf16.msra.mxu1 %v4281_v10 }
 0x6fa   :  { %2445 = vmatpush.bf16.msrb.mxu2 %v4511_v9  ;;  %2458 = vmatpush.bf16.msrb.mxu3 %v4532_v0 }
 0x6fd   :  { %2420 = vmatpush.bf16.msra.mxu0 %v4294_v15  ;;  %2433 = vmatpush.bf16.msra.mxu1 %v4299_v17 }
 0x6fe   :  { %2446 = vmatpush.bf16.msrb.mxu2 %v4547_v51  ;;  %2459 = vmatpush.bf16.msrb.mxu3 %v4583_v39 }
 0x701   :  { %2421 = vmatpush.bf16.msra.mxu0 %v4324_v22  ;;  %2434 = vmatpush.bf16.msra.mxu1 %v4331_v37 }
 0x702   :  { %2447 = vmatpush.bf16.msrb.mxu2 %v4588_v11  ;;  %2460 = vmatpush.bf16.msrb.mxu3 %v4610_v7 }
 0x705   :  { %2422 = vmatpush.bf16.msra.mxu0 %v4348_v44  ;;  %2435 = vmatpush.bf16.msra.mxu1 %v4354_v43 }
 0x706   :  { %2448 = vmatpush.bf16.msrb.mxu2 %v4623_v6  ;;  %2461 = vmatpush.bf16.msrb.mxu3 %v4644_v23 }
 0x764   :  { %v2170_v47 = vpop.f32.mrf.mxu0  ;;  %v2183_v50 = vpop.f32.mrf.mxu1 }
 0x765   :  { %v2171_v34 = vadd.f32 %v2170_v47, %v861_v45  ;;  %v2184_v48 = vadd.f32 %v2183_v50, %v862_v1  ;;  %v810_v45 = vadd.f32 %v5741_v62, %v5740_v26 }
 0x767   :  { %v3303_v2 = vmul.f32 -1.442695, %v2171_v34  ;;  %v3304_v8 = vmul.f32 -1.442695, %v2184_v48  ;;  %v864_v34 = vadd.f32 %v5675_v14, %v810_v45 }
 0x769   :  { %3645 = vpow2.f32 %v3303_v2 }
 0x76a   :  { %3647 = vpow2.f32 %v3304_v8 }
 0x76b   :  { %v2196_v31 = vpop.f32.mrf.mxu2  ;;  %v2209_v20 = vpop.f32.mrf.mxu3 }
 0x76c   :  { %v2197_v5 = vadd.f32 %v2196_v31, %v863_v52  ;;  %v2172_v63 = vpop.f32.mrf.mxu0  ;;  %v2185_v53 = vpop.f32.mrf.mxu1  ;;  %v2210_v12 = vadd.f32 %v2209_v20, %v864_v34 }
 0x76e   :  { %v3305_v19 = vmul.f32 -1.442695, %v2197_v5 }
 0x76f   :  { %v3646_v18 = vpop.eup %3645 }
 0x770   :  { %v3648_v57 = vpop.eup %3647  ;;  %v2222_v21 = vadd.f32 1.0, %v3646_v18  ;;  %3649 = vpow2.f32 %v3305_v19 }
 0x771   :  { %v2223_v49 = vadd.f32 1.0, %v3648_v57 }
 0x772   :  { %3651 = vrcp.f32 %v2222_v21  ;;  %v2236_v5 = vand.u32 2147483648, %v2222_v21  ;;  %v2234_v19 = vand.u32 2147483647, %v2222_v21  ;;  %vm2230_vm9 = vweird.f32 %v2222_v21 }
 0x773   :  { %3653 = vrcp.f32 %v2223_v49  ;;  %v2198_v1 = vpop.f32.mrf.mxu2  ;;  %v2211_v47 = vpop.f32.mrf.mxu3  ;;  %v2251_v63 = vand.u32 2147483648, %v2223_v49  ;;  %v2249_v57 = vand.u32 2147483647, %v2223_v49  ;;  %vm2245_vm10 = vweird.f32 %v2223_v49 }
 0x774   :  { %v2237_v45 = vor.u32 1.1754944e-38, %v2236_v5  ;;  %vm2235_vm1 = vcmp.eq.f32.partialorder %v2234_v19, 8.507059e+37 }
 0x775   :  { %v2252_v47 = vor.u32 1.1754944e-38, %v2251_v63  ;;  %vm2250_vm4 = vcmp.eq.f32.partialorder %v2249_v57, 8.507059e+37 }
 0x776   :  { %v3650_v50 = vpop.eup %3649 }
 0x777   :  { %v2224_v48 = vadd.f32 1.0, %v3650_v50 }
 0x778   :  { %v3652_v59 = vpop.eup %3651 }
 0x779   :  { %v3654_v40 = vpop.eup %3653  ;;  %v2226_v2 = vmul.f32 %v3652_v59, %v2222_v21  ;;  %3655 = vrcp.f32 %v2224_v48  ;;  %vm2231_vm5 = vweird.f32 %v3652_v59  ;;  %v2266_v5 = vand.u32 2147483648, %v2224_v48 }
 0x77a   :  { %v2241_v8 = vmul.f32 %v3654_v40, %v2223_v49  ;;  %3657 = vtanh.f32 %v2210_v12  ;;  %vm2246_vm8 = vweird.f32 %v3654_v40  ;;  %vm2232_vm11 = vmor %vm2230_vm9, %vm2231_vm5  ;;  %v5742_v49 = vld [vmem:[#allocation18_spill] sm:$0xff] }
 0x77b   :  { %v2227_v52 = vsub.f32 1.0, %v2226_v2  ;;  %vm2247_vm12 = vmor %vm2245_vm10, %vm2246_vm8  ;;  %vm5573_vm3 = vcmp.ne.s32.totalorder %v5742_v49, 0  ;;  %vm2260_vm8 = vweird.f32 %v2224_v48  ;;  %v2267_v19 = vor.u32 1.1754944e-38, %v2266_v5 }
 0x77c   :  { %v2242_v31 = vsub.f32 1.0, %v2241_v8 }
 0x77d   :  { %v2228_v53 = vmul.f32 %v3652_v59, %v2227_v52 }
 0x77e   :  { %v2243_v18 = vmul.f32 %v3654_v40, %v2242_v31 }
 0x77f   :  { %v3656_v26 = vpop.eup %3655  ;;  %v2229_v62 = vadd.f32 %v3652_v59, %v2228_v53 }
 0x780   :  { %v2256_v20 = vmul.f32 %v3656_v26, %v2224_v48  ;;  %v2244_v1 = vadd.f32 %v3654_v40, %v2243_v18  ;;  %v3658_v34 = vpop.eup %3657  ;;  %vm2261_vm5 = vweird.f32 %v3656_v26 }
 0x781   :  { %v2233_v50 = vsel %vm2232_vm11, %v3652_v59, %v2229_v62  ;;  %vm2262_vm9 = vmor %vm2260_vm8, %vm2261_vm5 }
 0x782   :  { %v2257_v12 = vsub.f32 1.0, %v2256_v20  ;;  %v2238_v2 = vsel %vm2235_vm1, %v2237_v45, %v2233_v50  ;;  %v2248_v8 = vsel %vm2247_vm12, %v3654_v40, %v2244_v1  ;;  %v2264_v40 = vand.u32 2147483647, %v2224_v48 }
 0x783   :  { %v2253_v52 = vsel %vm2250_vm4, %v2252_v47, %v2248_v8  ;;  %v2272_v31 = vmul.f32 %v3658_v34, %v2238_v2 }
 0x784   :  { %v2258_v38 = vmul.f32 %v3656_v26, %v2257_v12  ;;  %v2271_v53 = vmul.f32 %v2253_v52, %v5245_v41  ;;  %vm2265_vm10 = vcmp.eq.f32.partialorder %v2264_v40, 8.507059e+37 }
 0x786   :  { %v2273_v21 = vadd.f32 %v2272_v31, %v2271_v53  ;;  %v2259_v29 = vadd.f32 %v3656_v26, %v2258_v38 }
 0x788   :  { %3659 = vtanh.f32 %v2273_v21  ;;  %v5306_v59 = vsel %vm5573_vm3, %v2273_v21, %v5245_v41  ;;  %v2263_v63 = vsel %vm2262_vm9, %v3656_v26, %v2259_v29 }
 0x789   :  { %v2268_v57 = vsel %vm2265_vm10, %v2267_v19, %v2263_v63 }
 0x78e   :  { %v3660_v18 = vpop.eup %3659 }
 0x78f   :  { %v5308_v62 = vmul.f32 %v3660_v18, %v2268_v57 }
 0x791   :  { %v5314_v38 = vsel %vm5573_vm3, %v5308_v62, %v5253_v4 }
 0x792   :  { %v2283_v41 = vpack.c.bf16 %v5314_v38, %v5314_v38 }
 0x794   :  { %2296 = vmatmul.bf16.vlgmr.msrb.gmra.mxu0 %v2283_v41  ;;  %2309 = vmatmul.bf16.vlgmr.msrb.gmra.mxu1 %v2283_v41 }
 0x795   :  { %2322 = vmatmul.bf16.vlgmr.msra.gmra.mxu2 %v2283_v41  ;;  %2335 = vmatmul.bf16.vlgmr.msra.gmra.mxu3 %v2283_v41 }
 0x796   :  { %2555 = vmatpush.bf16.msrb.mxu1 %v4193_v28  ;;  %2542 = vmatpush.bf16.msrb.mxu0 %v4188_v24  ;;  %v5744_v24 = vld [vmem:[#allocation76_spill] sm:$0xff] }
 0x797   :  { %2568 = vmatpush.bf16.msra.mxu2 %v4329_v33  ;;  %2581 = vmatpush.bf16.msra.mxu3 %v4371_v54 }
 0x79a   :  { %2556 = vmatpush.bf16.msrb.mxu1 %v4211_v32  ;;  %2543 = vmatpush.bf16.msrb.mxu0 %v4205_v30  ;;  %v5745_v30 = vld [vmem:[#allocation35_spill] sm:$0xff]  ;;  %v5746_v32 = vld [vmem:[#allocation77_spill] sm:$0xff] }
 0x79b   :  { %2569 = vmatpush.bf16.msra.mxu2 %v4382_v60  ;;  %2582 = vmatpush.bf16.msra.mxu3 %v4419_v13 }
 0x79e   :  { %2557 = vmatpush.bf16.msrb.mxu1 %v4237_v46  ;;  %2544 = vmatpush.bf16.msrb.mxu0 %v4232_v36  ;;  %v734_v36 = vadd.f32 %v5746_v32, %v5745_v30 }
 0x79f   :  { %2570 = vmatpush.bf16.msra.mxu2 %v4424_v27  ;;  %2583 = vmatpush.bf16.msra.mxu3 %v4455_v42 }
 0x7a2   :  { %2558 = vmatpush.bf16.msrb.mxu1 %v4257_v56  ;;  %2545 = vmatpush.bf16.msrb.mxu0 %v4252_v55  ;;  %v866_v55 = vadd.f32 %v4762_v58, %v734_v36 }
 0x7a3   :  { %2571 = vmatpush.bf16.msra.mxu2 %v4470_v16  ;;  %2584 = vmatpush.bf16.msra.mxu3 %v4498_v25 }
 0x7a6   :  { %2559 = vmatpush.bf16.msrb.mxu1 %v4281_v10  ;;  %2546 = vmatpush.bf16.msrb.mxu0 %v4276_v3 }
 0x7a7   :  { %2572 = vmatpush.bf16.msra.mxu2 %v4511_v9  ;;  %2585 = vmatpush.bf16.msra.mxu3 %v4532_v0  ;;  %v5743_v0 = vld [vmem:[#allocation34_spill] sm:$0xff] }
 0x7a8   :  { %v695_v28 = vadd.f32 %v5744_v24, %v5743_v0 }
 0x7aa   :  { %2560 = vmatpush.bf16.msrb.mxu1 %v4299_v17  ;;  %2547 = vmatpush.bf16.msrb.mxu0 %v4294_v15  ;;  %v865_v46 = vadd.f32 %v4760_v61, %v695_v28  ;;  %v5747_v17 = vld [vmem:[#allocation74_spill] sm:$0xff] }
 0x7ab   :  { %2573 = vmatpush.bf16.msra.mxu2 %v4547_v51  ;;  %2586 = vmatpush.bf16.msra.mxu3 %v4583_v39  ;;  %v5749_v51 = vld [vmem:[#allocation75_spill] sm:$0xff] }
 0x7ae   :  { %2561 = vmatpush.bf16.msrb.mxu1 %v4331_v37  ;;  %2548 = vmatpush.bf16.msrb.mxu0 %v4324_v22  ;;  %v5748_v22 = vld [vmem:[#allocation102_spill] sm:$0xff] }
 0x7af   :  { %2574 = vmatpush.bf16.msra.mxu2 %v4588_v11  ;;  %2587 = vmatpush.bf16.msra.mxu3 %v4610_v7  ;;  %v773_v33 = vadd.f32 %v5748_v22, %v5747_v17  ;;  %v5750_v11 = vld [vmem:[#allocation103_spill] sm:$0xff] }
 0x7b0   :  { %v812_v7 = vadd.f32 %v5750_v11, %v5749_v51  ;;  %v3450_v11 = vld [vmem:[#allocation10 + $0x38] sm:$0xff] }
 0x7b2   :  { %2562 = vmatpush.bf16.msrb.mxu1 %v4354_v43  ;;  %2549 = vmatpush.bf16.msrb.mxu0 %v4348_v44  ;;  %v867_v43 = vadd.f32 %v4814_v35, %v773_v33  ;;  %v868_v48 = vadd.f32 %v5675_v14, %v812_v7 }
 0x7b3   :  { %2575 = vmatpush.bf16.msra.mxu2 %v4623_v6  ;;  %2588 = vmatpush.bf16.msra.mxu3 %v4644_v23 }
 0x811   :  { %v2297_v56 = vpop.f32.mrf.mxu0  ;;  %v2310_v3 = vpop.f32.mrf.mxu1 }
 0x812   :  { %v2298_v10 = vadd.f32 %v2297_v56, %v865_v46  ;;  %v2311_v15 = vadd.f32 %v2310_v3, %v866_v55  ;;  %v5751_v3 = vld [vmem:[#allocation27_spill] sm:$0xff] }
 0x813   :  { %vm2404_vm3 = vcmp.ne.s32.totalorder %v5751_v3, 0 }
 0x814   :  { %v3306_v37 = vmul.f32 -1.442695, %v2298_v10  ;;  %v3307_v44 = vmul.f32 -1.442695, %v2311_v15 }
 0x816   :  { %3661 = vpow2.f32 %v3306_v37 }
 0x817   :  { %3663 = vpow2.f32 %v3307_v44 }
 0x818   :  { %v2323_v54 = vpop.f32.mrf.mxu2  ;;  %v2336_v60 = vpop.f32.mrf.mxu3 }
 0x819   :  { %v2324_v6 = vadd.f32 %v2323_v54, %v867_v43  ;;  %v2299_v13 = vpop.f32.mrf.mxu0  ;;  %v2312_v27 = vpop.f32.mrf.mxu1  ;;  %v2337_v45 = vadd.f32 %v2336_v60, %v868_v48 }
 0x81a   :  { %v5753_v13 = vld [vmem:[#allocation80_spill] sm:$0xff] }
 0x81b   :  { %v3308_v42 = vmul.f32 -1.442695, %v2324_v6  ;;  %v5752_v6 = vld [vmem:[#allocation38_spill] sm:$0xff] }
 0x81c   :  { %v3662_v39 = vpop.eup %3661  ;;  %v698_v27 = vadd.f32 %v5753_v13, %v5752_v6 }
 0x81d   :  { %v3664_v16 = vpop.eup %3663  ;;  %v2349_v25 = vadd.f32 1.0, %v3662_v39  ;;  %3665 = vpow2.f32 %v3308_v42  ;;  %v5754_v42 = vld [vmem:[#allocation39_spill] sm:$0xff]  ;;  %v5755_v39 = vld [vmem:[#allocation81_spill] sm:$0xff] }
 0x81e   :  { %v2350_v9 = vadd.f32 1.0, %v3664_v16  ;;  %v737_v16 = vadd.f32 %v5755_v39, %v5754_v42 }
 0x81f   :  { %3667 = vrcp.f32 %v2349_v25  ;;  %v2363_v2 = vand.u32 2147483648, %v2349_v25  ;;  %v2361_v31 = vand.u32 2147483647, %v2349_v25  ;;  %vm2357_vm1 = vweird.f32 %v2349_v25 }
 0x820   :  { %3669 = vrcp.f32 %v2350_v9  ;;  %v2325_v23 = vpop.f32.mrf.mxu2  ;;  %v2338_v29 = vpop.f32.mrf.mxu3  ;;  %v2378_v8 = vand.u32 2147483648, %v2350_v9  ;;  %v2376_v21 = vand.u32 2147483647, %v2350_v9  ;;  %vm2372_vm4 = vweird.f32 %v2350_v9 }
 0x821   :  { %v2364_v19 = vor.u32 1.1754944e-38, %v2363_v2  ;;  %vm2362_vm9 = vcmp.eq.f32.partialorder %v2361_v31, 8.507059e+37  ;;  %v5756_v29 = vld [vmem:[#allocation78_spill] sm:$0xff]  ;;  %v3447_v31 = vld [vmem:[#allocation10 + $0x20] sm:$0xff] }
 0x822   :  { %v2379_v57 = vor.u32 1.1754944e-38, %v2378_v8  ;;  %vm2377_vm10 = vcmp.eq.f32.partialorder %v2376_v21, 8.507059e+37 }
 0x823   :  { %v3666_v4 = vpop.eup %3665 }
 0x824   :  { %v2351_v26 = vadd.f32 1.0, %v3666_v4  ;;  %v5757_v4 = vld [vmem:[#allocation104_spill] sm:$0xff] }
 0x825   :  { %v3668_v20 = vpop.eup %3667  ;;  %v776_v48 = vadd.f32 %v5757_v4, %v5756_v29 }
 0x826   :  { %v3670_v1 = vpop.eup %3669  ;;  %v2353_v47 = vmul.f32 %v3668_v20, %v2349_v25  ;;  %3671 = vrcp.f32 %v2351_v26  ;;  %vm2358_vm11 = vweird.f32 %v3668_v20  ;;  %v2393_v15 = vand.u32 2147483648, %v2351_v26 }
 0x827   :  { %v2368_v50 = vmul.f32 %v3670_v1, %v2350_v9  ;;  %3673 = vtanh.f32 %v2337_v45  ;;  %vm2373_vm12 = vweird.f32 %v3670_v1  ;;  %vm2359_vm5 = vmor %vm2357_vm1, %vm2358_vm11  ;;  %v2391_v22 = vand.u32 2147483647, %v2351_v26  ;;  %v3449_v45 = vld [vmem:[#allocation10 + $0x30] sm:$0xff] }
 0x828   :  { %v2354_v34 = vsub.f32 1.0, %v2353_v47  ;;  %vm2374_vm8 = vmor %vm2372_vm4, %vm2373_vm12  ;;  %vm2387_vm12 = vweird.f32 %v2351_v26  ;;  %v2394_v37 = vor.u32 1.1754944e-38, %v2393_v15  ;;  %v869_v25 = vadd.f32 %v4760_v61, %v698_v27  ;;  %v3448_v47 = vld [vmem:[#allocation10 + $0x28] sm:$0xff]  ;;  %v3443_v27 = vld [vmem:[#allocation10] sm:$0xff] }
 0x829   :  { %v2369_v12 = vsub.f32 1.0, %v2368_v50  ;;  %vm2392_vm4 = vcmp.eq.f32.partialorder %v2391_v22, 8.507059e+37  ;;  %v870_v9 = vadd.f32 %v4762_v58, %v737_v16  ;;  %v3444_v15 = vld [vmem:[#allocation10 + $0x8] sm:$0xff] }
 0x82a   :  { %v2355_v52 = vmul.f32 %v3668_v20, %v2354_v34 }
 0x82b   :  { %v2370_v53 = vmul.f32 %v3670_v1, %v2369_v12 }
 0x82c   :  { %v3672_v5 = vpop.eup %3671  ;;  %v2356_v40 = vadd.f32 %v3668_v20, %v2355_v52 }
 0x82d   :  { %v2383_v63 = vmul.f32 %v3672_v5, %v2351_v26  ;;  %v2371_v18 = vadd.f32 %v3670_v1, %v2370_v53  ;;  %v3674_v0 = vpop.eup %3673  ;;  %vm2388_vm11 = vweird.f32 %v3672_v5 }
 0x82e   :  { %v2360_v41 = vsel %vm2359_vm5, %v3668_v20, %v2356_v40  ;;  %vm2389_vm1 = vmor %vm2387_vm12, %vm2388_vm11 }
 0x82f   :  { %v2384_v24 = vsub.f32 1.0, %v2383_v63  ;;  %v2365_v28 = vsel %vm2362_vm9, %v2364_v19, %v2360_v41  ;;  %v2375_v30 = vsel %vm2374_vm8, %v3670_v1, %v2371_v18  ;;  %v871_v1 = vadd.f32 %v4814_v35, %v776_v48  ;;  %v5758_v63 = vld [vmem:[#allocation79_spill] sm:$0xff]  ;;  %v5759_v19 = vld [vmem:[#allocation105_spill] sm:$0xff] }
 0x830   :  { %v2380_v32 = vsel %vm2377_vm10, %v2379_v57, %v2375_v30  ;;  %v2399_v36 = vmul.f32 %v3674_v0, %v2365_v28  ;;  %v815_v18 = vadd.f32 %v5759_v19, %v5758_v63  ;;  %v3446_v0 = vld [vmem:[#allocation10 + $0x18] sm:$0xff]  ;;  %v3445_v30 = vld [vmem:[#allocation10 + $0x10] sm:$0xff]  ;;  %v5763_v19 = vld [vmem:[#allocation21_spill] sm:$0xff] }
 0x831   :  { %v2385_v46 = vmul.f32 %v3672_v5, %v2384_v24  ;;  %v2398_v55 = vmul.f32 %v2380_v32, %v5306_v59 }
 0x832   :  { %v872_v28 = vadd.f32 %v5675_v14, %v815_v18  ;;  %v5764_v18 = vld [vmem:[#allocation20_spill] sm:$0xff] }
 0x833   :  { %v2400_v56 = vadd.f32 %v2399_v36, %v2398_v55  ;;  %v2386_v10 = vadd.f32 %v3672_v5, %v2385_v46 }
 0x835   :  { %3675 = vtanh.f32 %v2400_v56  ;;  %v5367_v17 = vsel %vm2404_vm3, %v2400_v56, %v5306_v59  ;;  %v2390_v33 = vsel %vm2389_vm1, %v3672_v5, %v2386_v10 }
 0x836   :  { %v2395_v43 = vsel %vm2392_vm4, %v2394_v37, %v2390_v33 }
 0x83b   :  { %v3676_v44 = vpop.eup %3675 }
 0x83c   :  { %v5369_v54 = vmul.f32 %v3676_v44, %v2395_v43 }
 0x83e   :  { %v5375_v60 = vsel %vm2404_vm3, %v5369_v54, %v5314_v38 }
 0x83f   :  { %v2410_v59 = vpack.c.bf16 %v5375_v60, %v5375_v60 }
 0x841   :  { %2423 = vmatmul.bf16.vlgmr.msra.gmra.mxu0 %v2410_v59  ;;  %2436 = vmatmul.bf16.vlgmr.msra.gmra.mxu1 %v2410_v59 }
 0x842   :  { %2449 = vmatmul.bf16.vlgmr.msrb.gmra.mxu2 %v2410_v59  ;;  %2462 = vmatmul.bf16.vlgmr.msrb.gmra.mxu3 %v2410_v59 }
 0x843   :  { %2865 = vmatpush.bf16.msra.mxu1 %v3450_v11 }
 0x847   :  { %2866 = vmatpush.bf16.msra.mxu1 %v3449_v45 }
 0x84b   :  { %2867 = vmatpush.bf16.msra.mxu1 %v3448_v47 }
 0x84f   :  { %2868 = vmatpush.bf16.msra.mxu1 %v3447_v31 }
 0x853   :  { %2869 = vmatpush.bf16.msra.mxu1 %v3446_v0 }
 0x857   :  { %2870 = vmatpush.bf16.msra.mxu1 %v3445_v30  ;;  %v5770_v30 = vld [vmem:[#allocation108_spill] sm:$0xff] }
 0x85b   :  { %2871 = vmatpush.bf16.msra.mxu1 %v3444_v15 }
 0x85f   :  { %2872 = vmatpush.bf16.msra.mxu1 %v3443_v27  ;;  %v5781_v27 = vld [vmem:[#allocation41_spill] sm:$0xff] }
 0x8be   :  { %v2424_v51 = vpop.f32.mrf.mxu0  ;;  %v2437_v38 = vpop.f32.mrf.mxu1 }
 0x8bf   :  { %v2425_v7 = vadd.f32 %v2424_v51, %v869_v25  ;;  %v2438_v23 = vadd.f32 %v2437_v38, %v870_v9 }
 0x8c1   :  { %v3309_v26 = vmul.f32 -1.442695, %v2425_v7  ;;  %v3310_v20 = vmul.f32 -1.442695, %v2438_v23 }
 0x8c3   :  { %3677 = vpow2.f32 %v3309_v26 }
 0x8c4   :  { %3679 = vpow2.f32 %v3310_v20 }
 0x8c5   :  { %v2450_v50 = vpop.f32.mrf.mxu2  ;;  %v2463_v34 = vpop.f32.mrf.mxu3 }
 0x8c6   :  { %v2451_v12 = vadd.f32 %v2450_v50, %v871_v1  ;;  %v2426_v2 = vpop.f32.mrf.mxu0  ;;  %v2439_v8 = vpop.f32.mrf.mxu1  ;;  %v2464_v46 = vadd.f32 %v2463_v34, %v872_v28  ;;  %v5760_v1 = vld [vmem:[#allocation26_spill] sm:$0xff]  ;;  %v5769_v28 = vld [vmem:[#allocation87_spill] sm:$0xff] }
 0x8c8   :  { %v3311_v52 = vmul.f32 -1.442695, %v2451_v12 }
 0x8c9   :  { %v3678_v53 = vpop.eup %3677 }
 0x8ca   :  { %v3680_v21 = vpop.eup %3679  ;;  %v2476_v5 = vadd.f32 1.0, %v3678_v53  ;;  %3681 = vpow2.f32 %v3311_v52 }
 0x8cb   :  { %v2477_v40 = vadd.f32 1.0, %v3680_v21 }
 0x8cc   :  { %3683 = vrcp.f32 %v2476_v5  ;;  %v2490_v37 = vand.u32 2147483648, %v2476_v5  ;;  %v2488_v59 = vand.u32 2147483647, %v2476_v5  ;;  %vm2484_vm9 = vweird.f32 %v2476_v5 }
 0x8cd   :  { %3685 = vrcp.f32 %v2477_v40  ;;  %v2452_v57 = vpop.f32.mrf.mxu2  ;;  %v2465_v41 = vpop.f32.mrf.mxu3  ;;  %v2505_v44 = vand.u32 2147483648, %v2477_v40  ;;  %v2503_v13 = vand.u32 2147483647, %v2477_v40  ;;  %vm2499_vm10 = vweird.f32 %v2477_v40 }
 0x8ce   :  { %v2491_v25 = vor.u32 1.1754944e-38, %v2490_v37  ;;  %vm2489_vm1 = vcmp.eq.f32.partialorder %v2488_v59, 8.507059e+37  ;;  %v5765_v57 = vld [vmem:[#allocation86_spill] sm:$0xff]  ;;  %v5766_v41 = vld [vmem:[#allocation45_spill] sm:$0xff]  ;;  %v3458_v37 = vld [vmem:[#allocation11 + $0x38] sm:$0xff] }
 0x8cf   :  { %v2506_v51 = vor.u32 1.1754944e-38, %v2505_v44  ;;  %vm2504_vm4 = vcmp.eq.f32.partialorder %v2503_v13, 8.507059e+37  ;;  %v3481_v0 = vpack.c.bf16 %v5766_v41, %v5765_v57  ;;  %2778 = vmatpush.bf16.msra.mxu0 %v3458_v37  ;;  %v3457_v44 = vld [vmem:[#allocation11 + $0x30] sm:$0xff]  ;;  %v5779_v59 = vld [vmem:[#allocation40_spill] sm:$0xff] }
 0x8d0   :  { %v3682_v24 = vpop.eup %3681 }
 0x8d1   :  { %v2478_v32 = vadd.f32 1.0, %v3682_v24 }
 0x8d2   :  { %v3684_v36 = vpop.eup %3683 }
 0x8d3   :  { %v3686_v55 = vpop.eup %3685  ;;  %v2480_v56 = vmul.f32 %v3684_v36, %v2476_v5  ;;  %3687 = vrcp.f32 %v2478_v32  ;;  %vm2485_vm5 = vweird.f32 %v3684_v36  ;;  %v2520_v50 = vand.u32 2147483648, %v2478_v32  ;;  %2779 = vmatpush.bf16.msra.mxu0 %v3457_v44 }
 0x8d4   :  { %v2495_v10 = vmul.f32 %v3686_v55, %v2477_v40  ;;  %3689 = vtanh.f32 %v2464_v46  ;;  %vm2500_vm8 = vweird.f32 %v3686_v55  ;;  %vm2486_vm11 = vmor %vm2484_vm9, %vm2485_vm5  ;;  %vm2531_vm5 = vcmp.ne.s32.totalorder %v5760_v1, 0  ;;  %v5762_v40 = vld [vmem:[#allocation44_spill] sm:$0xff] }
 0x8d5   :  { %v2481_v22 = vsub.f32 1.0, %v2480_v56  ;;  %vm2501_vm12 = vmor %vm2499_vm10, %vm2500_vm8  ;;  %vm2514_vm8 = vweird.f32 %v2478_v32  ;;  %v2518_v12 = vand.u32 2147483647, %v2478_v32  ;;  %v2521_v8 = vor.u32 1.1754944e-38, %v2520_v50  ;;  %v5774_v56 = vld [vmem:[#allocation49_spill] sm:$0xff] }
 0x8d6   :  { %v2496_v33 = vsub.f32 1.0, %v2495_v10  ;;  %v3469_v1 = vpack.c.bf16 %v5769_v28, %v5770_v30 }
 0x8d7   :  { %v2482_v43 = vmul.f32 %v3684_v36, %v2481_v22  ;;  %v5776_v22 = vld [vmem:[#allocation24_spill] sm:$0xff] }
 0x8d8   :  { %v2497_v6 = vmul.f32 %v3686_v55, %v2496_v33  ;;  %v3490_v33 = vpack.c.bf16 %v5369_v54, %v5308_v62 }
 0x8d9   :  { %v3688_v42 = vpop.eup %3687  ;;  %v2483_v39 = vadd.f32 %v3684_v36, %v2482_v43  ;;  %v3456_v43 = vld [vmem:[#allocation11 + $0x28] sm:$0xff] }
 0x8da   :  { %v2510_v16 = vmul.f32 %v3688_v42, %v2478_v32  ;;  %v2498_v9 = vadd.f32 %v3686_v55, %v2497_v6  ;;  %v3690_v11 = vpop.eup %3689  ;;  %vm2515_vm9 = vweird.f32 %v3688_v42  ;;  %v3484_v32 = vpack.c.bf16 %v5770_v30, %v5769_v28  ;;  %2780 = vmatpush.bf16.msra.mxu0 %v3456_v43  ;;  %v5780_v6 = vld [vmem:[#allocation84_spill] sm:$0xff] }
 0x8db   :  { %v2487_v38 = vsel %vm2486_vm11, %v3684_v36, %v2483_v39  ;;  %vm2516_vm10 = vmor %vm2514_vm8, %vm2515_vm9  ;;  %vm2519_vm11 = vcmp.eq.f32.partialorder %v2518_v12, 8.507059e+37  ;;  %vm5777_vm9 = vcmp.ne.s32.totalorder %v5776_v22, 0  ;;  %v700_v13 = vadd.f32 %v5780_v6, %v5779_v59 }
 0x8dc   :  { %v2511_v7 = vsub.f32 1.0, %v2510_v16  ;;  %v2492_v23 = vsel %vm2489_vm1, %v2491_v25, %v2487_v38  ;;  %v2502_v29 = vsel %vm2501_vm12, %v3686_v55, %v2498_v9  ;;  %vm3477_vm12 = vmpackc.low %vm5575_vm0, %vm5574_vm7  ;;  %v5773_v55 = vld [vmem:[#allocation48_spill] sm:$0xff] }
 0x8dd   :  { %v2507_v4 = vsel %vm2504_vm4, %v2506_v51, %v2502_v29  ;;  %v2526_v48 = vmul.f32 %v3690_v11, %v2492_v23  ;;  %vm3480_vm1 = vmpackc.low %vm1642_vm13, %vm1515_vm14  ;;  %v3487_v10 = vpack.c.bf16 %v5774_v56, %v5773_v55  ;;  %v3455_v16 = vld [vmem:[#allocation11 + $0x20] sm:$0xff]  ;;  %v873_v25 = vadd.f32 %v4760_v61, %v700_v13  ;;  %v3454_v51 = vld [vmem:[#allocation11 + $0x18] sm:$0xff] }
 0x8de   :  { %v2512_v26 = vmul.f32 %v3688_v42, %v2511_v7  ;;  %v2525_v20 = vmul.f32 %v2507_v4, %v5367_v17  ;;  %vm3483_vm4 = vmpackc.low %vm1896_vm2, %vm1769_vm15  ;;  %2781 = vmatpush.bf16.msra.mxu0 %v3455_v16  ;;  %v5783_v29 = vld [vmem:[#allocation82_spill] sm:$0xff] }
 0x8df   :  { %vm3486_vm8 = vmpackc.low %vm5777_vm9, %vm2023_vm6  ;;  %v5784_v4 = vld [vmem:[#allocation106_spill] sm:$0xff] }
 0x8e0   :  { %v2527_v45 = vadd.f32 %v2526_v48, %v2525_v20  ;;  %v2513_v47 = vadd.f32 %v3688_v42, %v2512_v26  ;;  %v778_v48 = vadd.f32 %v5784_v4, %v5783_v29 }
 0x8e2   :  { %3691 = vtanh.f32 %v2527_v45  ;;  %v5396_v34 = vsel %vm2531_vm5, %v2527_v45, %v5367_v17  ;;  %v2517_v2 = vsel %vm2516_vm10, %v3688_v42, %v2513_v47  ;;  %v5761_v17 = vld [vmem:[#allocation109_spill] sm:$0xff]  ;;  %vm5778_vm10 = vcmp.ne.s32.totalorder %v5742_v49, 0  ;;  %2782 = vmatpush.bf16.msra.mxu0 %v3454_v51  ;;  %v3453_v45 = vld [vmem:[#allocation11 + $0x10] sm:$0xff] }
 0x8e3   :  { %v2522_v31 = vsel %vm2519_vm11, %v2521_v8, %v2517_v2  ;;  %v3478_v63 = vpack.c.bf16 %v5762_v40, %v5761_v17  ;;  %vm3489_vm11 = vmpackc.low %vm2404_vm3, %vm5778_vm10  ;;  %v5782_v42 = vld [vmem:[#allocation85_spill] sm:$0xff]  ;;  %v875_v47 = vadd.f32 %v4814_v35, %v778_v48 }
 0x8e4   :  { %v739_v39 = vadd.f32 %v5782_v42, %v5781_v27 }
 0x8e6   :  { %v874_v9 = vadd.f32 %v4762_v58, %v739_v39  ;;  %2783 = vmatpush.bf16.msra.mxu0 %v3453_v45  ;;  %v3452_v58 = vld [vmem:[#allocation11 + $0x8] sm:$0xff] }
 0x8e8   :  { %v3692_v52 = vpop.eup %3691 }
 0x8e9   :  { %v5398_v53 = vmul.f32 %v3692_v52, %v2522_v31 }
 0x8ea   :  { %2784 = vmatpush.bf16.msra.mxu0 %v3452_v58 }
 0x8eb   :  { %v2533_v21 = vsel %vm2531_vm5, %v5398_v53, %v5375_v60 }
 0x8ec   :  { %v2537_v5 = vpack.c.bf16 %v2533_v21, %v2533_v21  ;;  %v3451_v21 = vld [vmem:[#allocation11] sm:$0xff] }
 0x8ee   :  { %2550 = vmatmul.bf16.vlgmr.msrb.gmra.mxu0 %v2537_v5  ;;  %2563 = vmatmul.bf16.vlgmr.msrb.gmra.mxu1 %v2537_v5 }
 0x8ef   :  { %2576 = vmatmul.bf16.vlgmr.msra.gmra.mxu2 %v2537_v5  ;;  %2589 = vmatmul.bf16.vlgmr.msra.gmra.mxu3 %v2537_v5 }
 0x8f0   :  { %2785 = vmatpush.bf16.msra.mxu0 %v3451_v21 }
 0x8fe   :  { %3479 = vmatmul.msk.bf16.vlgmr.msra.gmra.mxu1 %vm3477_vm12, %v3478_v63 }
 0x90e   :  { %3482 = vmatmul.msk.bf16.gmra.mxu1 %vm3480_vm1, %v3481_v0 }
 0x91e   :  { %3485 = vmatmul.msk.bf16.gmra.mxu1 %vm3483_vm4, %v3484_v32  ;;  %v5785_v32 = vld [vmem:[#allocation83_spill] sm:$0xff] }
 0x92e   :  { %3488 = vmatmul.msk.bf16.gmra.mxu1 %vm3486_vm8, %v3487_v10  ;;  %v5786_v10 = vld [vmem:[#allocation107_spill] sm:$0xff] }
 0x93e   :  { %3491 = vmatmul.msk.bf16.gmra.mxu1 %vm3489_vm11, %v3490_v33  ;;  %v817_v33 = vadd.f32 %v5786_v10, %v5785_v32 }
 0x940   :  { %v876_v43 = vadd.f32 %v5675_v14, %v817_v33 }
 0x96b   :  { %v2551_v38 = vpop.f32.mrf.mxu0  ;;  %v2564_v11 = vpop.f32.mrf.mxu1 }
 0x96c   :  { %v2552_v7 = vadd.f32 %v2551_v38, %v873_v25  ;;  %v2565_v23 = vadd.f32 %v2564_v11, %v874_v9 }
 0x96e   :  { %v3312_v26 = vmul.f32 -1.442695, %v2552_v7  ;;  %v3313_v20 = vmul.f32 -1.442695, %v2565_v23 }
 0x970   :  { %3693 = vpow2.f32 %v3312_v26 }
 0x971   :  { %3695 = vpow2.f32 %v3313_v20 }
 0x972   :  { %v2577_v61 = vpop.f32.mrf.mxu2  ;;  %v2590_v50 = vpop.f32.mrf.mxu3 }
 0x973   :  { %v2578_v12 = vadd.f32 %v2577_v61, %v875_v47  ;;  %v2553_v2 = vpop.f32.mrf.mxu0  ;;  %v2566_v8 = vpop.f32.mrf.mxu1  ;;  %v2591_v13 = vadd.f32 %v2590_v50, %v876_v43  ;;  %v3463_v43 = vpack.c.bf16 %v5308_v62, %v5369_v54  ;;  %v3475_v62 = vpack.c.bf16 %v5761_v17, %v5762_v40 }
 0x975   :  { %v3314_v52 = vmul.f32 -1.442695, %v2578_v12 }
 0x976   :  { %v3694_v31 = vpop.eup %3693 }
 0x977   :  { %v3696_v5 = vpop.eup %3695  ;;  %v2603_v63 = vadd.f32 1.0, %v3694_v31  ;;  %3697 = vpow2.f32 %v3314_v52 }
 0x978   :  { %v2604_v0 = vadd.f32 1.0, %v3696_v5 }
 0x979   :  { %3699 = vrcp.f32 %v2603_v63  ;;  %v2617_v9 = vand.u32 2147483648, %v2603_v63  ;;  %v2615_v11 = vand.u32 2147483647, %v2603_v63  ;;  %vm2611_vm4 = vweird.f32 %v2603_v63 }
 0x97a   :  { %3701 = vrcp.f32 %v2604_v0  ;;  %v2579_v35 = vpop.f32.mrf.mxu2  ;;  %v2592_v37 = vpop.f32.mrf.mxu3  ;;  %v2632_v51 = vand.u32 2147483648, %v2604_v0  ;;  %v2630_v23 = vand.u32 2147483647, %v2604_v0  ;;  %vm2626_vm9 = vweird.f32 %v2604_v0 }
 0x97b   :  { %v2618_v48 = vor.u32 1.1754944e-38, %v2617_v9  ;;  %vm2616_vm11 = vcmp.eq.f32.partialorder %v2615_v11, 8.507059e+37  ;;  %v5787_v37 = vld [vmem:[#allocation19_spill] sm:$0xff]  ;;  %v2874_v3 = vpop.f32.mrf.mxu1 }
 0x97c   :  { %v2633_v20 = vor.u32 1.1754944e-38, %v2632_v51  ;;  %vm2631_vm7 = vcmp.eq.f32.partialorder %v2630_v23, 8.507059e+37 }
 0x97d   :  { %v3698_v44 = vpop.eup %3697 }
 0x97e   :  { %v2605_v59 = vadd.f32 1.0, %v3698_v44 }
 0x97f   :  { %v3700_v6 = vpop.eup %3699 }
 0x980   :  { %v3702_v27 = vpop.eup %3701  ;;  %v2607_v42 = vmul.f32 %v3700_v6, %v2603_v63  ;;  %3703 = vrcp.f32 %v2605_v59  ;;  %vm2612_vm12 = vweird.f32 %v3700_v6  ;;  %v2647_v5 = vand.u32 2147483648, %v2605_v59 }
 0x981   :  { %v2622_v39 = vmul.f32 %v3702_v27, %v2604_v0  ;;  %3705 = vtanh.f32 %v2591_v13  ;;  %vm2627_vm1 = vweird.f32 %v3702_v27  ;;  %vm2613_vm8 = vmor %vm2611_vm4, %vm2612_vm12  ;;  %vm2641_vm12 = vweird.f32 %v2605_v59 }
 0x982   :  { %v2608_v16 = vsub.f32 1.0, %v2607_v42  ;;  %vm2628_vm10 = vmor %vm2626_vm9, %vm2627_vm1  ;;  %v2645_v63 = vand.u32 2147483647, %v2605_v59  ;;  %v2648_v32 = vor.u32 1.1754944e-38, %v2647_v5 }
 0x983   :  { %v2623_v25 = vsub.f32 1.0, %v2622_v39  ;;  %v2876_v54 = vpop.f32.mrf.mxu1 }
 0x984   :  { %v2609_v38 = vmul.f32 %v3700_v6, %v2608_v16  ;;  %vm2646_vm4 = vcmp.eq.f32.partialorder %v2645_v63, 8.507059e+37 }
 0x985   :  { %v2624_v7 = vmul.f32 %v3702_v27, %v2623_v25 }
 0x986   :  { %v3704_v29 = vpop.eup %3703  ;;  %v2610_v14 = vadd.f32 %v3700_v6, %v2609_v38 }
 0x987   :  { %v2637_v4 = vmul.f32 %v3704_v29, %v2605_v59  ;;  %v2625_v26 = vadd.f32 %v3702_v27, %v2624_v7  ;;  %v3706_v47 = vpop.eup %3705  ;;  %vm2642_vm0 = vweird.f32 %v3704_v29  ;;  %v3466_v59 = vpack.c.bf16 %v5773_v55, %v5774_v56 }
 0x988   :  { %v2614_v45 = vsel %vm2613_vm8, %v3700_v6, %v2610_v14  ;;  %vm2643_vm1 = vmor %vm2641_vm12, %vm2642_vm0  ;;  %vm5788_vm0 = vcmp.ne.s32.totalorder %v5742_v49, 0  ;;  %v3472_v49 = vpack.c.bf16 %v5765_v57, %v5766_v41 }
 0x989   :  { %v2638_v61 = vsub.f32 1.0, %v2637_v4  ;;  %v2619_v50 = vsel %vm2616_vm11, %v2618_v48, %v2614_v45  ;;  %v2629_v58 = vsel %vm2628_vm10, %v3702_v27, %v2625_v26  ;;  %vm3462_vm10 = vmpackc.low %vm5788_vm0, %vm2404_vm3  ;;  %vm5789_vm11 = vcmp.ne.s32.totalorder %v5776_v22, 0 }
 0x98a   :  { %v2634_v12 = vsel %vm2631_vm7, %v2633_v20, %v2629_v58  ;;  %v2653_v2 = vmul.f32 %v3706_v47, %v2619_v50  ;;  %vm2658_vm7 = vcmp.ne.s32.totalorder %v5787_v37, 0  ;;  %vm3465_vm12 = vmpackc.low %vm2023_vm6, %vm5789_vm11  ;;  %vm5790_vm6 = vcmp.ne.s32.totalorder %v5764_v18, 0 }
 0x98b   :  { %v2639_v8 = vmul.f32 %v3704_v29, %v2638_v61  ;;  %v2652_v52 = vmul.f32 %v2634_v12, %v5396_v34  ;;  %vm3459_vm9 = vmpackc.low %vm2531_vm5, %vm2658_vm7  ;;  %v2879_v57 = vpop.f32.mrf.mxu1 }
 0x98c   :  { %vm3492_vm8 = vmpackc.low %vm2658_vm7, %vm2531_vm5 }
 0x98d   :  { %v2654_v31 = vadd.f32 %v2653_v2, %v2652_v52  ;;  %v2640_v21 = vadd.f32 %v3704_v29, %v2639_v8  ;;  %vm3468_vm5 = vmpackc.low %vm1769_vm15, %vm1896_vm2 }
 0x98e   :  { %vm3471_vm3 = vmpackc.low %vm1515_vm14, %vm1642_vm13 }
 0x98f   :  { %3707 = vtanh.f32 %v2654_v31  ;;  %v2644_v0 = vsel %vm2643_vm1, %v3704_v29, %v2640_v21  ;;  %vm5791_vm1 = vcmp.ne.s32.totalorder %v5763_v19, 0 }
 0x990   :  { %v2649_v33 = vsel %vm2646_vm4, %v2648_v32, %v2644_v0  ;;  %vm3474_vm4 = vmpackc.low %vm5791_vm1, %vm5790_vm6 }
 0x993   :  { %v2881_v18 = vpop.f32.mrf.mxu1 }
 0x995   :  { %v3708_v10 = vpop.eup %3707 }
 0x996   :  { %v2656_v35 = vmul.f32 %v3708_v10, %v2649_v33 }
 0x998   :  { %v3460_v34 = vpack.c.bf16 %v5398_v53, %v2656_v35  ;;  %v3493_v44 = vpack.c.bf16 %v2656_v35, %v5398_v53  ;;  %v3516_v53 = vld [vmem:[%s5531_s8] ss:$0 sm:$0xff] }
 0x99a   :  { %3461 = vmatmul.msk.bf16.vlgmr.msra.gmra.mxu0 %vm3459_vm9, %v3460_v34  ;;  %3494 = vmatmul.msk.bf16.gmra.mxu1 %vm3492_vm8, %v3493_v44 }
 0x99b   :  { %v2884_v46 = vpop.f32.mrf.mxu1 }
 0x9a3   :  { %v2886_v22 = vpop.f32.mrf.mxu1 }
 0x9aa   :  { %3464 = vmatmul.msk.bf16.gmra.mxu0 %vm3462_vm10, %v3463_v43 }
 0x9ab   :  { %v2889_v42 = vpop.f32.mrf.mxu1 }
 0x9b3   :  { %v2891_v38 = vpop.f32.mrf.mxu1 }
 0x9ba   :  { %3467 = vmatmul.msk.bf16.gmra.mxu0 %vm3465_vm12, %v3466_v59 }
 0x9bb   :  { %v2894_v14 = vpop.f32.mrf.mxu1 }
 0x9c3   :  { %v2896_v20 = vpop.f32.mrf.mxu1 }
 0x9ca   :  { %3470 = vmatmul.msk.bf16.gmra.mxu0 %vm3468_vm5, %v3469_v1 }
 0x9da   :  { %3473 = vmatmul.msk.bf16.gmra.mxu0 %vm3471_vm3, %v3472_v49 }
 0x9ea   :  { %3476 = vmatmul.msk.bf16.gmra.mxu0 %vm3474_vm4, %v3475_v62 }
 0xa17   :  { %v2787_v41 = vpop.f32.mrf.mxu0  ;;  %v2899_v50 = vpop.f32.mrf.mxu1 }
 0xa18   :  { %v2875_v24 = vadd.f32 %v2874_v3, %v2787_v41 }
 0xa1a   :  { %v2908_v60 = vadd.f32 %v3516_v53, %v2875_v24 }
 0xa1c   :  { %2920 = vst [vmem:[%s5532_s9] sm:$0xff] %v2908_v60 }
 0xa1f   :  { %v2789_v17 = vpop.f32.mrf.mxu0  ;;  %v2901_v8 = vpop.f32.mrf.mxu1 }
 0xa20   :  { %v2877_v40 = vadd.f32 %v2876_v54, %v2789_v17 }
 0xa22   :  { %v2909_v19 = vadd.f32 %v3516_v53, %v2877_v40 }
 0xa24   :  { %2921 = vst [vmem:[%s5532_s9 + $0x8] sm:$0xff] %v2909_v19 }
 0xa27   :  { %v2792_v28 = vpop.f32.mrf.mxu0 }
 0xa28   :  { %v2880_v30 = vadd.f32 %v2879_v57, %v2792_v28 }
 0xa2a   :  { %v2910_v36 = vadd.f32 %v3516_v53, %v2880_v30 }
 0xa2c   :  { %2922 = vst [vmem:[%s5532_s9 + $0x10] sm:$0xff] %v2910_v36 }
 0xa2f   :  { %v2794_v55 = vpop.f32.mrf.mxu0 }
 0xa30   :  { %v2882_v56 = vadd.f32 %v2881_v18, %v2794_v55 }
 0xa32   :  { %v2911_v15 = vadd.f32 %v3516_v53, %v2882_v56 }
 0xa34   :  { %2923 = vst [vmem:[%s5532_s9 + $0x18] sm:$0xff] %v2911_v15 }
 0xa37   :  { %v2797_v6 = vpop.f32.mrf.mxu0 }
 0xa38   :  { %v2885_v13 = vadd.f32 %v2884_v46, %v2797_v6 }
 0xa3a   :  { %v2912_v27 = vadd.f32 %v3516_v53, %v2885_v13 }
 0xa3c   :  { %2924 = vst [vmem:[%s5532_s9 + $0x20] sm:$0xff] %v2912_v27 }
 0xa3f   :  { %v2799_v39 = vpop.f32.mrf.mxu0 }
 0xa40   :  { %v2887_v16 = vadd.f32 %v2886_v22, %v2799_v39 }
 0xa42   :  { %v2913_v25 = vadd.f32 %v3516_v53, %v2887_v16 }
 0xa44   :  { %2925 = vst [vmem:[%s5532_s9 + $0x28] sm:$0xff] %v2913_v25 }
 0xa47   :  { %v2802_v9 = vpop.f32.mrf.mxu0 }
 0xa48   :  { %v2890_v51 = vadd.f32 %v2889_v42, %v2802_v9 }
 0xa4a   :  { %v2914_v11 = vadd.f32 %v3516_v53, %v2890_v51 }
 0xa4c   :  { %2926 = vst [vmem:[%s5532_s9 + $0x30] sm:$0xff] %v2914_v11 }
 0xa4f   :  { %v2804_v7 = vpop.f32.mrf.mxu0 }
 0xa50   :  { %v2892_v23 = vadd.f32 %v2891_v38, %v2804_v7 }
 0xa52   :  { %v2915_v29 = vadd.f32 %v3516_v53, %v2892_v23 }
 0xa54   :  { %2927 = vst [vmem:[%s5532_s9 + $0x38] sm:$0xff] %v2915_v29 }
 0xa57   :  { %v2807_v4 = vpop.f32.mrf.mxu0 }
 0xa58   :  { %v2895_v48 = vadd.f32 %v2894_v14, %v2807_v4 }
 0xa5a   :  { %v2916_v26 = vadd.f32 %v3516_v53, %v2895_v48 }
 0xa5c   :  { %2928 = vst [vmem:[%s5532_s9 + $0x40] sm:$0xff] %v2916_v26 }
 0xa5f   :  { %v2809_v45 = vpop.f32.mrf.mxu0 }
 0xa60   :  { %v2897_v47 = vadd.f32 %v2896_v20, %v2809_v45 }
 0xa62   :  { %v2917_v61 = vadd.f32 %v3516_v53, %v2897_v47 }
 0xa64   :  { %2929 = vst [vmem:[%s5532_s9 + $0x48] sm:$0xff] %v2917_v61 }
 0xa67   :  { %v2812_v58 = vpop.f32.mrf.mxu0 }
 0xa68   :  { %v2900_v12 = vadd.f32 %v2899_v50, %v2812_v58 }
 0xa6a   :  { %v2918_v2 = vadd.f32 %v3516_v53, %v2900_v12 }
 0xa6c   :  { %2930 = vst [vmem:[%s5532_s9 + $0x50] sm:$0xff] %v2918_v2 }
 0xa6f   :  { %v2814_v52 = vpop.f32.mrf.mxu0 }
 0xa70   :  { %v2902_v31 = vadd.f32 %v2901_v8, %v2814_v52 }
 0xa72   :  { %v2919_v21 = vadd.f32 %v3516_v53, %v2902_v31 }
 0xa74   :  { %2931 = vst [vmem:[%s5532_s9 + $0x58] sm:$0xff] %v2919_v21 }
 0xa75   :  { %2936 = vsyncpa [#allocation7], 1 }
 0xa76   :  { %2937 = vsyncpa [#allocation9], 1 }
 0xa77   :  { %2938 = vsyncpa [#allocation12], 1 }

</bundles_post_ra>
